<compile_context>
chip_gen: v5e
topology: v5e:2x2
jax: 0.10.0
libtpu: 0.0.40
codegen_flags: <defaults>
</compile_context>

<pallas_src>
import jax
import jax.numpy as jnp
import numpy as np
from jax import lax
from jax.experimental import pallas as pl
from jax.experimental.pallas import tpu as pltpu

LEAKY_SLOPE = 0.01  # PyTorch nn.LeakyReLU default
C1, C2, C3 = 32, 64, 128


def _leaky(x):
    return jnp.where(x >= 0, x, LEAKY_SLOPE * x)


# ----------------------------------------------------------------------------
# Tiling / VMEM heuristics
# ----------------------------------------------------------------------------
def _per_sample_vmem_bytes(L, K):
    """Rough live-activation bytes per sample inside the kernel."""
    b = (L + K - 1) * 4                  # padded input (f32)
    b += L * C1 * (4 + 2)                # h1 f32 epilogue + bf16 copy
    b += L * K * C1 * 2                  # im2col operand for conv2 (bf16)
    b += L * C2 * (4 + 2)                # h2 f32 epilogue + bf16 copy
    b += L * K * C2 * 2                  # im2col operand for conv3 (bf16)
    b += L * C3 * 4 * 2                  # h3 f32 + reduction temporaries
    return b


def _choose_block_b(B, L, K, vmem_cap_bytes=24 << 20):
    """Pick a batch tile: MXU-sized M = block_b*L, VMEM-capped, >=2 grid steps.

    - block_b*L >= 256 fills MXU passes (v6e/v7x 256-deep; multiples of 512
      also suit v5e's 4x128^2 MXUs at larger B).
    - cap ~512 samples / ~24 MiB of live activations keeps the tile safe on
      v7x's 64 MiB VMEM (do not blindly reuse a v5e/v6e-tuned tile).
    - >= 2 grid steps lets the "parallel" batch axis shard across v7x's two
      TensorCores (no effect on v5e/v6e, 1 TC/chip).
    """
    per_sample = _per_sample_vmem_bytes(L, K)
    cap = max(8, min(512, vmem_cap_bytes // per_sample))
    cands = [b for b in range(8, min(B, cap) + 1, 8) if B % b == 0]
    if not cands:
        return B                          # toy batch: single full-batch step
    multi = [b for b in cands if B // b >= 2]
    good = [b for b in multi if b * L >= 256]
    if good:
        return max(good)
    if multi:
        return max(multi)
    return max(cands)


def _vmem_limit_bytes(block_b, L, K):
    est = block_b * _per_sample_vmem_bytes(L, K)
    # Input/output double-buffers are tiny vs. the in-kernel temps.  2x
    # headroom, floored near the default scoped budget, capped at 48 MiB so
    # the same setting leaves headroom on v7x (64 MiB physical VMEM).
    return int(min(48 << 20, max(32 << 20, 2 * est)))


# ----------------------------------------------------------------------------
# Kernel
# ----------------------------------------------------------------------------
def _conv_same_im2col(h, w_flat, b, K, pad_l, pad_r, out_bf16):
    """'same' conv as one fused im2col matmul (contraction depth K*Cin).

    h:      (Bt, L, Cin) bf16 activation (value/register resident).
    w_flat: (K*Cin, Cout) bf16 weight, row index = t*Cin + c (matches the
            tap-concat ordering below).
    b:      (1, Cout) f32 bias.
    Returns bias+LeakyReLU output, f32 (or bf16 if out_bf16 for the next
    layer's im2col).  Matmul accumulates in f32 on the MXU.
    """
    Bt, L, Cin = h.shape
    pieces = []
    if pad_l:
        pieces.append(jnp.zeros((Bt, pad_l, Cin), h.dtype))
    pieces.append(h)
    if pad_r:
        pieces.append(jnp.zeros((Bt, pad_r, Cin), h.dtype))
    hp = jnp.concatenate(pieces, axis=1) if len(pieces) > 1 else h  # bf16 halo

    # Tap-shifted views concatenated along channels -> (Bt, L, K*Cin), bf16.
    cols = [hp[:, t:t + L, :] for t in range(K)]
    im2col = jnp.concatenate(cols, axis=2) if K > 1 else cols[0]

    a = im2col.reshape(Bt * L, K * Cin)                       # bf16, no cast
    y = jnp.dot(a, w_flat, preferred_element_type=jnp.float32)  # (Bt*L, Cout)
    y = y.reshape(Bt, L, w_flat.shape[1]) + b
    y = _leaky(y)
    return y.astype(jnp.bfloat16) if out_bf16 else y


def _make_kernel(Bt, L, K):
    PAD_L = (K - 1) // 2
    PAD_R = (K - 1) - PAD_L

    def kernel(x_ref, w1_ref, b1_ref, w2_ref, b2_ref, w3_ref, b3_ref,
               wl_ref, bl_ref, out_ref):
        x = x_ref[...]                                        # (Bt, L) f32

        # In-kernel 'same' halo for conv1 (zero-slab concat; x arrives
        # unpadded, no host-side jnp.pad / extra HBM copy).
        pieces = []
        if PAD_L:
            pieces.append(jnp.zeros((Bt, PAD_L), x.dtype))
        pieces.append(x)
        if PAD_R:
            pieces.append(jnp.zeros((Bt, PAD_R), x.dtype))
        xpad = jnp.concatenate(pieces, axis=1) if len(pieces) > 1 else x

        # ---- conv1: Cin = 1 -> per-tap broadcast multiply on the VPU ------
        # t=0 tap initializes the accumulator fused with the bias (no zeros
        # materialization, no separate full-tensor bias add).
        h1 = xpad[:, 0:L][:, :, None] * w1_ref[0] + b1_ref[...]
        for t in range(1, K):
            h1 = h1 + xpad[:, t:t + L][:, :, None] * w1_ref[t]
        h1 = _leaky(h1).astype(jnp.bfloat16)                  # bf16 for im2col

        # ---- conv2 / conv3: fused im2col matmuls on the MXU ----------------
        h2 = _conv_same_im2col(h1, w2_ref[...], b2_ref[...], K, PAD_L, PAD_R,
                               out_bf16=True)
        h3 = _conv_same_im2col(h2, w3_ref[...], b3_ref[...], K, PAD_L, PAD_R,
                               out_bf16=False)                # f32 for linear

        # ---- linear(128*L -> 1) -------------------------------------------
        # Multiply fused into an L-first (sublane) reduction, then one lane
        # reduce per sample: Bt XLU lane-reductions instead of Bt*L, and no
        # full (Bt, L, 128) f32 prod temporary.
        partial = jnp.sum(h3 * wl_ref[...][None, :, :], axis=1)  # (Bt, C3)
        logit = jnp.sum(partial, axis=1, keepdims=True) + bl_ref[...]
        out_ref[...] = jax.nn.sigmoid(logit)

    return kernel


# ----------------------------------------------------------------------------
# Wrapper
# ----------------------------------------------------------------------------
def discriminator_forward(x, params, K, block_b=None):
    """x: (B, L) float32.  params: dict of kernel-layout parameters."""
    B, L = x.shape

    if block_b is None:
        block_b = _choose_block_b(B, L, K)
    assert B % block_b == 0 and (block_b == B or block_b % 8 == 0)
    grid = (B // block_b,)

    kernel = _make_kernel(block_b, L, K)

    def rep_spec(arr):
        nd = arr.ndim
        return pl.BlockSpec(arr.shape, lambda i, _nd=nd: (0,) * _nd)

    return pl.pallas_call(
        kernel,
        out_shape=jax.ShapeDtypeStruct((B, 1), jnp.float32),
        grid=grid,
        in_specs=[
            pl.BlockSpec((block_b, L), lambda i: (i, 0)),
            rep_spec(params["w1"]), rep_spec(params["b1"]),
            rep_spec(params["w2"]), rep_spec(params["b2"]),
            rep_spec(params["w3"]), rep_spec(params["b3"]),
            rep_spec(params["wl"]), rep_spec(params["bl"]),
        ],
        out_specs=pl.BlockSpec((block_b, 1), lambda i: (i, 0)),
        compiler_params=pltpu.CompilerParams(
            dimension_semantics=("parallel",),
            vmem_limit_bytes=_vmem_limit_bytes(block_b, L, K)),
    )(x,
      params["w1"], params["b1"],
      params["w2"], params["b2"],
      params["w3"], params["b3"],
      params["wl"], params["bl"])


# ----------------------------------------------------------------------------
# Pure-JAX reference & parameter conversion
# ----------------------------------------------------------------------------
def ref_forward(x, tp, K):
    """Pure-JAX f32 reference using PyTorch-layout parameters (NCW)."""
    B, L = x.shape
    h = x[:, None, :]  # (B, 1, L)
    for w, b in [(tp["w1"], tp["b1"]), (tp["w2"], tp["b2"]), (tp["w3"], tp["b3"])]:
        h = lax.conv_general_dilated(
            h, w, window_strides=(1,), padding="SAME",
            dimension_numbers=("NCH", "OIH", "NCH")) + b[None, :, None]
        h = _leaky(h)
    flat = h.reshape(B, -1)                   # matches torch .view(B, 128*L)
    logit = flat @ tp["wl"].T + tp["bl"]
    return jax.nn.sigmoid(logit)


def torch_to_kernel_params(tp, L):
    """Convert PyTorch-layout params to the kernel's channels-last layout.

    conv2/conv3 weights are pre-flattened to (K*Cin, Cout) (row = t*Cin + c,
    matching the in-kernel im2col ordering) and cast to bf16 for the MXU.
    """
    K = tp["w1"].shape[-1]
    w2 = jnp.transpose(tp["w2"], (2, 1, 0)).reshape(K * C1, C2)   # (K*32, 64)
    w3 = jnp.transpose(tp["w3"], (2, 1, 0)).reshape(K * C2, C3)   # (K*64, 128)
    return {
        "w1": jnp.transpose(tp["w1"], (2, 1, 0)),          # (K, 1, 32) f32 (VPU)
        "b1": tp["b1"].reshape(1, -1),
        "w2": w2.astype(jnp.bfloat16),
        "b2": tp["b2"].reshape(1, -1),
        "w3": w3.astype(jnp.bfloat16),
        "b3": tp["b3"].reshape(1, -1),
        # torch flat index is c*L + l  ->  reshape (128, L) and transpose.
        "wl": tp["wl"].reshape(C3, L).T,                   # (L, 128) f32
        "bl": tp["bl"].reshape(1, 1),
    }


if __name__ == "__main__":
    config = {"output_len": 16, "kernel_size": 3}
    # Small demo batch that still exercises the tiled path: B=32, L=16 gives
    # block_b=16 -> 2 "parallel" grid steps (v7x megacore) with M=256 rows per
    # im2col matmul.
    B = 32
    L = config["output_len"]
    K = config["kernel_size"]

    key = jax.random.PRNGKey(0)
    ks = jax.random.split(key, 9)
    torch_params = {
        "w1": jax.random.normal(ks[0], (32, 1, K), jnp.float32) * 0.20,
        "b1": jax.random.normal(ks[1], (32,), jnp.float32) * 0.10,
        "w2": jax.random.normal(ks[2], (64, 32, K), jnp.float32) * 0.05,
        "b2": jax.random.normal(ks[3], (64,), jnp.float32) * 0.10,
        "w3": jax.random.normal(ks[4], (128, 64, K), jnp.float32) * 0.05,
        "b3": jax.random.normal(ks[5], (128,), jnp.float32) * 0.10,
        "wl": jax.random.normal(ks[6], (1, 128 * L), jnp.float32) * 0.02,
        "bl": jax.random.normal(ks[7], (1,), jnp.float32) * 0.10,
    }
    x = jax.random.normal(ks[8], (B, L), jnp.float32)

    kernel_params = torch_to_kernel_params(torch_params, L)

    out = discriminator_forward(x, kernel_params, K)
    out = jax.block_until_ready(out)

    ref = ref_forward(x, torch_params, K)
    # Tolerance slightly relaxed vs. pure-f32 because conv2/conv3 matmul
    # operands (and the activations feeding them) are bf16 with f32
    # accumulation; error at the sigmoid output is well below this bound.
    np.testing.assert_allclose(np.asarray(out), np.asarray(ref),
                               atol=2e-3, rtol=2e-3)
    print("KERNEL_OK")
</pallas_src>

<mosaic_0001>
module attributes {stable_mosaic.version = 11 : i64} {
  func.func @kernel(%arg0: i32, %arg1: memref<16x16xf32, #tpu.memory_space<vmem>>, %arg2: memref<3x1x32xf32, #tpu.memory_space<vmem>>, %arg3: memref<1x32xf32, #tpu.memory_space<vmem>>, %arg4: memref<96x64xbf16, #tpu.memory_space<vmem>>, %arg5: memref<1x64xf32, #tpu.memory_space<vmem>>, %arg6: memref<192x128xbf16, #tpu.memory_space<vmem>>, %arg7: memref<1x128xf32, #tpu.memory_space<vmem>>, %arg8: memref<16x128xf32, #tpu.memory_space<vmem>>, %arg9: memref<1x1xf32, #tpu.memory_space<vmem>>, %arg10: memref<16x1xf32, #tpu.memory_space<vmem>>) attributes {dimension_semantics = [#tpu.dimension_semantics<parallel>], iteration_bounds = array<i64: 2>, scalar_prefetch = 0 : i64, scratch_operands = 0 : i64, tpu.core_type = #tpu.core_type<tc>, window_params = [{transform_indices = @transform_0, window_bounds = array<i64: 16, 16>}, {pipeline_mode = #tpu.pipeline_mode<synchronous>, transform_indices = @transform_1, window_bounds = array<i64: 3, 1, 32>}, {pipeline_mode = #tpu.pipeline_mode<synchronous>, transform_indices = @transform_2, window_bounds = array<i64: 1, 32>}, {pipeline_mode = #tpu.pipeline_mode<synchronous>, transform_indices = @transform_3, window_bounds = array<i64: 96, 64>}, {pipeline_mode = #tpu.pipeline_mode<synchronous>, transform_indices = @transform_4, window_bounds = array<i64: 1, 64>}, {pipeline_mode = #tpu.pipeline_mode<synchronous>, transform_indices = @transform_5, window_bounds = array<i64: 192, 128>}, {pipeline_mode = #tpu.pipeline_mode<synchronous>, transform_indices = @transform_6, window_bounds = array<i64: 1, 128>}, {pipeline_mode = #tpu.pipeline_mode<synchronous>, transform_indices = @transform_7, window_bounds = array<i64: 16, 128>}, {pipeline_mode = #tpu.pipeline_mode<synchronous>, transform_indices = @transform_8, window_bounds = array<i64: 1, 1>}, {transform_indices = @transform_9, window_bounds = array<i64: 16, 1>}]} {
    %c0 = arith.constant 0 : index
    %c0_0 = arith.constant 0 : index
    %0 = vector.load %arg1[%c0, %c0_0] : memref<16x16xf32, #tpu.memory_space<vmem>>, vector<16x16xf32>
    %cst = arith.constant 0.000000e+00 : f32
    %1 = vector.broadcast %cst : f32 to vector<16x1xf32>
    %cst_1 = arith.constant 0.000000e+00 : f32
    %2 = vector.broadcast %cst_1 : f32 to vector<16x1xf32>
    %3 = tpu.concatenate %1, %0, %2 in 1 : vector<16x1xf32>, vector<16x16xf32>, vector<16x1xf32> -> vector<16x18xf32>
    %4 = vector.extract_strided_slice %3 {offsets = [0, 0], sizes = [16, 16], strides = [1, 1]} : vector<16x18xf32> to vector<16x16xf32>
    %5 = vector.shape_cast %4 : vector<16x16xf32> to vector<16x16x1xf32>
    %c0_2 = arith.constant 0 : index
    %c0_3 = arith.constant 0 : index
    %c0_4 = arith.constant 0 : index
    %6 = vector.load %arg2[%c0_2, %c0_3, %c0_4] : memref<3x1x32xf32, #tpu.memory_space<vmem>>, vector<1x1x32xf32>
    %7 = vector.shape_cast %6 : vector<1x1x32xf32> to vector<1x32xf32>
    %8 = vector.shape_cast %7 : vector<1x32xf32> to vector<1x1x32xf32>
    %9 = vector.broadcast %5 : vector<16x16x1xf32> to vector<16x16x32xf32>
    %10 = vector.broadcast %8 : vector<1x1x32xf32> to vector<16x16x32xf32>
    %11 = arith.mulf %9, %10 : vector<16x16x32xf32>
    %c0_5 = arith.constant 0 : index
    %c0_6 = arith.constant 0 : index
    %12 = vector.load %arg3[%c0_5, %c0_6] : memref<1x32xf32, #tpu.memory_space<vmem>>, vector<1x32xf32>
    %13 = vector.shape_cast %12 : vector<1x32xf32> to vector<1x1x32xf32>
    %14 = vector.broadcast %13 : vector<1x1x32xf32> to vector<16x16x32xf32>
    %15 = arith.addf %11, %14 : vector<16x16x32xf32>
    %16 = vector.extract_strided_slice %3 {offsets = [0, 1], sizes = [16, 16], strides = [1, 1]} : vector<16x18xf32> to vector<16x16xf32>
    %17 = vector.shape_cast %16 : vector<16x16xf32> to vector<16x16x1xf32>
    %c1 = arith.constant 1 : index
    %c0_7 = arith.constant 0 : index
    %c0_8 = arith.constant 0 : index
    %18 = vector.load %arg2[%c1, %c0_7, %c0_8] : memref<3x1x32xf32, #tpu.memory_space<vmem>>, vector<1x1x32xf32>
    %19 = vector.shape_cast %18 : vector<1x1x32xf32> to vector<1x32xf32>
    %20 = vector.shape_cast %19 : vector<1x32xf32> to vector<1x1x32xf32>
    %21 = vector.broadcast %17 : vector<16x16x1xf32> to vector<16x16x32xf32>
    %22 = vector.broadcast %20 : vector<1x1x32xf32> to vector<16x16x32xf32>
    %23 = arith.mulf %21, %22 : vector<16x16x32xf32>
    %24 = arith.addf %15, %23 : vector<16x16x32xf32>
    %25 = vector.extract_strided_slice %3 {offsets = [0, 2], sizes = [16, 16], strides = [1, 1]} : vector<16x18xf32> to vector<16x16xf32>
    %26 = vector.shape_cast %25 : vector<16x16xf32> to vector<16x16x1xf32>
    %c2 = arith.constant 2 : index
    %c0_9 = arith.constant 0 : index
    %c0_10 = arith.constant 0 : index
    %27 = vector.load %arg2[%c2, %c0_9, %c0_10] : memref<3x1x32xf32, #tpu.memory_space<vmem>>, vector<1x1x32xf32>
    %28 = vector.shape_cast %27 : vector<1x1x32xf32> to vector<1x32xf32>
    %29 = vector.shape_cast %28 : vector<1x32xf32> to vector<1x1x32xf32>
    %30 = vector.broadcast %26 : vector<16x16x1xf32> to vector<16x16x32xf32>
    %31 = vector.broadcast %29 : vector<1x1x32xf32> to vector<16x16x32xf32>
    %32 = arith.mulf %30, %31 : vector<16x16x32xf32>
    %33 = arith.addf %24, %32 : vector<16x16x32xf32>
    %cst_11 = arith.constant 0.000000e+00 : f32
    %34 = vector.broadcast %cst_11 : f32 to vector<16x16x32xf32>
    %35 = arith.cmpf oge, %33, %34 : vector<16x16x32xf32>
    %cst_12 = arith.constant 0.00999999977 : f32
    %36 = vector.broadcast %cst_12 : f32 to vector<16x16x32xf32>
    %37 = arith.mulf %36, %33 : vector<16x16x32xf32>
    %38 = arith.select %35, %33, %37 : vector<16x16x32xi1>, vector<16x16x32xf32>
    %39 = arith.truncf %38 : vector<16x16x32xf32> to vector<16x16x32xbf16>
    %c0_13 = arith.constant 0 : index
    %c0_14 = arith.constant 0 : index
    %40 = vector.load %arg4[%c0_13, %c0_14] : memref<96x64xbf16, #tpu.memory_space<vmem>>, vector<96x64xbf16>
    %c0_15 = arith.constant 0 : index
    %c0_16 = arith.constant 0 : index
    %41 = vector.load %arg5[%c0_15, %c0_16] : memref<1x64xf32, #tpu.memory_space<vmem>>, vector<1x64xf32>
    %cst_17 = arith.constant 0.000000e+00 : bf16
    %42 = vector.broadcast %cst_17 : bf16 to vector<16x1x32xbf16>
    %cst_18 = arith.constant 0.000000e+00 : bf16
    %43 = vector.broadcast %cst_18 : bf16 to vector<16x1x32xbf16>
    %44 = tpu.concatenate %42, %39, %43 in 1 : vector<16x1x32xbf16>, vector<16x16x32xbf16>, vector<16x1x32xbf16> -> vector<16x18x32xbf16>
    %45 = vector.extract_strided_slice %44 {offsets = [0, 0, 0], sizes = [16, 16, 32], strides = [1, 1, 1]} : vector<16x18x32xbf16> to vector<16x16x32xbf16>
    %46 = vector.extract_strided_slice %44 {offsets = [0, 1, 0], sizes = [16, 16, 32], strides = [1, 1, 1]} : vector<16x18x32xbf16> to vector<16x16x32xbf16>
    %47 = vector.extract_strided_slice %44 {offsets = [0, 2, 0], sizes = [16, 16, 32], strides = [1, 1, 1]} : vector<16x18x32xbf16> to vector<16x16x32xbf16>
    %48 = tpu.concatenate %45, %46, %47 in 2 : vector<16x16x32xbf16>, vector<16x16x32xbf16>, vector<16x16x32xbf16> -> vector<16x16x96xbf16>
    %49 = vector.shape_cast %48 : vector<16x16x96xbf16> to vector<256x96xbf16>
    %cst_19 = arith.constant dense<0.000000e+00> : vector<256x64xf32>
    %50 = tpu.matmul %49, %40, %cst_19 {dimension_numbers = #tpu.dot_dimension_numbers<[1], [0], [0], [1], [0, 0, 1, 1], [], []>} : vector<256x96xbf16>, vector<96x64xbf16>, vector<256x64xf32> -> vector<256x64xf32>
    %51 = vector.shape_cast %50 : vector<256x64xf32> to vector<16x16x64xf32>
    %52 = vector.shape_cast %41 : vector<1x64xf32> to vector<1x1x64xf32>
    %53 = vector.broadcast %52 : vector<1x1x64xf32> to vector<16x16x64xf32>
    %54 = arith.addf %51, %53 : vector<16x16x64xf32>
    %cst_20 = arith.constant 0.000000e+00 : f32
    %55 = vector.broadcast %cst_20 : f32 to vector<16x16x64xf32>
    %56 = arith.cmpf oge, %54, %55 : vector<16x16x64xf32>
    %cst_21 = arith.constant 0.00999999977 : f32
    %57 = vector.broadcast %cst_21 : f32 to vector<16x16x64xf32>
    %58 = arith.mulf %57, %54 : vector<16x16x64xf32>
    %59 = arith.select %56, %54, %58 : vector<16x16x64xi1>, vector<16x16x64xf32>
    %60 = arith.truncf %59 : vector<16x16x64xf32> to vector<16x16x64xbf16>
    %c0_22 = arith.constant 0 : index
    %c0_23 = arith.constant 0 : index
    %61 = vector.load %arg6[%c0_22, %c0_23] : memref<192x128xbf16, #tpu.memory_space<vmem>>, vector<192x128xbf16>
    %c0_24 = arith.constant 0 : index
    %c0_25 = arith.constant 0 : index
    %62 = vector.load %arg7[%c0_24, %c0_25] : memref<1x128xf32, #tpu.memory_space<vmem>>, vector<1x128xf32>
    %cst_26 = arith.constant 0.000000e+00 : bf16
    %63 = vector.broadcast %cst_26 : bf16 to vector<16x1x64xbf16>
    %cst_27 = arith.constant 0.000000e+00 : bf16
    %64 = vector.broadcast %cst_27 : bf16 to vector<16x1x64xbf16>
    %65 = tpu.concatenate %63, %60, %64 in 1 : vector<16x1x64xbf16>, vector<16x16x64xbf16>, vector<16x1x64xbf16> -> vector<16x18x64xbf16>
    %66 = vector.extract_strided_slice %65 {offsets = [0, 0, 0], sizes = [16, 16, 64], strides = [1, 1, 1]} : vector<16x18x64xbf16> to vector<16x16x64xbf16>
    %67 = vector.extract_strided_slice %65 {offsets = [0, 1, 0], sizes = [16, 16, 64], strides = [1, 1, 1]} : vector<16x18x64xbf16> to vector<16x16x64xbf16>
    %68 = vector.extract_strided_slice %65 {offsets = [0, 2, 0], sizes = [16, 16, 64], strides = [1, 1, 1]} : vector<16x18x64xbf16> to vector<16x16x64xbf16>
    %69 = tpu.concatenate %66, %67, %68 in 2 : vector<16x16x64xbf16>, vector<16x16x64xbf16>, vector<16x16x64xbf16> -> vector<16x16x192xbf16>
    %70 = vector.shape_cast %69 : vector<16x16x192xbf16> to vector<256x192xbf16>
    %cst_28 = arith.constant dense<0.000000e+00> : vector<256x128xf32>
    %71 = tpu.matmul %70, %61, %cst_28 {dimension_numbers = #tpu.dot_dimension_numbers<[1], [0], [0], [1], [0, 0, 1, 1], [], []>} : vector<256x192xbf16>, vector<192x128xbf16>, vector<256x128xf32> -> vector<256x128xf32>
    %72 = vector.shape_cast %71 : vector<256x128xf32> to vector<16x16x128xf32>
    %73 = vector.shape_cast %62 : vector<1x128xf32> to vector<1x1x128xf32>
    %74 = vector.broadcast %73 : vector<1x1x128xf32> to vector<16x16x128xf32>
    %75 = arith.addf %72, %74 : vector<16x16x128xf32>
    %cst_29 = arith.constant 0.000000e+00 : f32
    %76 = vector.broadcast %cst_29 : f32 to vector<16x16x128xf32>
    %77 = arith.cmpf oge, %75, %76 : vector<16x16x128xf32>
    %cst_30 = arith.constant 0.00999999977 : f32
    %78 = vector.broadcast %cst_30 : f32 to vector<16x16x128xf32>
    %79 = arith.mulf %78, %75 : vector<16x16x128xf32>
    %80 = arith.select %77, %75, %79 : vector<16x16x128xi1>, vector<16x16x128xf32>
    %c0_31 = arith.constant 0 : index
    %c0_32 = arith.constant 0 : index
    %81 = vector.load %arg8[%c0_31, %c0_32] : memref<16x128xf32, #tpu.memory_space<vmem>>, vector<16x128xf32>
    %82 = vector.shape_cast %81 : vector<16x128xf32> to vector<1x16x128xf32>
    %83 = vector.broadcast %82 : vector<1x16x128xf32> to vector<16x16x128xf32>
    %84 = arith.mulf %80, %83 : vector<16x16x128xf32>
    %cst_33 = arith.constant dense<0.000000e+00> : vector<16x128xf32>
    %85 = vector.multi_reduction <add>, %84, %cst_33 [1] : vector<16x16x128xf32> to vector<16x128xf32>
    %cst_34 = arith.constant dense<0.000000e+00> : vector<16xf32>
    %86 = vector.multi_reduction <add>, %85, %cst_34 [1] : vector<16x128xf32> to vector<16xf32>
    %87 = vector.shape_cast %86 : vector<16xf32> to vector<16x1xf32>
    %c0_35 = arith.constant 0 : index
    %c0_36 = arith.constant 0 : index
    %88 = vector.load %arg9[%c0_35, %c0_36] : memref<1x1xf32, #tpu.memory_space<vmem>>, vector<1x1xf32>
    %89 = vector.broadcast %88 : vector<1x1xf32> to vector<16x1xf32>
    %90 = arith.addf %87, %89 : vector<16x1xf32>
    %91 = arith.negf %90 : vector<16x1xf32>
    %92 = math.exp %91 : vector<16x1xf32>
    %cst_37 = arith.constant 1.000000e+00 : f32
    %93 = vector.broadcast %cst_37 : f32 to vector<16x1xf32>
    %94 = arith.addf %93, %92 : vector<16x1xf32>
    %95 = arith.divf %93, %94 : vector<16x1xf32>
    %c0_38 = arith.constant 0 : index
    %c0_39 = arith.constant 0 : index
    %96 = vector.load %arg10[%c0_38, %c0_39] : memref<16x1xf32, #tpu.memory_space<vmem>>, vector<16x1xf32>
    tpu.vector_store %arg10[%c0_38, %c0_39], %95 {strides = array<i32>} : memref<16x1xf32, #tpu.memory_space<vmem>>, vector<16x1xf32>,
    return
  }
  func.func @transform_0(%arg0: i32) -> (i32, i32) {
    %c0_i32 = arith.constant 0 : i32
    %c0_i32_0 = arith.constant 0 : i32
    return %arg0, %c0_i32 : i32, i32
  }
  func.func @transform_1(%arg0: i32) -> (i32, i32, i32) {
    %c0_i32 = arith.constant 0 : i32
    %c0_i32_0 = arith.constant 0 : i32
    %c0_i32_1 = arith.constant 0 : i32
    %c0_i32_2 = arith.constant 0 : i32
    return %c0_i32, %c0_i32_0, %c0_i32_1 : i32, i32, i32
  }
  func.func @transform_2(%arg0: i32) -> (i32, i32) {
    %c0_i32 = arith.constant 0 : i32
    %c0_i32_0 = arith.constant 0 : i32
    %c0_i32_1 = arith.constant 0 : i32
    return %c0_i32, %c0_i32_0 : i32, i32
  }
  func.func @transform_3(%arg0: i32) -> (i32, i32) {
    %c0_i32 = arith.constant 0 : i32
    %c0_i32_0 = arith.constant 0 : i32
    %c0_i32_1 = arith.constant 0 : i32
    return %c0_i32, %c0_i32_0 : i32, i32
  }
  func.func @transform_4(%arg0: i32) -> (i32, i32) {
    %c0_i32 = arith.constant 0 : i32
    %c0_i32_0 = arith.constant 0 : i32
    %c0_i32_1 = arith.constant 0 : i32
    return %c0_i32, %c0_i32_0 : i32, i32
  }
  func.func @transform_5(%arg0: i32) -> (i32, i32) {
    %c0_i32 = arith.constant 0 : i32
    %c0_i32_0 = arith.constant 0 : i32
    %c0_i32_1 = arith.constant 0 : i32
    return %c0_i32, %c0_i32_0 : i32, i32
  }
  func.func @transform_6(%arg0: i32) -> (i32, i32) {
    %c0_i32 = arith.constant 0 : i32
    %c0_i32_0 = arith.constant 0 : i32
    %c0_i32_1 = arith.constant 0 : i32
    return %c0_i32, %c0_i32_0 : i32, i32
  }
  func.func @transform_7(%arg0: i32) -> (i32, i32) {
    %c0_i32 = arith.constant 0 : i32
    %c0_i32_0 = arith.constant 0 : i32
    %c0_i32_1 = arith.constant 0 : i32
    return %c0_i32, %c0_i32_0 : i32, i32
  }
  func.func @transform_8(%arg0: i32) -> (i32, i32) {
    %c0_i32 = arith.constant 0 : i32
    %c0_i32_0 = arith.constant 0 : i32
    %c0_i32_1 = arith.constant 0 : i32
    return %c0_i32, %c0_i32_0 : i32, i32
  }
  func.func @transform_9(%arg0: i32) -> (i32, i32) {
    %c0_i32 = arith.constant 0 : i32
    %c0_i32_0 = arith.constant 0 : i32
    return %arg0, %c0_i32 : i32, i32
  }
}

</mosaic_0001>

<bundles_post_ra>
// kernel: tpu_custom_call.1
= control target key start
LH: loop header
LB: loop body
LE: loop exit
PB: predicated region body
PF: predicated region fallthrough
CT: control target
= control target key end

     0   :  { %s5418_s0 = inlined_call_operand.vmem [shape: f32[32,16], index: 0, kind: input, shape index: {}]   ;;  %s5419_s1 = inlined_call_operand.vmem [shape: f32[3,1,32], index: 1, kind: input, shape index: {}]   ;;  %s5420_s2 = inlined_call_operand.vmem [shape: f32[1,32], index: 2, kind: input, shape index: {}]   ;;  %s5421_s3 = inlined_call_operand.vmem [shape: bf16[96,64], index: 3, kind: input, shape index: {}]   ;;  %s5422_s4 = inlined_call_operand.vmem [shape: f32[1,64], index: 4, kind: input, shape index: {}]   ;;  %s5423_s5 = inlined_call_operand.vmem [shape: bf16[192,128], index: 5, kind: input, shape index: {}]   ;;  %s5424_s6 = inlined_call_operand.vmem [shape: f32[1,128], index: 6, kind: input, shape index: {}]   ;;  %s5425_s7 = inlined_call_operand.hbm [shape: f32[16,128], index: 7, kind: input, shape index: {}]   ;;  %s5426_s8 = inlined_call_operand.<no memory space> [shape: f32[1,1], index: 8, kind: input, shape index: {}]   ;;  %s5427_s9 = inlined_call_operand.vmem [shape: f32[32,1], index: 9, kind: output, shape index: {}]  }
   0x1   :  { %v14_v0 = vstv %s5426_s8 }
   0x2   :  { %15 = vst [vmem:[#allocation2] sm:$0x1] %v14_v0 }
   0x3   :  { %16 = vsyncpa [#allocation4], 0  ;;  %s4053_s11 = smov 0  }
   0x4 LB: > { %s276_s14 = sshll.u32 %s5425_s7, 4  ;;  %s3664_s15 = sadd.s32 4294967295, %s3992_s11   ;;  %s3992_s11 = sphi %s4053_s11, %s22_s11   ;;  %s277_s14 = int_to_ptr.hbm [resolvable:$true] %s276_s14 }
   0x5   : > { %p3666_p0 = scmp.ge.s32.totalorder %s3992_s11, 1  ;;  %p247_p1 = scmp.lt.s32.totalorder %s3992_s11, 3 }
   0x6   : > { %p3829_p2 = scmp.eq.s32.totalorder %s3664_s15, 0  ;;  %s3994_s8 = smov [#allocation3]  }
   0x7   : > { %p248_p3 = pnand %p3666_p0, %p247_p1  ;;  %s278_s16 = sshll.u32 %s3994_s8, 4  ;;  %s279_s16 = int_to_ptr.vmem [resolvable:$true] %s278_s16 }
   0x8   : > { %s3995_s17 = smov 128   ;;  %s3996_s18 = smov 8  }
   0x9   : > { %p3825_p4 = pneg %p248_p3  ;;  %306 = sbr.rel (%p248_p3) target bundleno = 1571 (0x623), region = 56 }
   0xb   : > { %p3826_p5 = pnand %p3829_p2, %p3825_p4 }
   0xd   : > { %3828 = dma.hbm_to_vmem [thread:$0]  (!%p3826_p5), %s277_s14, 256, %s279_s16, [#allocation4], %s3995_s17, %s3995_s17, %s3996_s18  }
   0xe   : > { %3987 = dma.done.wait (%p3829_p2), [#allocation4], 256  }
   0xf   : > { %3989 = vsyncadd (%p3829_p2), [#allocation4], 4294967040  ;;  %s3671_s19 = sshll.u32 %s3664_s15, 1  ;;  %v373_v1 = vlaneseq  ;;  %s3997_s24 = smov 1   ;;  %vm5428_vm0 = vcmask 7168   ;;  %vm369_vm1 = vcmask 138240  }
  0x10   : > { %p344_p6 = scmp.lt.s32.totalorder %s3671_s19, 3  ;;  %v4177_v35 = vld [vmem:[%s5419_s1] ss:$0 sm:$0xff]  ;;  %v4183_v38 = vld [vmem:[%s5419_s1 + $0x1] ss:$0 sm:$0xff]  ;;  %vm1539_vm4 = vcmask 1040384  }
  0x11   : > { %v4064_v2 = vshrl.u32 %v373_v1, 7  ;;  %v4188_v40 = vld [vmem:[%s5420_s2] ss:$0 sm:$0xff]  ;;  %v4193_v41 = vld [vmem:[%s5419_s1 + $0x2] ss:$0 sm:$0xff]  ;;  %s3998_s13 = smov 32  }
  0x12   : > { %s5434_s19 = smov (!%p344_p6, %s3671_s19), 3  ;;  %vm1540_vm5 = vsmask.f32 256  ;;  %vm1574_vm7 = vsmask.f32 7424  ;;  %s3999_s14 = smov 64  }
  0x13   : > { %3847 = vset.pattern.permute.xlu2 %v4064_v2  ;;  %3845 = vset.pattern.permute.xlu1 %v4064_v2  ;;  %v4071_v3 = vadd.s32 1, %v4064_v2  ;;  %s3672_s20 = sshll.u32 %s5434_s19, 3  ;;  %v4087_v11 = vadd.s32 8, %v4064_v2  ;;  %v4090_v12 = vadd.s32 9, %v4064_v2  ;;  %v4096_v13 = vadd.s32 2, %v4064_v2  ;;  %vm4218_vm6 = vmand %vm1539_vm4, %vm1540_vm5 }
  0x14   : > { %s347_s23 = scalar_lea.vmem %s5418_s0, %s3672_s20  ;;  %v4103_v15 = vadd.s32 10, %v4064_v2  ;;  %s353_s12 = scalar_lea.vmem %s5427_s9, %s3672_s20 }
  0x15   : > { %3849 = vset.pattern.permute.xlu0 %v4071_v3  ;;  %v356_v4 = vld [vmem:[%s347_s23] sm:$0xff]  ;;  %v357_v5 = vld [vmem:[%s347_s23 + $0x8] sm:$0xff] }
  0x16   : > { %360 = vrot.lane.b32.xlu0 %v356_v4, %s3997_s24 }
  0x1e   : > { %362 = vrot.lane.b32.xlu0 %v357_v5, %s3997_s24 }
  0x88   : > { %v361_v6 = vpop.permute.xlu0 %360 }
  0x89   : > { %v367_v7 = vsel %vm5428_vm0, 0.0, %v361_v6 }
  0x8a   : > { %v4082_v8 = vsel %vm369_vm1, %v367_v7, 0.0 }
  0x8b   : > { %v385_v9 = vperm.slane %v4082_v8, 1  ;;  %v372_v10 = vperm.slane %v4082_v8, 0  ;;  %v398_v14 = vperm.slane %v4082_v8, 2  ;;  %v4109_v16 = vperm.slane %v4082_v8, 4 }
  0x8c   : > { %v4131_v21 = vperm.slane %v4082_v8, 6  ;;  %v411_v23 = vperm.slane %v4082_v8, 3  ;;  %v4150_v25 = vperm.slane %v4082_v8, 7  ;;  %v4167_v32 = vperm.slane %v4082_v8, 5 }
  0x8d   : > { %390 = vperm.xlu2 %3847, %v385_v9   ;;  %656 = vperm.xlu0 %3849, %v372_v10  }
  0x8e   : > { %377 = vperm.xlu1 %3845, %v372_v10  }
  0x90   : > { %v363_v17 = vpop.permute.xlu0 %362 }
  0x91   : > { %v368_v18 = vsel %vm5428_vm0, 0.0, %v363_v17 }
  0x92   : > { %v4121_v19 = vsel %vm369_vm1, %v368_v18, 0.0  ;;  %vm1831_vm1 = vcmask 1046528  }
  0x93   : > { %v4124_v20 = vperm.slane %v4121_v19, 4  ;;  %v4138_v22 = vperm.slane %v4121_v19, 6  ;;  %v4146_v24 = vperm.slane %v4121_v19, 5  ;;  %v4204_v47 = vperm.slane %v4121_v19, 7 }
  0x95   : > { %3848 = vset.pattern.permute.xlu2 %v4087_v11  ;;  %3854 = vset.pattern.permute.xlu0 %v4090_v12 }
  0x96   : > { %3846 = vset.pattern.permute.xlu1 %v4087_v11 }
  0x9d   : > { %396 = vperm.xlu2 %3848, %v385_v9   ;;  %674 = vperm.xlu0 %3854, %v385_v9  }
  0x9e   : > { %383 = vperm.xlu1 %3846, %v372_v10  }
  0xa5   : > { %3851 = vset.pattern.permute.xlu2 %v4096_v13  ;;  %3859 = vset.pattern.permute.xlu0 %v4071_v3 }
  0xa6   : > { %3850 = vset.pattern.permute.xlu1 %v4090_v12 }
  0xad   : > { %917 = vperm.xlu2 %3851, %v372_v10   ;;  %680 = vperm.xlu0 %3859, %v398_v14  }
  0xae   : > { %662 = vperm.xlu1 %3850, %v372_v10  }
  0xb5   : > { %3853 = vset.pattern.permute.xlu2 %v4071_v3  ;;  %3868 = vset.pattern.permute.xlu0 %v4064_v2 }
  0xb6   : > { %3852 = vset.pattern.permute.xlu1 %v4103_v15 }
  0xbd   : > { %668 = vperm.xlu2 %3853, %v385_v9   ;;  %429 = vperm.xlu0 %3868, %v4109_v16  }
  0xbe   : > { %923 = vperm.xlu1 %3852, %v372_v10  }
  0xc5   : > { %3856 = vset.pattern.permute.xlu2 %v4103_v15  ;;  %3873 = vset.pattern.permute.xlu0 %v4103_v15 }
  0xc6   : > { %3855 = vset.pattern.permute.xlu1 %v4096_v13 }
  0xcd   : > { %935 = vperm.xlu2 %3856, %v385_v9   ;;  %971 = vperm.xlu0 %3873, %v4109_v16  }
  0xce   : > { %929 = vperm.xlu1 %3855, %v385_v9  }
  0xd5   : > { %3858 = vset.pattern.permute.xlu2 %v4087_v11  ;;  %3876 = vset.pattern.permute.xlu0 %v4071_v3 }
  0xd6   : > { %3857 = vset.pattern.permute.xlu1 %v4064_v2 }
  0xdd   : > { %409 = vperm.xlu2 %3858, %v398_v14   ;;  %800 = vperm.xlu0 %3876, %v4124_v20  }
  0xde   : > { %403 = vperm.xlu1 %3857, %v398_v14  }
  0xe5   : > { %3861 = vset.pattern.permute.xlu2 %v4096_v13  ;;  %3892 = vset.pattern.permute.xlu0 %v4090_v12 }
  0xe6   : > { %3860 = vset.pattern.permute.xlu1 %v4090_v12 }
  0xe7   : > { %v391_v26 = vpop.permute.xlu2 %390 }
  0xe8   : > { %v586_v48 = vmul.f32 %v4177_v35, %v391_v26 }
  0xea   : > { %v622_v51 = vadd.f32 %v4188_v40, %v586_v48 }
  0xed   : > { %941 = vperm.xlu2 %3861, %v398_v14   ;;  %734 = vperm.xlu0 %3892, %v4131_v21  }
  0xee   : > { %686 = vperm.xlu1 %3860, %v398_v14  }
  0xf5   : > { %3863 = vset.pattern.permute.xlu2 %v4064_v2  ;;  %3899 = vset.pattern.permute.xlu0 %v4103_v15 }
  0xf6   : > { %3862 = vset.pattern.permute.xlu1 %v4103_v15 }
  0xf7   : > { %v397_v27 = vpop.permute.xlu2 %396 }
  0xf8   : > { %v587_v37 = vmul.f32 %v4177_v35, %v397_v27  ;;  %v4243_v27 = vperm.slane %v4121_v19, 0 }
  0xfa   : > { %v623_v43 = vadd.f32 %v4188_v40, %v587_v37 }
  0xfd   : > { %416 = vperm.xlu2 %3863, %v411_v23   ;;  %1091 = vperm.xlu0 %3899, %v4138_v22  }
  0xfe   : > { %947 = vperm.xlu1 %3862, %v398_v14  }
  0xff   : > { %v4164_v31 = vpop.permute.xlu0 %656 }
 0x100   : > { %v4156_v28 = vpop.permute.xlu1 %377 }
 0x105   : > { %3865 = vset.pattern.permute.xlu2 %v4090_v12  ;;  %3900 = vset.pattern.permute.xlu0 %v4096_v13 }
 0x106   : > { %3864 = vset.pattern.permute.xlu1 %v4071_v3 }
 0x107   : > { %v4158_v29 = vpop.permute.xlu2 %917 }
 0x10d   : > { %698 = vperm.xlu2 %3865, %v411_v23   ;;  %1073 = vperm.xlu0 %3900, %v4146_v24  }
 0x10e   : > { %692 = vperm.xlu1 %3864, %v411_v23  }
 0x10f   : > { %v675_v36 = vpop.permute.xlu0 %674 }
 0x110   : > { %v4162_v30 = vpop.permute.xlu1 %383  ;;  %v852_v42 = vmul.f32 %v4183_v38, %v675_v36 }
 0x112   : > { %v884_v46 = vadd.f32 %v852_v42, %v623_v43 }
 0x115   : > { %3867 = vset.pattern.permute.xlu2 %v4103_v15  ;;  %1001 = vperm.xlu0 %3900, %v4150_v25  }
 0x116   : > { %3866 = vset.pattern.permute.xlu1 %v4096_v13 }
 0x117   : > { %v669_v33 = vpop.permute.xlu2 %668 }
 0x118   : > { %v851_v50 = vmul.f32 %v4183_v38, %v669_v33  ;;  %v4249_v33 = vperm.slane %v4121_v19, 1 }
 0x11a   : > { %v883_v54 = vadd.f32 %v851_v50, %v622_v51 }
 0x11d   : > { %959 = vperm.xlu2 %3867, %v411_v23   ;;  %3905 = vset.pattern.permute.xlu0 %v4087_v11 }
 0x11e   : > { %953 = vperm.xlu1 %3866, %v411_v23  }
 0x11f   : > { %v4287_v50 = vpop.permute.xlu0 %680 }
 0x120   : > { %v4172_v34 = vpop.permute.xlu1 %662 }
 0x125   : > { %3870 = vset.pattern.permute.xlu2 %v4071_v3  ;;  %422 = vperm.xlu0 %3905, %v411_v23  }
 0x126   : > { %3869 = vset.pattern.permute.xlu1 %v4087_v11 }
 0x127   : > { %v936_v39 = vpop.permute.xlu2 %935 }
 0x128   : > { %v1113_v44 = vmul.f32 %v4193_v41, %v936_v39 }
 0x12a   : > { %v1145_v49 = vadd.f32 %v1113_v44, %v884_v46  ;;  %v4278_v46 = vperm.slane %v4121_v19, 2 }
 0x12c   : > { %v1209_v52 = vmul.f32 0.01, %v1145_v49  ;;  %vm1177_vm2 = vcmp.ge.f32.partialorder %v1145_v49, 0.0 }
 0x12d   : > { %704 = vperm.xlu2 %3870, %v4109_v16   ;;  %448 = vperm.xlu0 %3905, %v4167_v32  }
 0x12e   : > { %435 = vperm.xlu1 %3869, %v4109_v16   ;;  %v1241_v56 = vsel %vm1177_vm2, %v1145_v49, %v1209_v52 }
 0x12f   : > { %v1273_v59 = vpack.c.bf16 %v1241_v56, %v1241_v56  ;;  %v430_v52 = vpop.permute.xlu0 %429 }
 0x130   : > { %v4201_v45 = vpop.permute.xlu1 %923 }
 0x131   : > { %v1350_v62 = vunpack.c.l.b16 %v1273_v59  ;;  %v4302_v59 = vperm.slane %v4121_v19, 3 }
 0x135   : > { %3872 = vset.pattern.permute.xlu2 %v4096_v13  ;;  %552 = vperm.xlu0 %3905, %v4146_v24  }
 0x136   : > { %3871 = vset.pattern.permute.xlu1 %v4090_v12 }
 0x137   : > { %v4253_v36 = vpop.permute.xlu2 %409 }
 0x13d   : > { %965 = vperm.xlu2 %3872, %v4109_v16   ;;  %578 = vperm.xlu0 %3905, %v4204_v47  }
 0x13e   : > { %710 = vperm.xlu1 %3871, %v4109_v16  }
 0x140   : > { %v930_v53 = vpop.permute.xlu1 %929 }
 0x141   : > { %v1112_v55 = vmul.f32 %v4193_v41, %v930_v53  ;;  %v592_v53 = vmul.f32 %v4177_v35, %v430_v52 }
 0x143   : > { %v1144_v57 = vadd.f32 %v1112_v55, %v883_v54 }
 0x145   : > { %vm1176_vm3 = vcmp.ge.f32.partialorder %v1144_v57, 0.0  ;;  %v1208_v58 = vmul.f32 0.01, %v1144_v57  ;;  %3875 = vset.pattern.permute.xlu2 %v4087_v11  ;;  %3908 = vset.pattern.permute.xlu0 %v4064_v2 }
 0x146   : > { %3874 = vset.pattern.permute.xlu1 %v4064_v2 }
 0x147   : > { %v1240_v60 = vsel %vm1176_vm3, %v1144_v57, %v1208_v58  ;;  %v4258_v37 = vpop.permute.xlu2 %941  ;;  %v628_v57 = vadd.f32 %v4188_v40, %v592_v53 }
 0x148   : > { %v1272_v61 = vpack.c.bf16 %v1240_v60, %v1240_v60 }
 0x14a   : > { %v1349_v63 = vunpack.c.l.b16 %v1272_v61 }
 0x14c   : > { %v1380_v0 = vpack.c.b16 %v1350_v62, %v1349_v63  ;;  %v972_v63 = vpop.permute.xlu0 %971 }
 0x14d   : > { %539 = vperm.xlu2 %3875, %v4124_v20   ;;  %v1119_v19 = vmul.f32 %v4193_v41, %v972_v63 }
 0x14e   : > { %533 = vperm.xlu1 %3874, %v4124_v20   ;;  %v1403_v1 = vshrl.u32 %v1380_v0, 16  ;;  %v1406_v4 = vshll.u32 %v1380_v0, 16 }
 0x150   : > { %v1405_v5 = vrot.slane %v1403_v1, 7 }
 0x152   : > { %v1408_v7 = vor.u32 %v1406_v4, %v1405_v5  ;;  %v4224_v8 = vsel %vm4218_vm6, %v1405_v5, 0 }
 0x153   : > { %v1595_v14 = vshll.u32 %v4224_v8, 16 }
 0x154   : > { %v4228_v9 = vsel %vm4218_vm6, 0, %v1408_v7  ;;  %v4320_v52 = vpop.permute.xlu0 %800 }
 0x155   : > { %3878 = vset.pattern.permute.xlu2 %v4096_v13  ;;  %v1590_v10 = vshll.u32 %v4228_v9, 16  ;;  %v1588_v16 = vshrl.u32 %v4228_v9, 16  ;;  %v1597_v23 = vrot.slane %v1595_v14, 1 }
 0x156   : > { %3877 = vset.pattern.permute.xlu1 %v4090_v12 }
 0x157   : > { %v1592_v17 = vrot.slane %v1590_v10, 1  ;;  %v4265_v39 = vpop.permute.xlu2 %416 }
 0x159   : > { %v1593_v18 = vor.u32 %v1592_v17, %v1588_v16 }
 0x15b   : > { %v1598_v26 = vsel %vm1574_vm7, %v1593_v18, %v1597_v23 }
 0x15c   : > { %1769 = vrot.lane.b32.xlu0 %v1598_v26, %s3998_s13 }
 0x15d   : > { %1061 = vperm.xlu2 %3878, %v4124_v20  }
 0x15e   : > { %806 = vperm.xlu1 %3877, %v4124_v20  }
 0x15f   : > { %v4325_v53 = vpop.permute.xlu0 %734 }
 0x164   : > { %559 = vperm.xlu0 %3908, %v4138_v22  }
 0x165   : > { %3880 = vset.pattern.permute.xlu2 %v4064_v2 }
 0x166   : > { %3879 = vset.pattern.permute.xlu1 %v4103_v15 }
 0x167   : > { %v4272_v43 = vpop.permute.xlu2 %698 }
 0x16c   : > { %481 = vperm.xlu0 %3908, %v4243_v27  }
 0x16d   : > { %442 = vperm.xlu2 %3880, %v4167_v32  }
 0x16e   : > { %1067 = vperm.xlu1 %3879, %v4124_v20   ;;  %v4261_v20 = vpop.permute.xlu1 %403 }
 0x174   : > { %494 = vperm.xlu0 %3908, %v4249_v33  }
 0x175   : > { %3882 = vset.pattern.permute.xlu2 %v4090_v12 }
 0x176   : > { %3881 = vset.pattern.permute.xlu1 %v4071_v3  ;;  %v4268_v42 = vpop.permute.xlu1 %686 }
 0x177   : > { %v4282_v48 = vpop.permute.xlu2 %959 }
 0x17c   : > { %3917 = vset.pattern.permute.xlu0 %v4103_v15 }
 0x17d   : > { %722 = vperm.xlu2 %3882, %v4167_v32  }
 0x17e   : > { %716 = vperm.xlu1 %3881, %v4167_v32   ;;  %v4275_v44 = vpop.permute.xlu1 %947 }
 0x184   : > { %1019 = vperm.xlu0 %3917, %v4243_v27  }
 0x185   : > { %3884 = vset.pattern.permute.xlu2 %v4103_v15 }
 0x186   : > { %3883 = vset.pattern.permute.xlu1 %v4096_v13  ;;  %v4285_v49 = vpop.permute.xlu1 %692 }
 0x18c   : > { %1031 = vperm.xlu0 %3917, %v4249_v33  }
 0x18d   : > { %983 = vperm.xlu2 %3884, %v4167_v32  }
 0x18e   : > { %977 = vperm.xlu1 %3883, %v4167_v32   ;;  %v705_v32 = vpop.permute.xlu2 %704 }
 0x18f   : > { %v857_v55 = vmul.f32 %v4183_v38, %v705_v32 }
 0x190   : > { %v4292_v51 = vpop.permute.xlu1 %953 }
 0x191   : > { %v889_v60 = vadd.f32 %v857_v55, %v628_v57 }
 0x194   : > { %1043 = vperm.xlu0 %3917, %v4278_v46  }
 0x195   : > { %3885 = vset.pattern.permute.xlu2 %v4064_v2 }
 0x196   : > { %3886 = vset.pattern.permute.xlu1 %v4071_v3 }
 0x197   : > { %v966_v54 = vpop.permute.xlu2 %965 }
 0x198   : > { %v1118_v58 = vmul.f32 %v4193_v41, %v966_v54  ;;  %v4329_v54 = vpop.permute.xlu0 %1091 }
 0x19a   : > { %v1150_v61 = vadd.f32 %v1118_v58, %v889_v60 }
 0x19c   : > { %3926 = vset.pattern.permute.xlu0 %v4064_v2  ;;  %v1214_v1 = vmul.f32 0.01, %v1150_v61  ;;  %vm1182_vm8 = vcmp.ge.f32.partialorder %v1150_v61, 0.0 }
 0x19d   : > { %546 = vperm.xlu2 %3885, %v4146_v24  }
 0x19e   : > { %812 = vperm.xlu1 %3886, %v4146_v24   ;;  %v1246_v10 = vsel %vm1182_vm8, %v1150_v61, %v1214_v1 }
 0x19f   : > { %v1278_v16 = vpack.c.bf16 %v1246_v10, %v1246_v10  ;;  %v584_v10 = vmul.f32 %v4177_v35, %v4156_v28 }
 0x1a0   : > { %v436_v56 = vpop.permute.xlu1 %435  ;;  %v4339_v58 = vpop.permute.xlu0 %1073 }
 0x1a1   : > { %v593_v62 = vmul.f32 %v4177_v35, %v436_v56  ;;  %v1355_v23 = vunpack.c.l.b16 %v1278_v16  ;;  %v620_v28 = vadd.f32 %v4188_v40, %v584_v10 }
 0x1a3   : > { %v629_v4 = vadd.f32 %v4188_v40, %v593_v62 }
 0x1a4   : > { %507 = vperm.xlu0 %3926, %v4278_v46  }
 0x1a5   : > { %3887 = vset.pattern.permute.xlu2 %v4090_v12 }
 0x1a6   : > { %3888 = vset.pattern.permute.xlu1 %v4103_v15 }
 0x1a7   : > { %v4333_v56 = vpop.permute.xlu2 %539 }
 0x1a8   : > { %v4347_v63 = vpop.permute.xlu0 %1001 }
 0x1ac   : > { %520 = vperm.xlu0 %3926, %v4302_v59  }
 0x1ad   : > { %818 = vperm.xlu2 %3887, %v4146_v24  }
 0x1ae   : > { %1079 = vperm.xlu1 %3888, %v4146_v24  }
 0x1b0   : > { %v711_v0 = vpop.permute.xlu1 %710 }
 0x1b1   : > { %v858_v5 = vmul.f32 %v4183_v38, %v711_v0 }
 0x1b3   : > { %v890_v7 = vadd.f32 %v858_v5, %v629_v4 }
 0x1b4   : > { %3931 = vset.pattern.permute.xlu0 %v4103_v15 }
 0x1b5   : > { %v1151_v14 = vadd.f32 %v1119_v19, %v890_v7  ;;  %3889 = vset.pattern.permute.xlu2 %v4064_v2  ;;  %v423_v19 = vpop.permute.xlu0 %422 }
 0x1b6   : > { %3890 = vset.pattern.permute.xlu1 %v4087_v11  ;;  %v591_v7 = vmul.f32 %v4177_v35, %v423_v19 }
 0x1b7   : > { %vm1183_vm9 = vcmp.ge.f32.partialorder %v1151_v14, 0.0  ;;  %v1215_v24 = vmul.f32 0.01, %v1151_v14  ;;  %v4341_v60 = vpop.permute.xlu2 %1061 }
 0x1b8   : > { %v627_v16 = vadd.f32 %v4188_v40, %v591_v7 }
 0x1b9   : > { %v1247_v17 = vsel %vm1183_vm9, %v1151_v14, %v1215_v24  ;;  %v585_v14 = vmul.f32 %v4177_v35, %v4162_v30  ;;  %v1111_v30 = vmul.f32 %v4193_v41, %v4201_v45  ;;  %v1116_v45 = vmul.f32 %v4193_v41, %v4292_v51 }
 0x1ba   : > { %v1279_v18 = vpack.c.bf16 %v1247_v17, %v1247_v17  ;;  %v850_v17 = vmul.f32 %v4183_v38, %v4172_v34  ;;  %v855_v34 = vmul.f32 %v4183_v38, %v4285_v49  ;;  %v588_v51 = vmul.f32 %v4177_v35, %v4261_v20 }
 0x1bb   : > { %v853_v20 = vmul.f32 %v4183_v38, %v4287_v50 }
 0x1bc   : > { %v1356_v26 = vunpack.c.l.b16 %v1279_v18  ;;  %1055 = vperm.xlu0 %3931, %v4302_v59   ;;  %v590_v18 = vmul.f32 %v4177_v35, %v4265_v39  ;;  %v849_v39 = vmul.f32 %v4183_v38, %v4164_v31 }
 0x1bd   : > { %455 = vperm.xlu2 %3889, %v4131_v21  }
 0x1be   : > { %461 = vperm.xlu1 %3890, %v4131_v21   ;;  %v4317_v32 = vpack.c.b16 %v1356_v26, %v1355_v23  ;;  %v856_v23 = vmul.f32 %v4183_v38, %v4272_v43  ;;  %v621_v26 = vadd.f32 %v4188_v40, %v585_v14  ;;  %v1110_v43 = vmul.f32 %v4193_v41, %v4158_v29 }
 0x1bf   : > { %v881_v49 = vadd.f32 %v849_v39, %v620_v28 }
 0x1c0   : > { %v4331_v55 = vpop.permute.xlu1 %533 }
 0x1c1   : > { %v1142_v29 = vadd.f32 %v1110_v43, %v881_v49 }
 0x1c3   : > { %vm1174_vm12 = vcmp.ge.f32.partialorder %v1142_v29, 0.0 }
 0x1c5   : > { %3891 = vset.pattern.permute.xlu2 %v4071_v3 }
 0x1c6   : > { %3893 = vset.pattern.permute.xlu1 %v4096_v13 }
 0x1c7   : > { %v443_v62 = vpop.permute.xlu2 %442 }
 0x1c8   : > { %v594_v0 = vmul.f32 %v4177_v35, %v443_v62  ;;  %v888_v62 = vadd.f32 %v856_v23, %v627_v16 }
 0x1ca   : > { %v630_v1 = vadd.f32 %v4188_v40, %v594_v0 }
 0x1cd   : > { %728 = vperm.xlu2 %3891, %v4131_v21  }
 0x1ce   : > { %989 = vperm.xlu1 %3893, %v4131_v21  }
 0x1d0   : > { %v4337_v57 = vpop.permute.xlu1 %806 }
 0x1d5   : > { %3894 = vset.pattern.permute.xlu2 %v4103_v15 }
 0x1d6   : > { %3895 = vset.pattern.permute.xlu1 %v4087_v11 }
 0x1d7   : > { %v4361_v24 = vpop.permute.xlu2 %722 }
 0x1dd   : > { %995 = vperm.xlu2 %3894, %v4131_v21  }
 0x1de   : > { %565 = vperm.xlu1 %3895, %v4138_v22  }
 0x1e0   : > { %v4345_v61 = vpop.permute.xlu1 %1067 }
 0x1e5   : > { %3896 = vset.pattern.permute.xlu2 %v4071_v3 }
 0x1e6   : > { %3897 = vset.pattern.permute.xlu1 %v4090_v12 }
 0x1e7   : > { %v4388_v19 = vpop.permute.xlu2 %983 }
 0x1ed   : > { %824 = vperm.xlu2 %3896, %v4138_v22  }
 0x1ee   : > { %830 = vperm.xlu1 %3897, %v4138_v22  }
 0x1f0   : > { %v717_v21 = vpop.permute.xlu1 %716 }
 0x1f1   : > { %v859_v4 = vmul.f32 %v4183_v38, %v717_v21  ;;  %v626_v21 = vadd.f32 %v4188_v40, %v590_v18  ;;  %v1206_v18 = vmul.f32 0.01, %v1142_v29 }
 0x1f3   : > { %v891_v5 = vadd.f32 %v859_v4, %v630_v1  ;;  %v1117_v1 = vmul.f32 %v4193_v41, %v4282_v48  ;;  %v887_v31 = vadd.f32 %v855_v34, %v626_v21  ;;  %v624_v34 = vadd.f32 %v4188_v40, %v588_v51 }
 0x1f4   : > { %v1238_v39 = vsel %vm1174_vm12, %v1142_v29, %v1206_v18  ;;  %v1115_v21 = vmul.f32 %v4193_v41, %v4275_v44  ;;  %v1114_v29 = vmul.f32 %v4193_v41, %v4258_v37  ;;  %v1136_v44 = vmul.f32 %v4193_v41, %v4339_v58 }
 0x1f5   : > { %3898 = vset.pattern.permute.xlu2 %v4096_v13  ;;  %v1149_v10 = vadd.f32 %v1117_v1, %v888_v62  ;;  %v1148_v16 = vadd.f32 %v1116_v45, %v887_v31  ;;  %v854_v62 = vmul.f32 %v4183_v38, %v4268_v42  ;;  %v1270_v45 = vpack.c.bf16 %v1238_v39, %v1238_v39 }
 0x1f6   : > { %3901 = vset.pattern.permute.xlu1 %v4064_v2  ;;  %v885_v42 = vadd.f32 %v853_v20, %v624_v34 }
 0x1f7   : > { %vm1181_vm11 = vcmp.ge.f32.partialorder %v1149_v10, 0.0  ;;  %v1212_v23 = vmul.f32 0.01, %v1148_v16  ;;  %vm1180_vm13 = vcmp.ge.f32.partialorder %v1148_v16, 0.0  ;;  %v547_v28 = vpop.permute.xlu2 %546  ;;  %v1347_v51 = vunpack.c.l.b16 %v1270_v45 }
 0x1f8   : > { %v1146_v18 = vadd.f32 %v1114_v29, %v885_v42  ;;  %v1835_v42 = vrot.slane %v4228_v9, 1 }
 0x1f9   : > { %v1244_v43 = vsel %vm1180_vm13, %v1148_v16, %v1212_v23 }
 0x1fa   : > { %v1276_v49 = vpack.c.bf16 %v1244_v43, %v1244_v43  ;;  %v1210_v37 = vmul.f32 0.01, %v1146_v18  ;;  %vm1178_vm15 = vcmp.ge.f32.partialorder %v1146_v18, 0.0 }
 0x1fc   : > { %v1353_v23 = vunpack.c.l.b16 %v1276_v49  ;;  %v1242_v58 = vsel %vm1178_vm15, %v1146_v18, %v1210_v37 }
 0x1fd   : > { %1085 = vperm.xlu2 %3898, %v4138_v22   ;;  %v882_v22 = vadd.f32 %v850_v17, %v621_v26  ;;  %v1213_v17 = vmul.f32 0.01, %v1149_v10 }
 0x1fe   : > { %468 = vperm.xlu1 %3901, %v4150_v25  }
 0x1ff   : > { %v1143_v7 = vadd.f32 %v1111_v30, %v882_v22  ;;  %v1245_v30 = vsel %vm1181_vm11, %v1149_v10, %v1213_v17  ;;  %v610_v22 = vmul.f32 %v4177_v35, %v547_v28 }
 0x200   : > { %v978_v0 = vpop.permute.xlu1 %977  ;;  %v1277_v1 = vpack.c.bf16 %v1245_v30, %v1245_v30 }
 0x201   : > { %v1120_v4 = vmul.f32 %v4193_v41, %v978_v0  ;;  %v1207_v48 = vmul.f32 0.01, %v1143_v7  ;;  %vm1175_vm10 = vcmp.ge.f32.partialorder %v1143_v7, 0.0  ;;  %v646_v50 = vadd.f32 %v4188_v40, %v610_v22 }
 0x203   : > { %v4390_v14 = vadd.f32 %v1120_v4, %v891_v5  ;;  %v589_v5 = vmul.f32 %v4177_v35, %v4253_v36  ;;  %v1239_v26 = vsel %vm1175_vm10, %v1143_v7, %v1207_v48  ;;  %v1354_v48 = vunpack.c.l.b16 %v1277_v1 }
 0x204   : > { %v1271_v0 = vpack.c.bf16 %v1239_v26, %v1239_v26 }
 0x205   : > { %3902 = vset.pattern.permute.xlu2 %v4087_v11  ;;  %v625_v36 = vadd.f32 %v4188_v40, %v589_v5  ;;  %v1382_v30 = vpack.c.b16 %v1354_v48, %v1353_v23  ;;  %vm1184_vm8 = vcmp.ge.f32.partialorder %v4390_v14, 0.0 }
 0x206   : > { %3903 = vset.pattern.permute.xlu1 %v4071_v3  ;;  %v1348_v10 = vunpack.c.l.b16 %v1271_v0  ;;  %v1274_v0 = vpack.c.bf16 %v1242_v58, %v1242_v58 }
 0x207   : > { %v886_v4 = vadd.f32 %v854_v62, %v625_v36  ;;  %v1417_v62 = vshrl.u32 %v1382_v30, 16  ;;  %v4421_v36 = vpop.permute.xlu2 %818  ;;  %v1420_v1 = vshll.u32 %v1382_v30, 16 }
 0x208   : > { %v1379_v28 = vpack.c.b16 %v1348_v10, %v1347_v51 }
 0x209   : > { %v1147_v16 = vadd.f32 %v1115_v21, %v886_v4  ;;  %v1419_v43 = vrot.slane %v1417_v62, 7 }
 0x20a   : > { %v1396_v39 = vshrl.u32 %v1379_v28, 16  ;;  %v1399_v21 = vshll.u32 %v1379_v28, 16 }
 0x20b   : > { %v1211_v26 = vmul.f32 0.01, %v1147_v16  ;;  %vm1179_vm14 = vcmp.ge.f32.partialorder %v1147_v16, 0.0  ;;  %v1422_v4 = vor.u32 %v1420_v1, %v1419_v43 }
 0x20c   : > { %v1398_v22 = vrot.slane %v1396_v39, 7 }
 0x20d   : > { %474 = vperm.xlu2 %3902, %v4150_v25   ;;  %v1243_v34 = vsel %vm1179_vm14, %v1147_v16, %v1211_v26  ;;  %v4430_v10 = vsel %vm4218_vm6, 0, %v1422_v4  ;;  %vm1912_vm14 = vcmask 261120  }
 0x20e   : > { %740 = vperm.xlu1 %3903, %v4150_v25   ;;  %v1275_v20 = vpack.c.bf16 %v1243_v34, %v1243_v34  ;;  %v1401_v49 = vor.u32 %v1399_v21, %v1398_v22  ;;  %v1841_v48 = vrot.slane %v4430_v10, 1  ;;  %v1558_v18 = vsel %vm4218_vm6, %v1398_v22, 0 }
 0x20f   : > { %v1583_v62 = vshll.u32 %v1558_v18, 16  ;;  %v862_v21 = vmul.f32 %v4183_v38, %v4325_v53 }
 0x210   : > { %v813_v7 = vpop.permute.xlu1 %812  ;;  %v1352_v45 = vunpack.c.l.b16 %v1275_v20  ;;  %v4434_v29 = vsel %vm4218_vm6, 0, %v1401_v49 }
 0x211   : > { %v875_v31 = vmul.f32 %v4183_v38, %v813_v7  ;;  %v1351_v7 = vunpack.c.l.b16 %v1274_v0  ;;  %v1576_v34 = vshrl.u32 %v4434_v29, 16  ;;  %v1832_v58 = vrot.slane %v4434_v29, 1 }
 0x212   : > { %v1833_v0 = vrot.slane %v1558_v18, 1 }
 0x213   : > { %v907_v17 = vadd.f32 %v875_v31, %v646_v50  ;;  %v1836_v50 = vrot.slane %v4224_v8, 1  ;;  %v1381_v31 = vpack.c.b16 %v1352_v45, %v1351_v7  ;;  %v1585_v45 = vrot.slane %v1583_v62, 1 }
 0x215   : > { %v4415_v5 = vadd.f32 %v1136_v44, %v907_v17  ;;  %3904 = vset.pattern.permute.xlu2 %v4090_v12  ;;  %v1578_v44 = vshll.u32 %v4434_v29, 16  ;;  %v1410_v17 = vshrl.u32 %v1381_v31, 16  ;;  %v1413_v30 = vshll.u32 %v1381_v31, 16 }
 0x216   : > { %3906 = vset.pattern.permute.xlu1 %v4103_v15 }
 0x217   : > { %v456_v16 = vpop.permute.xlu2 %455  ;;  %v1580_v28 = vrot.slane %v1578_v44, 1  ;;  %v1412_v26 = vrot.slane %v1410_v17, 7  ;;  %vm1200_vm11 = vcmp.ge.f32.partialorder %v4415_v5, 0.0 }
 0x218   : > { %v596_v44 = vmul.f32 %v4177_v35, %v456_v16 }
 0x219   : > { %v1415_v22 = vor.u32 %v1413_v30, %v1412_v26  ;;  %v4468_v53 = vsel %vm4218_vm6, %v1412_v26, 0 }
 0x21b   : > { %v4462_v7 = vsel %vm4218_vm6, 0, %v1415_v22 }
 0x21d   : > { %746 = vperm.xlu2 %3904, %v4150_v25  }
 0x21e   : > { %1007 = vperm.xlu1 %3906, %v4150_v25   ;;  %v1837_v25 = vsel %vm1831_vm1, %v1835_v42, %v1836_v50  ;;  %v1834_v42 = vsel %vm1831_vm1, %v1832_v58, %v1833_v0 }
 0x220   : > { %v4437_v8 = vpop.permute.xlu1 %1079 }
 0x225   : > { %3907 = vset.pattern.permute.xlu2 %v4064_v2  ;;  %v4441_v2 = vsel %vm4218_vm6, %v1419_v43, 0  ;;  %v1581_v43 = vor.u32 %v1580_v28, %v1576_v34 }
 0x226   : > { %1882 = vrot.lane.b32.xlu1 %v1837_v25, %s3999_s14  ;;  %v1842_v51 = vrot.slane %v4441_v2, 1  ;;  %v1838_v25 = vrot.slane %v4462_v7, 1 }
 0x227   : > { %3909 = vset.pattern.permute.xlu1 %v4071_v3  ;;  %v729_v37 = vpop.permute.xlu2 %728  ;;  %v1586_v4 = vsel %vm1574_vm7, %v1581_v43, %v1585_v45  ;;  %v608_v43 = vmul.f32 %v4177_v35, %v4331_v55 }
 0x228   : > { %v1843_v23 = vsel %vm1831_vm1, %v1841_v48, %v1842_v51  ;;  %v1839_v48 = vrot.slane %v4468_v53, 1  ;;  %v861_v18 = vmul.f32 %v4183_v38, %v729_v37 }
 0x229   : > { %v644_v45 = vadd.f32 %v4188_v40, %v608_v43  ;;  %v1602_v43 = vshll.u32 %v4462_v7, 16 }
 0x22a   : > { %v1840_v51 = vsel %vm1831_vm1, %v1838_v25, %v1839_v48 }
 0x22d   : > { %572 = vperm.xlu2 %3907, %v4204_v47  }
 0x22e   : > { %1886 = vrot.lane.b32.xlu1 %v1843_v23, %s3999_s14  ;;  %v632_v23 = vadd.f32 %v4188_v40, %v596_v44 }
 0x230   : > { %v462_v39 = vpop.permute.xlu1 %461  ;;  %v893_v30 = vadd.f32 %v861_v18, %v632_v23 }
 0x231   : > { %v597_v20 = vmul.f32 %v4177_v35, %v462_v39 }
 0x233   : > { %v633_v1 = vadd.f32 %v4188_v40, %v597_v20 }
 0x235   : > { %1880 = vrot.lane.b32.xlu2 %v1834_v42, %s3999_s14  ;;  %v894_v49 = vadd.f32 %v862_v21, %v633_v1  ;;  %v609_v21 = vmul.f32 %v4177_v35, %v4333_v56  ;;  %v874_v42 = vmul.f32 %v4183_v38, %v4337_v57 }
 0x236   : > { %1767 = vrot.lane.b32.xlu1 %v1586_v4, %s3998_s13  ;;  %3910 = vset.pattern.permute.xlu2 %v4090_v12  ;;  %v873_v4 = vmul.f32 %v4183_v38, %v4320_v52 }
 0x237   : > { %v996_v50 = vpop.permute.xlu2 %995  ;;  %v645_v55 = vadd.f32 %v4188_v40, %v609_v21 }
 0x238   : > { %v1123_v31 = vmul.f32 %v4193_v41, %v996_v50  ;;  %v905_v56 = vadd.f32 %v873_v4, %v644_v45  ;;  %v1600_v4 = vshrl.u32 %v4462_v7, 16 }
 0x239   : > { %v906_v50 = vadd.f32 %v874_v42, %v645_v55  ;;  %v1607_v55 = vshll.u32 %v4468_v53, 16  ;;  %v3790_v53 = vld [vmem:[%s5421_s3 + $0x28] sm:$0xff] }
 0x23a   : > { %v1155_v17 = vadd.f32 %v1123_v31, %v894_v49  ;;  %v1135_v49 = vmul.f32 %v4193_v41, %v4345_v61  ;;  %v1134_v31 = vmul.f32 %v4193_v41, %v4341_v60  ;;  %2049 = vmatpush.bf16.msra.mxu0 %v3790_v53  ;;  %3803 = vmatpush.bf16.msra.mxu3 %v3790_v53 }
 0x23c   : > { %v1219_v28 = vmul.f32 0.01, %v1155_v17  ;;  %vm1187_vm2 = vcmp.ge.f32.partialorder %v1155_v17, 0.0  ;;  %v1167_v25 = vadd.f32 %v1135_v49, %v906_v50  ;;  %v1166_v48 = vadd.f32 %v1134_v31, %v905_v56 }
 0x23d   : > { %1884 = vrot.lane.b32.xlu2 %v1840_v51, %s3999_s14  ;;  %v1121_v31 = vmul.f32 %v4193_v41, %v4388_v19  ;;  %v876_v19 = vmul.f32 %v4183_v38, %v4421_v36  ;;  %v1137_v36 = vmul.f32 %v4193_v41, %v4437_v8 }
 0x23e   : > { %836 = vperm.xlu1 %3909, %v4204_v47   ;;  %v1251_v62 = vsel %vm1187_vm2, %v1155_v17, %v1219_v28  ;;  %vm1199_vm4 = vcmp.ge.f32.partialorder %v1167_v25, 0.0  ;;  %v1230_v52 = vmul.f32 0.01, %v1166_v48  ;;  %vm1198_vm5 = vcmp.ge.f32.partialorder %v1166_v48, 0.0 }
 0x23f   : > { %v1283_v58 = vpack.c.bf16 %v1251_v62, %v1251_v62  ;;  %vm2014_vm2 = vcmask 785408  }
 0x240   : > { %v990_v26 = vpop.permute.xlu1 %989  ;;  %v1262_v17 = vsel %vm1198_vm5, %v1166_v48, %v1230_v52 }
 0x241   : > { %v1122_v34 = vmul.f32 %v4193_v41, %v990_v26  ;;  %v1360_v22 = vunpack.c.l.b16 %v1283_v58  ;;  %v1294_v60 = vpack.c.bf16 %v1262_v17, %v1262_v17  ;;  %v1424_v26 = vshrl.u32 %v4317_v32, 16 }
 0x243   : > { %v1154_v39 = vadd.f32 %v1122_v34, %v893_v30  ;;  %v1139_v30 = vmul.f32 %v4193_v41, %v4329_v54  ;;  %v1371_v62 = vunpack.c.l.b16 %v1294_v60  ;;  %v1426_v58 = vrot.slane %v1424_v26, 7  ;;  %v3789_v26 = vld [vmem:[%s5421_s3 + $0x20] sm:$0xff] }
 0x244   : > { %v1604_v54 = vrot.slane %v1602_v43, 1  ;;  %2050 = vmatpush.bf16.msra.mxu0 %v3789_v26  ;;  %3804 = vmatpush.bf16.msra.mxu3 %v3789_v26 }
 0x245   : > { %vm1186_vm3 = vcmp.ge.f32.partialorder %v1154_v39, 0.0  ;;  %v1218_v16 = vmul.f32 0.01, %v1154_v39  ;;  %842 = vperm.xlu2 %3910, %v4204_v47   ;;  %v1562_v17 = vsel %vm4218_vm6, %v1426_v58, 0 }
 0x246   : > { %3911 = vset.pattern.permute.xlu1 %v4096_v13  ;;  %v1845_v43 = vrot.slane %v1562_v17, 1 }
 0x247   : > { %v1250_v37 = vsel %vm1186_vm3, %v1154_v39, %v1218_v16  ;;  %vm1945_vm3 = vcmask 523264  }
 0x248   : > { %v1282_v20 = vpack.c.bf16 %v1250_v37, %v1250_v37  ;;  %v1427_v37 = vshll.u32 %v4317_v32, 16  ;;  %v860_v32 = vmul.f32 %v4183_v38, %v4361_v24 }
 0x24a   : > { %v1359_v0 = vunpack.c.l.b16 %v1282_v20  ;;  %v449_v20 = vpop.permute.xlu0 %448 }
 0x24b   : > { %v595_v21 = vmul.f32 %v4177_v35, %v449_v20 }
 0x24c   : > { %v4486_v1 = vpack.c.b16 %v1360_v22, %v1359_v0  ;;  %v1429_v22 = vor.u32 %v1427_v37, %v1426_v58 }
 0x24d   : > { %3912 = vset.pattern.permute.xlu2 %v4103_v15  ;;  %v1231_v15 = vmul.f32 0.01, %v1167_v25  ;;  %v631_v56 = vadd.f32 %v4188_v40, %v595_v21 }
 0x24e   : > { %1097 = vperm.xlu1 %3911, %v4204_v47   ;;  %v4521_v45 = vsel %vm4218_vm6, 0, %v1429_v22 }
 0x24f   : > { %v1263_v44 = vsel %vm1199_vm4, %v1167_v25, %v1231_v15  ;;  %v1605_v25 = vor.u32 %v1604_v54, %v1600_v4  ;;  %v1626_v48 = vshll.u32 %v4521_v45, 16  ;;  %v892_v24 = vadd.f32 %v860_v32, %v631_v56  ;;  %v3788_v54 = vld [vmem:[%s5421_s3 + $0x18] sm:$0xff] }
 0x250   : > { %v566_v57 = vpop.permute.xlu1 %565  ;;  %v1295_v51 = vpack.c.bf16 %v1263_v44, %v1263_v44  ;;  %v1609_v44 = vrot.slane %v1607_v55, 1  ;;  %2051 = vmatpush.bf16.msra.mxu0 %v3788_v54  ;;  %3805 = vmatpush.bf16.msra.mxu3 %v3788_v54 }
 0x251   : > { %v613_v61 = vmul.f32 %v4177_v35, %v566_v57  ;;  %v4532_v57 = vpop.permute.xlu2 %824  ;;  %v1628_v60 = vrot.slane %v1626_v48, 1  ;;  %v1619_v48 = vshll.u32 %v4441_v2, 16 }
 0x252   : > { %v1372_v28 = vunpack.c.l.b16 %v1295_v51  ;;  %v553_v50 = vpop.permute.xlu0 %552  ;;  %v1610_v51 = vsel %vm1574_vm7, %v1605_v25, %v1609_v44  ;;  %v1612_v25 = vshrl.u32 %v4430_v10, 16 }
 0x253   : > { %v611_v15 = vmul.f32 %v4177_v35, %v553_v50 }
 0x254   : > { %v1391_v16 = vpack.c.b16 %v1372_v28, %v1371_v62  ;;  %v1631_v28 = vshll.u32 %v1562_v17, 16  ;;  %v1614_v62 = vshll.u32 %v4430_v10, 16 }
 0x255   : > { %1103 = vperm.xlu2 %3912, %v4204_v47   ;;  %v649_v47 = vadd.f32 %v4188_v40, %v613_v61  ;;  %v1153_v61 = vadd.f32 %v1121_v31, %v892_v24 }
 0x256   : > { %3913 = vset.pattern.permute.xlu1 %v4087_v11  ;;  %v1480_v0 = vshrl.u32 %v1391_v16, 16  ;;  %v1483_v49 = vshll.u32 %v1391_v16, 16  ;;  %v1633_v21 = vrot.slane %v1631_v28, 1  ;;  %v1616_v55 = vrot.slane %v1614_v62, 1 }
 0x257   : > { %v1217_v16 = vmul.f32 0.01, %v1153_v61  ;;  %vm1185_vm9 = vcmp.ge.f32.partialorder %v1153_v61, 0.0 }
 0x258   : > { %v1482_v42 = vrot.slane %v1480_v0, 7  ;;  %v1617_v17 = vor.u32 %v1616_v55, %v1612_v25 }
 0x259   : > { %v4561_v20 = vpop.permute.xlu2 %1085 }
 0x25a   : > { %v1485_v52 = vor.u32 %v1483_v49, %v1482_v42  ;;  %v1570_v4 = vsel %vm4218_vm6, %v1482_v42, 0  ;;  %v1249_v49 = vsel %vm1185_vm9, %v1153_v61, %v1217_v16  ;;  %v3787_v42 = vld [vmem:[%s5421_s3 + $0x10] sm:$0xff]  ;;  %v1232_v61 = vmul.f32 0.01, %v4415_v5 }
 0x25b   : > { %v1727_v24 = vshll.u32 %v1570_v4, 16  ;;  %v1281_v44 = vpack.c.bf16 %v1249_v49, %v1249_v49  ;;  %2052 = vmatpush.bf16.msra.mxu0 %v3787_v42  ;;  %3806 = vmatpush.bf16.msra.mxu3 %v3787_v42 }
 0x25c   : > { %v1264_v62 = vsel %vm1200_vm11, %v4415_v5, %v1232_v61 }
 0x25d   : > { %3914 = vset.pattern.permute.xlu2 %v4071_v3 }
 0x25e   : > { %487 = vperm.xlu1 %3913, %v4243_v27  }
 0x260   : > { %v831_v18 = vpop.permute.xlu1 %830 }
 0x261   : > { %v878_v23 = vmul.f32 %v4183_v38, %v831_v18  ;;  %v647_v18 = vadd.f32 %v4188_v40, %v611_v15 }
 0x263   : > { %v910_v34 = vadd.f32 %v878_v23, %v649_v47  ;;  %v4547_v47 = vsel %vm4218_vm6, 0, %v1485_v52  ;;  %v1216_v23 = vmul.f32 0.01, %v4390_v14  ;;  %v908_v58 = vadd.f32 %v876_v19, %v647_v18 }
 0x264   : > { %v1722_v8 = vshll.u32 %v4547_v47, 16  ;;  %v1720_v52 = vshrl.u32 %v4547_v47, 16  ;;  %v1868_v5 = vrot.slane %v4547_v47, 1 }
 0x265   : > { %v4510_v39 = vadd.f32 %v1139_v30, %v910_v34  ;;  %752 = vperm.xlu2 %3914, %v4243_v27   ;;  %v1844_v34 = vrot.slane %v4521_v45, 1  ;;  %v1248_v22 = vsel %vm1184_vm8, %v4390_v14, %v1216_v23  ;;  %v1169_v0 = vadd.f32 %v1137_v36, %v908_v58  ;;  %v3786_v36 = vld [vmem:[%s5421_s3 + $0x8] sm:$0xff] }
 0x266   : > { %3915 = vset.pattern.permute.xlu1 %v4090_v12  ;;  %v1724_v14 = vrot.slane %v1722_v8, 1  ;;  %v1280_v31 = vpack.c.bf16 %v1248_v22, %v1248_v22  ;;  %v1621_v23 = vrot.slane %v1619_v48, 1  ;;  %2053 = vmatpush.bf16.msra.mxu0 %v3786_v36 }
 0x267   : > { %v1846_v32 = vsel %vm1831_vm1, %v1844_v34, %v1845_v43  ;;  %v1233_v15 = vmul.f32 0.01, %v1169_v0  ;;  %vm1201_vm10 = vcmp.ge.f32.partialorder %v1169_v0, 0.0  ;;  %v475_v18 = vpop.permute.xlu2 %474  ;;  %3807 = vmatpush.bf16.msra.mxu3 %v3786_v36  ;;  %v1296_v43 = vpack.c.bf16 %v1264_v62, %v1264_v62 }
 0x268   : > { %v1622_v34 = vsel %vm1574_vm7, %v1617_v17, %v1621_v23  ;;  %vm1203_vm15 = vcmp.ge.f32.partialorder %v4510_v39, 0.0 }
 0x269   : > { %v1265_v28 = vsel %vm1201_vm10, %v1169_v0, %v1233_v15  ;;  %v1373_v55 = vunpack.c.l.b16 %v1296_v43  ;;  %v4617_v15 = vld [vmem:[%s5419_s1 + $0x2] ss:$0 sm:$0xff] }
 0x26a   : > { %v1297_v8 = vpack.c.bf16 %v1265_v28, %v1265_v28 }
 0x26c   : > { %v1374_v22 = vunpack.c.l.b16 %v1297_v8 }
 0x26d   : > { %3916 = vset.pattern.permute.xlu2 %v4096_v13 }
 0x26e   : > { %758 = vperm.xlu1 %3915, %v4243_v27  }
 0x270   : > { %v469_v30 = vpop.permute.xlu1 %468 }
 0x271   : > { %v598_v56 = vmul.f32 %v4177_v35, %v469_v30  ;;  %v1729_v30 = vrot.slane %v1727_v24, 1 }
 0x273   : > { %v634_v19 = vadd.f32 %v4188_v40, %v598_v56  ;;  %v1358_v40 = vunpack.c.l.b16 %v1281_v44 }
 0x275   : > { %1013 = vperm.xlu2 %3916, %v4243_v27   ;;  %v1624_v27 = vshrl.u32 %v4521_v45, 16 }
 0x276   : > { %1771 = vrot.lane.b32.xlu1 %v1610_v51, %s3998_s13  ;;  %v1725_v51 = vor.u32 %v1724_v14, %v1720_v52 }
 0x277   : > { %3918 = vset.pattern.permute.xlu1 %v4087_v11  ;;  %v1629_v37 = vor.u32 %v1628_v60, %v1624_v27  ;;  %v1357_v60 = vunpack.c.l.b16 %v1280_v31  ;;  %v1124_v27 = vmul.f32 %v4193_v41, %v4347_v63  ;;  %v3785_v41 = vld [vmem:[%s5421_s3] sm:$0xff]  ;;  %v4598_v63 = vpop.permute.xlu0 %578  ;;  %v747_v0 = vpop.permute.xlu2 %746 }
 0x278   : > { %v1730_v58 = vsel %vm1574_vm7, %v1725_v51, %v1729_v30  ;;  %2054 = vmatpush.bf16.msra.mxu0 %v3785_v41  ;;  %3808 = vmatpush.bf16.msra.mxu3 %v3785_v41  ;;  %v864_v56 = vmul.f32 %v4183_v38, %v747_v0  ;;  %v4609_v31 = vld [vmem:[%s5420_s2] ss:$0 sm:$0xff]  ;;  %v4648_v41 = vld [vmem:[%s5419_s1 + $0x1] ss:$0 sm:$0xff] }
 0x279   : > { %v1634_v50 = vsel %vm1574_vm7, %v1629_v37, %v1633_v21  ;;  %v1384_v37 = vpack.c.b16 %v1358_v40, %v1357_v60  ;;  %v1869_v21 = vrot.slane %v1570_v4, 1  ;;  %v877_v43 = vmul.f32 %v4648_v41, %v4532_v57 }
 0x27b   : > { %v1431_v54 = vshrl.u32 %v1384_v37, 16  ;;  %v1870_v49 = vsel %vm1831_vm1, %v1868_v5, %v1869_v21  ;;  %v1434_v48 = vshll.u32 %v1384_v37, 16 }
 0x27d   : > { %1888 = vrot.lane.b32.xlu2 %v1846_v32, %s3999_s14  ;;  %v599_v32 = vmul.f32 %v4177_v35, %v475_v18  ;;  %v1433_v14 = vrot.slane %v1431_v54, 7 }
 0x27e   : > { %1775 = vrot.lane.b32.xlu1 %v1634_v50, %s3998_s13  ;;  %3919 = vset.pattern.permute.xlu2 %v4071_v3  ;;  %v1392_v50 = vpack.c.b16 %v1374_v22, %v1373_v55 }
 0x27f   : > { %v635_v4 = vadd.f32 %v4609_v31, %v599_v32  ;;  %v4612_v25 = vpop.permute.xlu0 %1769  ;;  %v1436_v24 = vor.u32 %v1434_v48, %v1433_v14  ;;  %v1563_v62 = vsel %vm4218_vm6, %v1433_v14, 0  ;;  %v1138_v32 = vmul.f32 %v4617_v15, %v4561_v20 }
 0x280   : > { %v741_v53 = vpop.permute.xlu1 %740  ;;  %v1487_v44 = vshrl.u32 %v1392_v50, 16  ;;  %v1490_v18 = vshll.u32 %v1392_v50, 16  ;;  %v1643_v0 = vshll.u32 %v1563_v62, 16  ;;  %v1235_v48 = vmul.f32 0.01, %v4510_v39 }
 0x281   : > { %v863_v2 = vmul.f32 %v4183_v38, %v741_v53  ;;  %v896_v38 = vadd.f32 %v864_v56, %v635_v4 }
 0x282   : > { %v1489_v51 = vrot.slane %v1487_v44, 7  ;;  %v1645_v50 = vrot.slane %v1643_v0, 1  ;;  %v1916_v0 = vsel %vm1912_vm14, %v4228_v9, %v4612_v25 }
 0x283   : > { %v895_v26 = vadd.f32 %v863_v2, %v634_v19  ;;  %v4624_v2 = vsel %vm4218_vm6, 0, %v1436_v24 }
 0x284   : > { %v1492_v40 = vor.u32 %v1490_v18, %v1489_v51  ;;  %v1636_v22 = vshrl.u32 %v4624_v2, 16  ;;  %v1571_v57 = vsel %vm4218_vm6, %v1489_v51, 0 }
 0x285   : > { %v1156_v16 = vadd.f32 %v1124_v27, %v895_v26  ;;  %1773 = vrot.lane.b32.xlu2 %v1622_v34, %s3998_s13  ;;  %v1638_v27 = vshll.u32 %v4624_v2, 16 }
 0x286   : > { %1791 = vrot.lane.b32.xlu1 %v1730_v58, %s3998_s13  ;;  %v4643_v8 = vsel %vm4218_vm6, 0, %v1492_v40 }
 0x287   : > { %v1220_v35 = vmul.f32 0.01, %v1156_v16  ;;  %vm1188_vm12 = vcmp.ge.f32.partialorder %v1156_v16, 0.0  ;;  %v560_v28 = vpop.permute.xlu0 %559  ;;  %v1640_v37 = vrot.slane %v1638_v27, 1  ;;  %v4652_v5 = vpop.permute.xlu2 %572  ;;  %v1732_v20 = vshrl.u32 %v4643_v8, 16 }
 0x289   : > { %v1252_v53 = vsel %vm1188_vm12, %v1156_v16, %v1220_v35  ;;  %v4636_v16 = vld [vmem:[%s5419_s1] ss:$0 sm:$0xff]  ;;  %v1641_v55 = vor.u32 %v1640_v37, %v1636_v22  ;;  %v1441_v22 = vshll.u32 %v4486_v1, 16 }
 0x28a   : > { %v1284_v19 = vpack.c.bf16 %v1252_v53, %v1252_v53  ;;  %v612_v58 = vmul.f32 %v4636_v16, %v560_v28  ;;  %v1871_v28 = vrot.slane %v4643_v8, 1 }
 0x28b   : > { %v1646_v4 = vsel %vm1574_vm7, %v1641_v55, %v1645_v50 }
 0x28c   : > { %v1361_v26 = vunpack.c.l.b16 %v1284_v19  ;;  %v648_v54 = vadd.f32 %v4609_v31, %v612_v58  ;;  %v1267_v19 = vsel %vm1203_vm15, %v4510_v39, %v1235_v48  ;;  %v1872_v39 = vrot.slane %v1571_v57, 1 }
 0x28d   : > { %1904 = vrot.lane.b32.xlu2 %v1870_v49, %s3999_s14  ;;  %v1734_v49 = vshll.u32 %v4643_v8, 16  ;;  %v1299_v27 = vpack.c.bf16 %v1267_v19, %v1267_v19 }
 0x28e   : > { %500 = vperm.xlu1 %3918, %v4249_v33   ;;  %v909_v56 = vadd.f32 %v877_v43, %v648_v54  ;;  %v1873_v58 = vsel %vm1831_vm1, %v1871_v28, %v1872_v39 }
 0x28f   : > { %v1736_v35 = vrot.slane %v1734_v49, 1  ;;  %v1881_v24 = vpop.permute.xlu2 %1880 }
 0x290   : > { %v1008_v42 = vpop.permute.xlu1 %1007  ;;  %v1170_v14 = vadd.f32 %v1138_v32, %v909_v56 }
 0x291   : > { %v1125_v52 = vmul.f32 %v4617_v15, %v1008_v42  ;;  %v1739_v42 = vshll.u32 %v1571_v57, 16  ;;  %v1737_v53 = vor.u32 %v1736_v35, %v1732_v20 }
 0x292   : > { %vm1202_vm4 = vcmp.ge.f32.partialorder %v1170_v14, 0.0 }
 0x293   : > { %v1157_v17 = vadd.f32 %v1125_v52, %v896_v38  ;;  %v1847_v52 = vrot.slane %v4624_v2, 1  ;;  %v1741_v51 = vrot.slane %v1739_v42, 1 }
 0x295   : > { %vm1189_vm13 = vcmp.ge.f32.partialorder %v1157_v17, 0.0  ;;  %v1221_v61 = vmul.f32 0.01, %v1157_v17  ;;  %764 = vperm.xlu2 %3919, %v4249_v33  }
 0x296   : > { %3920 = vset.pattern.permute.xlu1 %v4090_v12 }
 0x297   : > { %v1253_v60 = vsel %vm1189_vm13, %v1157_v17, %v1221_v61  ;;  %v1848_v61 = vrot.slane %v1563_v62, 1  ;;  %v4683_v62 = vpop.permute.xlu2 %1884 }
 0x298   : > { %v1285_v23 = vpack.c.bf16 %v1253_v60, %v1253_v60  ;;  %v4626_v36 = vpop.permute.xlu1 %1882 }
 0x299   : > { %v1849_v60 = vsel %vm1831_vm1, %v1847_v52, %v1848_v61  ;;  %v1949_v54 = vsel %vm1945_vm3, %v1916_v0, %v4626_v36  ;;  %v614_v36 = vmul.f32 %v4636_v16, %v4652_v5 }
 0x29a   : > { %v1362_v30 = vunpack.c.l.b16 %v1285_v23  ;;  %v1742_v23 = vsel %vm1574_vm7, %v1737_v53, %v1741_v51 }
 0x29b   : > { %v650_v5 = vadd.f32 %v4609_v31, %v614_v36 }
 0x29c   : > { %v4629_v34 = vpack.c.b16 %v1362_v30, %v1361_v26  ;;  %v1376_v26 = vunpack.c.l.b16 %v1299_v27  ;;  %v1438_v30 = vshrl.u32 %v4486_v1, 16  ;;  %v482_v27 = vpop.permute.xlu0 %481 }
 0x29d   : > { %3921 = vset.pattern.permute.xlu2 %v4096_v13 }
 0x29e   : > { %770 = vperm.xlu1 %3920, %v4249_v33   ;;  %v1440_v43 = vrot.slane %v1438_v30, 7 }
 0x29f   : > { %v843_v56 = vpop.permute.xlu2 %842 }
 0x2a0   : > { %v4655_v21 = vpop.permute.xlu1 %1886  ;;  %v1443_v32 = vor.u32 %v1441_v22, %v1440_v43 }
 0x2a2   : > { %v4699_v1 = vsel %vm4218_vm6, 0, %v1443_v32 }
 0x2a3   : > { %v1650_v9 = vshll.u32 %v4699_v1, 16 }
 0x2a5   : > { %1025 = vperm.xlu2 %3921, %v4249_v33   ;;  %v1234_v33 = vmul.f32 0.01, %v1170_v14  ;;  %v1652_v20 = vrot.slane %v1650_v9, 1 }
 0x2a6   : > { %1777 = vrot.lane.b32.xlu1 %v1646_v4, %s3998_s13  ;;  %v615_v4 = vmul.f32 %v4636_v16, %v4598_v63 }
 0x2a7   : > { %3922 = vset.pattern.permute.xlu1 %v4087_v11  ;;  %v1266_v18 = vsel %vm1202_vm4, %v1170_v14, %v1234_v33  ;;  %v1564_v14 = vsel %vm4218_vm6, %v1440_v43, 0  ;;  %v880_v33 = vmul.f32 %v4648_v41, %v843_v56 }
 0x2a8   : > { %v1768_v38 = vpop.permute.xlu1 %1767  ;;  %v1851_v0 = vrot.slane %v1564_v14, 1 }
 0x2a9   : > { %v1914_v44 = vsel %vm1912_vm14, %v4434_v29, %v1768_v38  ;;  %v1298_v29 = vpack.c.bf16 %v1266_v18, %v1266_v18  ;;  %v1655_v38 = vshll.u32 %v1564_v14, 16 }
 0x2aa   : > { %v1947_v17 = vsel %vm1945_vm3, %v1914_v44, %v1881_v24  ;;  %v1648_v24 = vshrl.u32 %v4699_v1, 16  ;;  %v651_v44 = vadd.f32 %v4609_v31, %v615_v4 }
 0x2ab   : > { %3701 = vmatmul.msk.bf16.vlgmr.msra.gmra.mxu0 %vm2014_vm2, %v1947_v17  ;;  %v1375_v40 = vunpack.c.l.b16 %v1298_v29  ;;  %v1657_v18 = vrot.slane %v1655_v38, 1 }
 0x2ac   : > { %v1653_v61 = vor.u32 %v1652_v20, %v1648_v24  ;;  %v912_v51 = vadd.f32 %v880_v33, %v651_v44 }
 0x2ad   : > { %1890 = vrot.lane.b32.xlu2 %v1849_v60, %s3999_s14  ;;  %v1393_v37 = vpack.c.b16 %v1376_v26, %v1375_v40 }
 0x2ae   : > { %1793 = vrot.lane.b32.xlu1 %v1742_v23, %s3998_s13  ;;  %3923 = vset.pattern.permute.xlu2 %v4071_v3  ;;  %v1658_v28 = vsel %vm1574_vm7, %v1653_v61, %v1657_v18 }
 0x2af   : > { %v1494_v55 = vshrl.u32 %v1393_v37, 16  ;;  %v1497_v57 = vshll.u32 %v1393_v37, 16  ;;  %v1104_v42 = vpop.permute.xlu2 %1103  ;;  %v1850_v37 = vrot.slane %v4699_v1, 1 }
 0x2b0   : > { %v837_v49 = vpop.permute.xlu1 %836  ;;  %v1141_v53 = vmul.f32 %v4617_v15, %v1104_v42  ;;  %v1445_v42 = vshrl.u32 %v4629_v34, 16 }
 0x2b1   : > { %v1496_v50 = vrot.slane %v1494_v55, 7  ;;  %v879_v48 = vmul.f32 %v4648_v41, %v837_v49  ;;  %v1852_v32 = vsel %vm1831_vm1, %v1850_v37, %v1851_v0  ;;  %v600_v55 = vmul.f32 %v4636_v16, %v482_v27 }
 0x2b2   : > { %v1173_v29 = vadd.f32 %v1141_v53, %v912_v51  ;;  %v1447_v44 = vrot.slane %v1445_v42, 7 }
 0x2b3   : > { %v1499_v25 = vor.u32 %v1497_v57, %v1496_v50  ;;  %v911_v17 = vadd.f32 %v879_v48, %v650_v5  ;;  %v1572_v23 = vsel %vm4218_vm6, %v1496_v50, 0  ;;  %v4736_v57 = vpop.permute.xlu0 %494  ;;  %v636_v4 = vadd.f32 %v4609_v31, %v600_v55 }
 0x2b4   : > { %v1237_v43 = vmul.f32 0.01, %v1173_v29  ;;  %vm1205_vm8 = vcmp.ge.f32.partialorder %v1173_v29, 0.0  ;;  %v1875_v20 = vrot.slane %v1572_v23, 1 }
 0x2b5   : > { %1906 = vrot.lane.b32.xlu2 %v1873_v58, %s3999_s14  ;;  %v4713_v52 = vsel %vm4218_vm6, 0, %v1499_v25  ;;  %v1751_v58 = vshll.u32 %v1572_v23, 16 }
 0x2b6   : > { %513 = vperm.xlu1 %3922, %v4278_v46   ;;  %v1746_v19 = vshll.u32 %v4713_v52, 16  ;;  %v1744_v40 = vshrl.u32 %v4713_v52, 16  ;;  %v1269_v49 = vsel %vm1205_vm8, %v1173_v29, %v1237_v43  ;;  %v1874_v14 = vrot.slane %v4713_v52, 1 }
 0x2b7   : > { %v1301_v25 = vpack.c.bf16 %v1269_v49, %v1269_v49 }
 0x2b8   : > { %v1748_v26 = vrot.slane %v1746_v19, 1 }
 0x2b9   : > { %v1378_v5 = vunpack.c.l.b16 %v1301_v25 }
 0x2ba   : > { %v1749_v22 = vor.u32 %v1748_v26, %v1744_v40 }
 0x2bb   : > { %3702 = vmatmul.msk.bf16.gmra.mxu0 %vm2014_vm2, %v1949_v54  ;;  %v1753_v54 = vrot.slane %v1751_v58, 1  ;;  %v1020_v53 = vpop.permute.xlu0 %1019 }
 0x2bc   : > { %v1127_v29 = vmul.f32 %v4617_v15, %v1020_v53 }
 0x2bd   : > { %776 = vperm.xlu2 %3923, %v4278_v46  }
 0x2be   : > { %3924 = vset.pattern.permute.xlu1 %v4090_v12 }
 0x2bf   : > { %v753_v39 = vpop.permute.xlu2 %752 }
 0x2c0   : > { %v1098_v35 = vpop.permute.xlu1 %1097  ;;  %v865_v9 = vmul.f32 %v4648_v41, %v753_v39 }
 0x2c1   : > { %v1140_v63 = vmul.f32 %v4617_v15, %v1098_v35 }
 0x2c2   : > { %v897_v38 = vadd.f32 %v865_v9, %v636_v4 }
 0x2c3   : > { %v1172_v60 = vadd.f32 %v1140_v63, %v911_v17  ;;  %v1448_v17 = vshll.u32 %v4629_v34, 16 }
 0x2c5   : > { %3925 = vset.pattern.permute.xlu2 %v4096_v13  ;;  %v1236_v30 = vmul.f32 0.01, %v1172_v60  ;;  %vm1204_vm5 = vcmp.ge.f32.partialorder %v1172_v60, 0.0  ;;  %v1450_v23 = vor.u32 %v1448_v17, %v1447_v44 }
 0x2c6   : > { %782 = vperm.xlu1 %3924, %v4278_v46  }
 0x2c7   : > { %v4757_v34 = vsel %vm4218_vm6, 0, %v1450_v23 }
 0x2cd   : > { %1037 = vperm.xlu2 %3925, %v4278_v46   ;;  %v1268_v46 = vsel %vm1204_vm5, %v1172_v60, %v1236_v30 }
 0x2ce   : > { %1779 = vrot.lane.b32.xlu1 %v1658_v28, %s3998_s13  ;;  %v1300_v56 = vpack.c.bf16 %v1268_v46, %v1268_v46  ;;  %v1662_v46 = vshll.u32 %v4757_v34, 16 }
 0x2cf   : > { %3927 = vset.pattern.permute.xlu1 %v4087_v11  ;;  %v1754_v11 = vsel %vm1574_vm7, %v1749_v22, %v1753_v54  ;;  %v1014_v50 = vpop.permute.xlu2 %1013 }
 0x2d0   : > { %v488_v36 = vpop.permute.xlu1 %487  ;;  %v1126_v35 = vmul.f32 %v4617_v15, %v1014_v50  ;;  %v1377_v48 = vunpack.c.l.b16 %v1300_v56  ;;  %v1565_v56 = vsel %vm4218_vm6, %v1447_v44, 0  ;;  %v1664_v50 = vrot.slane %v1662_v46, 1 }
 0x2d1   : > { %v601_v63 = vmul.f32 %v4636_v16, %v488_v36  ;;  %v1667_v25 = vshll.u32 %v1565_v56, 16 }
 0x2d2   : > { %v1158_v33 = vadd.f32 %v1126_v35, %v897_v38  ;;  %v1394_v24 = vpack.c.b16 %v1378_v5, %v1377_v48 }
 0x2d3   : > { %v637_v60 = vadd.f32 %v4609_v31, %v601_v63  ;;  %v1669_v42 = vrot.slane %v1667_v25, 1 }
 0x2d4   : > { %v1222_v51 = vmul.f32 0.01, %v1158_v33  ;;  %vm1190_vm9 = vcmp.ge.f32.partialorder %v1158_v33, 0.0  ;;  %v1501_v27 = vshrl.u32 %v1394_v24, 16  ;;  %v1504_v58 = vshll.u32 %v1394_v24, 16 }
 0x2d5   : > { %1892 = vrot.lane.b32.xlu2 %v1852_v32, %s3999_s14 }
 0x2d6   : > { %1795 = vrot.lane.b32.xlu1 %v1754_v11, %s3998_s13  ;;  %3928 = vset.pattern.permute.xlu2 %v4071_v3  ;;  %v1876_v3 = vsel %vm1831_vm1, %v1874_v14, %v1875_v20  ;;  %v1254_v26 = vsel %vm1190_vm9, %v1158_v33, %v1222_v51  ;;  %v1503_v30 = vrot.slane %v1501_v27, 7 }
 0x2d7   : > { %v4748_v61 = vpop.permute.xlu2 %1888  ;;  %v1286_v37 = vpack.c.bf16 %v1254_v26, %v1254_v26  ;;  %v1854_v26 = vrot.slane %v1565_v56, 1 }
 0x2d8   : > { %v1506_v55 = vor.u32 %v1504_v58, %v1503_v30 }
 0x2d9   : > { %v1363_v49 = vunpack.c.l.b16 %v1286_v37 }
 0x2dd   : > { %1908 = vrot.lane.b32.xlu2 %v1876_v3, %s3999_s14 }
 0x2de   : > { %526 = vperm.xlu1 %3927, %v4302_v59  }
 0x2df   : > { %v1774_v32 = vpop.permute.xlu2 %1773 }
 0x2e0   : > { %v759_v19 = vpop.permute.xlu1 %758  ;;  %v1920_v53 = vsel %vm1912_vm14, %v4430_v10, %v1774_v32  ;;  %v602_v32 = vmul.f32 %v4636_v16, %v4736_v57 }
 0x2e1   : > { %v866_v18 = vmul.f32 %v4648_v41, %v759_v19 }
 0x2e3   : > { %v898_v28 = vadd.f32 %v866_v18, %v637_v60 }
 0x2e5   : > { %v1159_v39 = vadd.f32 %v1127_v29, %v898_v28  ;;  %788 = vperm.xlu2 %3928, %v4302_v59   ;;  %v1953_v28 = vsel %vm1945_vm3, %v1920_v53, %v4655_v21 }
 0x2e6   : > { %3929 = vset.pattern.permute.xlu1 %v4090_v12 }
 0x2e7   : > { %vm1191_vm10 = vcmp.ge.f32.partialorder %v1159_v39, 0.0  ;;  %v1223_v40 = vmul.f32 0.01, %v1159_v39  ;;  %v1905_v38 = vpop.permute.xlu2 %1904 }
 0x2e8   : > { %v1772_v43 = vpop.permute.xlu1 %1771 }
 0x2e9   : > { %v1255_v22 = vsel %vm1191_vm10, %v1159_v39, %v1223_v40  ;;  %v1918_v0 = vsel %vm1912_vm14, %v4462_v7, %v1772_v43  ;;  %v4771_v7 = vsel %vm4218_vm6, 0, %v1506_v55 }
 0x2ea   : > { %v1287_v54 = vpack.c.bf16 %v1255_v22, %v1255_v22  ;;  %v1951_v12 = vsel %vm1945_vm3, %v1918_v0, %v4683_v62  ;;  %v1660_v62 = vshrl.u32 %v4757_v34, 16  ;;  %v1758_v35 = vshll.u32 %v4771_v7, 16 }
 0x2eb   : > { %3703 = vmatmul.msk.bf16.gmra.mxu0 %vm2014_vm2, %v1951_v12  ;;  %v1756_v17 = vshrl.u32 %v4771_v7, 16  ;;  %v1877_v21 = vrot.slane %v4771_v7, 1 }
 0x2ec   : > { %v1364_v11 = vunpack.c.l.b16 %v1287_v54  ;;  %v1665_v4 = vor.u32 %v1664_v50, %v1660_v62  ;;  %v1760_v63 = vrot.slane %v1758_v35, 1  ;;  %v638_v50 = vadd.f32 %v4609_v31, %v602_v32 }
 0x2ed   : > { %3930 = vset.pattern.permute.xlu2 %v4096_v13  ;;  %v1573_v13 = vsel %vm4218_vm6, %v1503_v30, 0 }
 0x2ee   : > { %v1387_v9 = vpack.c.b16 %v1364_v11, %v1363_v49  ;;  %794 = vperm.xlu1 %3929, %v4302_v59   ;;  %v1670_v33 = vsel %vm1574_vm7, %v1665_v4, %v1669_v42  ;;  %v1763_v24 = vshll.u32 %v1573_v13, 16  ;;  %v1761_v23 = vor.u32 %v1760_v63, %v1756_v17  ;;  %v1032_v4 = vpop.permute.xlu0 %1031 }
 0x2ef   : > { %v765_v43 = vpop.permute.xlu2 %764  ;;  %v1878_v0 = vrot.slane %v1573_v13, 1  ;;  %v1129_v42 = vmul.f32 %v4617_v15, %v1032_v4 }
 0x2f0   : > { %v1776_v36 = vpop.permute.xlu1 %1775  ;;  %v1452_v14 = vshrl.u32 %v1387_v9, 16  ;;  %v1455_v20 = vshll.u32 %v1387_v9, 16  ;;  %v1765_v39 = vrot.slane %v1763_v24, 1  ;;  %v867_v11 = vmul.f32 %v4648_v41, %v765_v43 }
 0x2f1   : > { %v1879_v54 = vsel %vm1831_vm1, %v1877_v21, %v1878_v0  ;;  %v1922_v49 = vsel %vm1912_vm14, %v4521_v45, %v1776_v36 }
 0x2f2   : > { %v1454_v48 = vrot.slane %v1452_v14, 7  ;;  %v1955_v57 = vsel %vm1945_vm3, %v1922_v49, %v4748_v61  ;;  %v899_v62 = vadd.f32 %v867_v11, %v638_v50 }
 0x2f4   : > { %v1457_v5 = vor.u32 %v1455_v20, %v1454_v48  ;;  %v1566_v3 = vsel %vm4218_vm6, %v1454_v48, 0 }
 0x2f5   : > { %1049 = vperm.xlu2 %3930, %v4302_v59   ;;  %v1679_v51 = vshll.u32 %v1566_v3, 16  ;;  %v1853_v59 = vrot.slane %v4757_v34, 1  ;;  %v1857_v46 = vrot.slane %v1566_v3, 1 }
 0x2f6   : > { %1781 = vrot.lane.b32.xlu1 %v1670_v33, %s3998_s13  ;;  %v4784_v44 = vsel %vm4218_vm6, 0, %v1457_v5  ;;  %v4828_v5 = vld [vmem:[%s5423_s5 + $0x58] sm:$0xff] }
 0x2f7   : > { %v1674_v19 = vshll.u32 %v4784_v44, 16  ;;  %v1672_v27 = vshrl.u32 %v4784_v44, 16  ;;  %v1681_v40 = vrot.slane %v1679_v51, 1  ;;  %v1855_v58 = vsel %vm1831_vm1, %v1853_v59, %v1854_v26  ;;  %3145 = vmatpush.bf16.msra.mxu2 %v4828_v5  ;;  %v4837_v51 = vld [vmem:[%s5423_s5 + $0x50] sm:$0xff] }
 0x2f8   : > { %v1792_v60 = vpop.permute.xlu1 %1791  ;;  %v1856_v22 = vrot.slane %v4784_v44, 1 }
 0x2f9   : > { %v1938_v18 = vsel %vm1912_vm14, %v4547_v47, %v1792_v60  ;;  %v1676_v29 = vrot.slane %v1674_v19, 1  ;;  %v1766_v47 = vsel %vm1574_vm7, %v1761_v23, %v1765_v39 }
 0x2fa   : > { %v1971_v10 = vsel %vm1945_vm3, %v1938_v18, %v1905_v38  ;;  %v1858_v12 = vsel %vm1831_vm1, %v1856_v22, %v1857_v46 }
 0x2fb   : > { %3704 = vmatmul.msk.bf16.gmra.mxu0 %vm2014_vm2, %v1953_v28  ;;  %3713 = vmatmul.msk.bf16.vlgmr.msra.gmra.mxu3 %vm2014_vm2, %v1971_v10  ;;  %v1677_v30 = vor.u32 %v1676_v29, %v1672_v27  ;;  %v1044_v10 = vpop.permute.xlu0 %1043 }
 0x2fc   : > { %3146 = vmatpush.bf16.msra.mxu2 %v4837_v51 }
 0x2fd   : > { %1894 = vrot.lane.b32.xlu2 %v1855_v58, %s3999_s14  ;;  %v1682_v37 = vsel %vm1574_vm7, %v1677_v30, %v1681_v40  ;;  %v4853_v40 = vld [vmem:[%s5423_s5 + $0x40] sm:$0xff] }
 0x2fe   : > { %1797 = vrot.lane.b32.xlu1 %v1766_v47, %s3998_s13  ;;  %1783 = vrot.lane.b32.xlu0 %v1682_v37, %s3998_s13 }
 0x2ff   : > { %v1026_v55 = vpop.permute.xlu2 %1025 }
 0x300   : > { %v501_v56 = vpop.permute.xlu1 %500  ;;  %v1128_v9 = vmul.f32 %v4617_v15, %v1026_v55 }
 0x301   : > { %v603_v25 = vmul.f32 %v4636_v16, %v501_v56 }
 0x302   : > { %v1160_v14 = vadd.f32 %v1128_v9, %v899_v62 }
 0x303   : > { %v639_v45 = vadd.f32 %v4609_v31, %v603_v25  ;;  %v508_v11 = vpop.permute.xlu0 %507 }
 0x304   : > { %v1224_v36 = vmul.f32 0.01, %v1160_v14  ;;  %vm1192_vm11 = vcmp.ge.f32.partialorder %v1160_v14, 0.0  ;;  %v604_v9 = vmul.f32 %v4636_v16, %v508_v11 }
 0x305   : > { %1910 = vrot.lane.b32.xlu2 %v1879_v54, %s3999_s14 }
 0x306   : > { %1896 = vrot.lane.b32.xlu1 %v1858_v12, %s3999_s14  ;;  %v1256_v38 = vsel %vm1192_vm11, %v1160_v14, %v1224_v36 }
 0x307   : > { %v1891_v20 = vpop.permute.xlu2 %1890  ;;  %v1288_v33 = vpack.c.bf16 %v1256_v38, %v1256_v38 }
 0x309   : > { %v1365_v60 = vunpack.c.l.b16 %v1288_v33 }
 0x30b   : > { %3705 = vmatmul.msk.bf16.gmra.mxu0 %vm2014_vm2, %v1955_v57 }
 0x30f   : > { %v1907_v18 = vpop.permute.xlu2 %1906 }
 0x310   : > { %v771_v35 = vpop.permute.xlu1 %770 }
 0x311   : > { %v868_v48 = vmul.f32 %v4648_v41, %v771_v35 }
 0x313   : > { %v900_v13 = vadd.f32 %v868_v48, %v639_v45  ;;  %v640_v45 = vadd.f32 %v4609_v31, %v604_v9 }
 0x315   : > { %v1161_v61 = vadd.f32 %v1129_v42, %v900_v13 }
 0x317   : > { %vm1193_vm12 = vcmp.ge.f32.partialorder %v1161_v61, 0.0  ;;  %v1225_v3 = vmul.f32 0.01, %v1161_v61  ;;  %v777_v37 = vpop.permute.xlu2 %776 }
 0x318   : > { %v1778_v63 = vpop.permute.xlu1 %1777  ;;  %v869_v14 = vmul.f32 %v4648_v41, %v777_v37 }
 0x319   : > { %v1257_v24 = vsel %vm1193_vm12, %v1161_v61, %v1225_v3  ;;  %v1924_v53 = vsel %vm1912_vm14, %v4624_v2, %v1778_v63  ;;  %v4844_v2 = vld [vmem:[%s5423_s5 + $0x48] sm:$0xff] }
 0x31a   : > { %v1289_v17 = vpack.c.bf16 %v1257_v24, %v1257_v24  ;;  %v1957_v19 = vsel %vm1945_vm3, %v1924_v53, %v1891_v20  ;;  %3147 = vmatpush.bf16.msra.mxu2 %v4844_v2  ;;  %v901_v42 = vadd.f32 %v869_v14, %v640_v45 }
 0x31b   : > { %3706 = vmatmul.msk.bf16.gmra.mxu0 %vm2014_vm2, %v1957_v19 }
 0x31c   : > { %v1366_v59 = vunpack.c.l.b16 %v1289_v17 }
 0x31e   : > { %v1388_v23 = vpack.c.b16 %v1366_v59, %v1365_v60  ;;  %3148 = vmatpush.bf16.msra.mxu2 %v4853_v40 }
 0x320   : > { %v1794_v27 = vpop.permute.xlu1 %1793  ;;  %v1459_v29 = vshrl.u32 %v1388_v23, 16  ;;  %v1462_v30 = vshll.u32 %v1388_v23, 16 }
 0x321   : > { %v1940_v28 = vsel %vm1912_vm14, %v4643_v8, %v1794_v27  ;;  %v4862_v8 = vld [vmem:[%s5422_s4] ss:$0 sm:$0xff] }
 0x322   : > { %v1973_v26 = vsel %vm1945_vm3, %v1940_v28, %v1907_v18  ;;  %v1461_v39 = vrot.slane %v1459_v29, 7  ;;  %v1131_v28 = vmul.f32 %v4617_v15, %v1044_v10 }
 0x323   : > { %3714 = vmatmul.msk.bf16.gmra.mxu3 %vm2014_vm2, %v1973_v26 }
 0x324   : > { %v1464_v58 = vor.u32 %v1462_v30, %v1461_v39  ;;  %v1567_v47 = vsel %vm4218_vm6, %v1461_v39, 0 }
 0x325   : > { %v1860_v22 = vrot.slane %v1567_v47, 1  ;;  %v1691_v46 = vshll.u32 %v1567_v47, 16 }
 0x326   : > { %v4866_v43 = vsel %vm4218_vm6, 0, %v1464_v58 }
 0x327   : > { %v1859_v21 = vrot.slane %v4866_v43, 1  ;;  %v1686_v0 = vshll.u32 %v4866_v43, 16  ;;  %v1684_v55 = vshrl.u32 %v4866_v43, 16  ;;  %v1693_v50 = vrot.slane %v1691_v46, 1  ;;  %v1038_v25 = vpop.permute.xlu2 %1037 }
 0x328   : > { %v2056_v54 = vpop.f32.mrf.mxu0  ;;  %v514_v4 = vpop.permute.xlu1 %513  ;;  %v1130_v48 = vmul.f32 %v4617_v15, %v1038_v25 }
 0x329   : > { %v2139_v32 = vadd.f32 %v4862_v8, %v2056_v54  ;;  %v1861_v12 = vsel %vm1831_vm1, %v1859_v21, %v1860_v22  ;;  %v1688_v49 = vrot.slane %v1686_v0, 1  ;;  %v605_v3 = vmul.f32 %v4636_v16, %v514_v4 }
 0x32a   : > { %1898 = vrot.lane.b32.xlu0 %v1861_v12, %s3999_s14  ;;  %v1162_v61 = vadd.f32 %v1130_v48, %v901_v42 }
 0x32b   : > { %v1689_v56 = vor.u32 %v1688_v49, %v1684_v55  ;;  %v2203_v57 = vmul.f32 0.01, %v2139_v32  ;;  %vm2171_vm13 = vcmp.ge.f32.partialorder %v2139_v32, 0.0  ;;  %v641_v59 = vadd.f32 %v4609_v31, %v605_v3 }
 0x32c   : > { %v1226_v60 = vmul.f32 0.01, %v1162_v61  ;;  %vm1194_vm4 = vcmp.ge.f32.partialorder %v1162_v61, 0.0 }
 0x32d   : > { %v1694_v62 = vsel %vm1574_vm7, %v1689_v56, %v1693_v50  ;;  %v2235_v36 = vsel %vm2171_vm13, %v2139_v32, %v2203_v57 }
 0x32e   : > { %1785 = vrot.lane.b32.xlu2 %v1694_v62, %s3998_s13  ;;  %v2267_v38 = vpack.c.bf16 %v2235_v36, %v2235_v36  ;;  %v1258_v30 = vsel %vm1194_vm4, %v1162_v61, %v1226_v60 }
 0x32f   : > { %v1893_v29 = vpop.permute.xlu2 %1892  ;;  %v1290_v0 = vpack.c.bf16 %v1258_v30, %v1258_v30 }
 0x330   : > { %v2058_v35 = vpop.f32.mrf.mxu0  ;;  %v2356_v24 = vunpack.c.l.b16 %v2267_v38 }
 0x331   : > { %v2140_v20 = vadd.f32 %v4862_v8, %v2058_v35  ;;  %v1367_v14 = vunpack.c.l.b16 %v1290_v0  ;;  %v521_v0 = vpop.permute.xlu0 %520 }
 0x333   : > { %vm2172_vm15 = vcmp.ge.f32.partialorder %v2140_v20, 0.0  ;;  %v2204_v13 = vmul.f32 0.01, %v2140_v20 }
 0x335   : > { %v2236_v33 = vsel %vm2172_vm15, %v2140_v20, %v2204_v13 }
 0x336   : > { %v2268_v63 = vpack.c.bf16 %v2236_v33, %v2236_v33 }
 0x337   : > { %v1909_v35 = vpop.permute.xlu2 %1908 }
 0x338   : > { %v2357_v53 = vunpack.c.l.b16 %v2268_v63  ;;  %v783_v17 = vpop.permute.xlu1 %782  ;;  %v2061_v19 = vpop.f32.mrf.mxu0 }
 0x339   : > { %v870_v18 = vmul.f32 %v4648_v41, %v783_v17  ;;  %v2141_v23 = vadd.f32 %v4862_v8, %v2061_v19 }
 0x33a   : > { %v2388_v27 = vpack.c.b16 %v2357_v53, %v2356_v24 }
 0x33b   : > { %v902_v26 = vadd.f32 %v870_v18, %v641_v59  ;;  %v2205_v47 = vmul.f32 0.01, %v2141_v23  ;;  %vm2173_vm5 = vcmp.ge.f32.partialorder %v2141_v23, 0.0 }
 0x33c   : > { %v2405_v39 = vshrl.u32 %v2388_v27, 16  ;;  %v2408_v37 = vshll.u32 %v2388_v27, 16 }
 0x33d   : > { %v1163_v58 = vadd.f32 %v1131_v28, %v902_v26  ;;  %v2237_v10 = vsel %vm2173_vm5, %v2141_v23, %v2205_v47 }
 0x33e   : > { %v2407_v21 = vrot.slane %v2405_v39, 7 }
 0x33f   : > { %vm1195_vm8 = vcmp.ge.f32.partialorder %v1163_v58, 0.0  ;;  %v1227_v22 = vmul.f32 0.01, %v1163_v58  ;;  %v789_v23 = vpop.permute.xlu2 %788 }
 0x340   : > { %v1780_v46 = vpop.permute.xlu1 %1779  ;;  %v2063_v54 = vpop.f32.mrf.mxu0  ;;  %v2410_v32 = vor.u32 %v2408_v37, %v2407_v21  ;;  %v4888_v12 = vsel %vm4218_vm6, %v2407_v21, 0 }
 0x341   : > { %v1259_v55 = vsel %vm1195_vm8, %v1163_v58, %v1227_v22  ;;  %v1926_v49 = vsel %vm1912_vm14, %v4699_v1, %v1780_v46  ;;  %v2142_v11 = vadd.f32 %v4862_v8, %v2063_v54  ;;  %v2837_v25 = vrot.slane %v4888_v12, 1 }
 0x342   : > { %v1291_v56 = vpack.c.bf16 %v1259_v55, %v1259_v55  ;;  %v1959_v50 = vsel %vm1945_vm3, %v1926_v49, %v1893_v29  ;;  %v4896_v9 = vsel %vm4218_vm6, 0, %v2410_v32  ;;  %v2269_v1 = vpack.c.bf16 %v2237_v10, %v2237_v10 }
 0x343   : > { %vm2174_vm9 = vcmp.ge.f32.partialorder %v2142_v11, 0.0  ;;  %v2206_v57 = vmul.f32 0.01, %v2142_v11  ;;  %3707 = vmatmul.msk.bf16.gmra.mxu0 %vm2014_vm2, %v1959_v50  ;;  %v2836_v62 = vrot.slane %v4896_v9, 1  ;;  %v2583_v59 = vshll.u32 %v4896_v9, 16 }
 0x344   : > { %v1368_v4 = vunpack.c.l.b16 %v1291_v56  ;;  %v2358_v42 = vunpack.c.l.b16 %v2269_v1  ;;  %v2588_v46 = vshll.u32 %v4888_v12, 16  ;;  %v2581_v32 = vshrl.u32 %v4896_v9, 16 }
 0x345   : > { %v2238_v45 = vsel %vm2174_vm9, %v2142_v11, %v2206_v57  ;;  %v2838_v36 = vsel %vm1831_vm1, %v2836_v62, %v2837_v25  ;;  %v2585_v22 = vrot.slane %v2583_v59, 1  ;;  %v606_v56 = vmul.f32 %v4636_v16, %v521_v0 }
 0x346   : > { %v1389_v48 = vpack.c.b16 %v1368_v4, %v1367_v14  ;;  %v2270_v20 = vpack.c.bf16 %v2238_v45, %v2238_v45  ;;  %3765 = vmatmul.msk.bf16.vlgmr.msra.gmra.mxu2 %vm1945_vm3, %v2838_v36  ;;  %v871_v25 = vmul.f32 %v4648_v41, %v789_v23  ;;  %v2590_v14 = vrot.slane %v2588_v46, 1 }
 0x347   : > { %v2586_v57 = vor.u32 %v2585_v22, %v2581_v32  ;;  %v642_v1 = vadd.f32 %v4609_v31, %v606_v56 }
 0x348   : > { %v2359_v13 = vunpack.c.l.b16 %v2270_v20  ;;  %v1796_v38 = vpop.permute.xlu1 %1795  ;;  %v1466_v61 = vshrl.u32 %v1389_v48, 16  ;;  %v1469_v33 = vshll.u32 %v1389_v48, 16 }
 0x349   : > { %v1942_v3 = vsel %vm1912_vm14, %v4713_v52, %v1796_v38  ;;  %v2591_v45 = vsel %vm1574_vm7, %v2586_v57, %v2590_v14  ;;  %v903_v36 = vadd.f32 %v871_v25, %v642_v1  ;;  %v3798_v1 = vld [vmem:[%s5423_s5 + $0x38] sm:$0xff] }
 0x34a   : > { %v2389_v63 = vpack.c.b16 %v2359_v13, %v2358_v42  ;;  %v1975_v24 = vsel %vm1945_vm3, %v1942_v3, %v1909_v35  ;;  %v1468_v53 = vrot.slane %v1466_v61, 7  ;;  %v1056_v42 = vpop.permute.xlu0 %1055  ;;  %3052 = vmatpush.bf16.msra.mxu1 %v3798_v1  ;;  %3809 = vmatpush.bf16.msrb.mxu3 %v3798_v1 }
 0x34b   : > { %3715 = vmatmul.msk.bf16.gmra.mxu3 %vm2014_vm2, %v1975_v24 }
 0x34c   : > { %v1471_v17 = vor.u32 %v1469_v33, %v1468_v53  ;;  %v1568_v19 = vsel %vm4218_vm6, %v1468_v53, 0  ;;  %v2412_v60 = vshrl.u32 %v2389_v63, 16  ;;  %v2415_v18 = vshll.u32 %v2389_v63, 16 }
 0x34d   : > { %v1863_v28 = vrot.slane %v1568_v19, 1  ;;  %v1703_v39 = vshll.u32 %v1568_v19, 16  ;;  %v1133_v33 = vmul.f32 %v4617_v15, %v1056_v42 }
 0x34e   : > { %v4912_v27 = vsel %vm4218_vm6, 0, %v1471_v17  ;;  %v2414_v52 = vrot.slane %v2412_v60, 7 }
 0x34f   : > { %v1862_v29 = vrot.slane %v4912_v27, 1  ;;  %v1698_v26 = vshll.u32 %v4912_v27, 16  ;;  %v1696_v37 = vshrl.u32 %v4912_v27, 16  ;;  %v1705_v11 = vrot.slane %v1703_v39, 1  ;;  %v1050_v62 = vpop.permute.xlu2 %1049 }
 0x350   : > { %v2417_v30 = vor.u32 %v2415_v18, %v2414_v52  ;;  %v4918_v58 = vsel %vm4218_vm6, %v2414_v52, 0  ;;  %v527_v4 = vpop.permute.xlu1 %526  ;;  %v1132_v35 = vmul.f32 %v4617_v15, %v1050_v62 }
 0x351   : > { %v1864_v47 = vsel %vm1831_vm1, %v1862_v29, %v1863_v28  ;;  %v1700_v21 = vrot.slane %v1698_v26, 1  ;;  %v2840_v10 = vrot.slane %v4918_v58, 1  ;;  %v607_v20 = vmul.f32 %v4636_v16, %v527_v4 }
 0x352   : > { %1900 = vrot.lane.b32.xlu2 %v1864_v47, %s3999_s14  ;;  %v4926_v54 = vsel %vm4218_vm6, 0, %v2417_v30  ;;  %v1164_v48 = vadd.f32 %v1132_v35, %v903_v36 }
 0x353   : > { %v2839_v55 = vrot.slane %v4926_v54, 1  ;;  %v1701_v49 = vor.u32 %v1700_v21, %v1696_v37  ;;  %v643_v61 = vadd.f32 %v4609_v31, %v607_v20 }
 0x354   : > { %v1228_v38 = vmul.f32 0.01, %v1164_v48  ;;  %vm1196_vm10 = vcmp.ge.f32.partialorder %v1164_v48, 0.0 }
 0x355   : > { %v2841_v50 = vsel %vm1831_vm1, %v2839_v55, %v2840_v10  ;;  %v1706_v12 = vsel %vm1574_vm7, %v1701_v49, %v1705_v11 }
 0x356   : > { %3766 = vmatmul.msk.bf16.gmra.mxu2 %vm1945_vm3, %v2841_v50  ;;  %1787 = vrot.lane.b32.xlu1 %v1706_v12, %s3998_s13  ;;  %v1260_v24 = vsel %vm1196_vm10, %v1164_v48, %v1228_v38 }
 0x357   : > { %v1895_v17 = vpop.permute.xlu2 %1894  ;;  %v1292_v60 = vpack.c.bf16 %v1260_v24, %v1260_v24  ;;  %v3797_v24 = vld [vmem:[%s5423_s5 + $0x30] sm:$0xff] }
 0x358   : > { %3053 = vmatpush.bf16.msra.mxu1 %v3797_v24  ;;  %3810 = vmatpush.bf16.msrb.mxu3 %v3797_v24 }
 0x359   : > { %v1369_v15 = vunpack.c.l.b16 %v1292_v60 }
 0x35a   : > { %2772 = vrot.lane.b32.xlu2 %v2591_v45, %s3999_s14 }
 0x35f   : > { %v1911_v37 = vpop.permute.xlu2 %1910 }
 0x360   : > { %v795_v13 = vpop.permute.xlu1 %794 }
 0x361   : > { %v872_v3 = vmul.f32 %v4648_v41, %v795_v13 }
 0x363   : > { %v904_v63 = vadd.f32 %v872_v3, %v643_v61 }
 0x365   : > { %v1165_v53 = vadd.f32 %v1133_v33, %v904_v63 }
 0x367   : > { %vm1197_vm11 = vcmp.ge.f32.partialorder %v1165_v53, 0.0  ;;  %v1229_v19 = vmul.f32 0.01, %v1165_v53 }
 0x368   : > { %v2066_v59 = vpop.f32.mrf.mxu0  ;;  %v1782_v18 = vpop.permute.xlu1 %1781 }
 0x369   : > { %v1261_v16 = vsel %vm1197_vm11, %v1165_v53, %v1229_v19  ;;  %v2143_v23 = vadd.f32 %v4862_v8, %v2066_v59  ;;  %v1928_v31 = vsel %vm1912_vm14, %v4757_v34, %v1782_v18 }
 0x36a   : > { %v1293_v52 = vpack.c.bf16 %v1261_v16, %v1261_v16  ;;  %v1961_v41 = vsel %vm1945_vm3, %v1928_v31, %v1895_v17 }
 0x36b   : > { %3708 = vmatmul.msk.bf16.gmra.mxu0 %vm2014_vm2, %v1961_v41  ;;  %v2207_v28 = vmul.f32 0.01, %v2143_v23  ;;  %vm2175_vm12 = vcmp.ge.f32.partialorder %v2143_v23, 0.0  ;;  %v3796_v41 = vld [vmem:[%s5423_s5 + $0x28] sm:$0xff] }
 0x36c   : > { %v1370_v29 = vunpack.c.l.b16 %v1293_v52  ;;  %v2593_v52 = vshrl.u32 %v4926_v54, 16  ;;  %3054 = vmatpush.bf16.msra.mxu1 %v3796_v41  ;;  %3811 = vmatpush.bf16.msrb.mxu3 %v3796_v41 }
 0x36d   : > { %v2239_v21 = vsel %vm2175_vm12, %v2143_v23, %v2207_v28  ;;  %v2600_v23 = vshll.u32 %v4918_v58, 16 }
 0x36e   : > { %v1390_v26 = vpack.c.b16 %v1370_v29, %v1369_v15  ;;  %v2271_v10 = vpack.c.bf16 %v2239_v21, %v2239_v21 }
 0x370   : > { %v2068_v39 = vpop.f32.mrf.mxu0  ;;  %v1798_v30 = vpop.permute.xlu1 %1797  ;;  %v1473_v47 = vshrl.u32 %v1390_v26, 16  ;;  %v1476_v0 = vshll.u32 %v1390_v26, 16  ;;  %v2360_v35 = vunpack.c.l.b16 %v2271_v10 }
 0x371   : > { %v2144_v22 = vadd.f32 %v4862_v8, %v2068_v39  ;;  %v1944_v34 = vsel %vm1912_vm14, %v4771_v7, %v1798_v30  ;;  %v1784_v50 = vpop.permute.xlu0 %1783  ;;  %v2595_v7 = vshll.u32 %v4926_v54, 16 }
 0x372   : > { %v1977_v46 = vsel %vm1945_vm3, %v1944_v34, %v1911_v37  ;;  %v1475_v32 = vrot.slane %v1473_v47, 7  ;;  %v1930_v36 = vsel %vm1912_vm14, %v4784_v44, %v1784_v50  ;;  %v2602_v37 = vrot.slane %v2600_v23, 1 }
 0x373   : > { %vm2176_vm13 = vcmp.ge.f32.partialorder %v2144_v22, 0.0  ;;  %v2208_v55 = vmul.f32 0.01, %v2144_v22  ;;  %3716 = vmatmul.msk.bf16.gmra.mxu3 %vm2014_vm2, %v1977_v46  ;;  %v2597_v60 = vrot.slane %v2595_v7, 1 }
 0x374   : > { %v1478_v49 = vor.u32 %v1476_v0, %v1475_v32  ;;  %v1569_v11 = vsel %vm4218_vm6, %v1475_v32, 0  ;;  %v3795_v0 = vld [vmem:[%s5423_s5 + $0x20] sm:$0xff] }
 0x375   : > { %v2240_v56 = vsel %vm2176_vm13, %v2144_v22, %v2208_v55  ;;  %v1866_v25 = vrot.slane %v1569_v11, 1  ;;  %v1715_v4 = vshll.u32 %v1569_v11, 16  ;;  %v2598_v30 = vor.u32 %v2597_v60, %v2593_v52  ;;  %3055 = vmatpush.bf16.msra.mxu1 %v3795_v0  ;;  %3812 = vmatpush.bf16.msrb.mxu3 %v3795_v0 }
 0x376   : > { %v2272_v12 = vpack.c.bf16 %v2240_v56, %v2240_v56  ;;  %v4959_v57 = vsel %vm4218_vm6, 0, %v1478_v49 }
 0x377   : > { %v1865_v62 = vrot.slane %v4959_v57, 1  ;;  %v1710_v14 = vshll.u32 %v4959_v57, 16  ;;  %v1708_v42 = vshrl.u32 %v4959_v57, 16  ;;  %v1717_v44 = vrot.slane %v1715_v4, 1 }
 0x378   : > { %v2361_v45 = vunpack.c.l.b16 %v2272_v12  ;;  %v2071_v48 = vpop.f32.mrf.mxu0  ;;  %v1897_v20 = vpop.permute.xlu1 %1896  ;;  %v2603_v11 = vsel %vm1574_vm7, %v2598_v30, %v2602_v37  ;;  %v3791_v30 = vld [vmem:[%s5423_s5] sm:$0xff] }
 0x379   : > { %v2145_v13 = vadd.f32 %v4862_v8, %v2071_v48  ;;  %v1867_v38 = vsel %vm1831_vm1, %v1865_v62, %v1866_v25  ;;  %v1963_v61 = vsel %vm1945_vm3, %v1930_v36, %v1897_v20  ;;  %v1712_v3 = vrot.slane %v1710_v14, 1  ;;  %v3794_v14 = vld [vmem:[%s5423_s5 + $0x18] sm:$0xff] }
 0x37a   : > { %v2390_v33 = vpack.c.b16 %v2361_v45, %v2360_v35  ;;  %1902 = vrot.lane.b32.xlu1 %v1867_v38, %s3999_s14  ;;  %3056 = vmatpush.bf16.msra.mxu1 %v3794_v14 }
 0x37b   : > { %3709 = vmatmul.msk.bf16.gmra.mxu0 %vm2014_vm2, %v1963_v61  ;;  %v1713_v63 = vor.u32 %v1712_v3, %v1708_v42  ;;  %v2209_v17 = vmul.f32 0.01, %v2145_v13  ;;  %vm2177_vm15 = vcmp.ge.f32.partialorder %v2145_v13, 0.0  ;;  %3813 = vmatpush.bf16.msrb.mxu3 %v3794_v14 }
 0x37c   : > { %v2419_v53 = vshrl.u32 %v2390_v33, 16  ;;  %v2422_v59 = vshll.u32 %v2390_v33, 16  ;;  %v3793_v33 = vld [vmem:[%s5423_s5 + $0x10] sm:$0xff] }
 0x37d   : > { %v1718_v19 = vsel %vm1574_vm7, %v1713_v63, %v1717_v44  ;;  %v2241_v26 = vsel %vm2177_vm15, %v2145_v13, %v2209_v17 }
 0x37e   : > { %v2116_v18 = vpop.f32.mrf.mxu3  ;;  %1789 = vrot.lane.b32.xlu0 %v1718_v19, %s3998_s13  ;;  %v2421_v16 = vrot.slane %v2419_v53, 7  ;;  %v2273_v46 = vpack.c.bf16 %v2241_v26, %v2241_v26  ;;  %3057 = vmatpush.bf16.msra.mxu1 %v3793_v33 }
 0x37f   : > { %v2163_v31 = vadd.f32 %v4862_v8, %v2116_v18  ;;  %3814 = vmatpush.bf16.msrb.mxu3 %v3793_v33 }
 0x380   : > { %v2073_v15 = vpop.f32.mrf.mxu0  ;;  %v2424_v29 = vor.u32 %v2422_v59, %v2421_v16  ;;  %v2566_v28 = vsel %vm4218_vm6, %v2421_v16, 0  ;;  %v2362_v4 = vunpack.c.l.b16 %v2273_v46  ;;  %v3792_v59 = vld [vmem:[%s5423_s5 + $0x8] sm:$0xff] }
 0x381   : > { %v2146_v39 = vadd.f32 %v4862_v8, %v2073_v15  ;;  %v2227_v58 = vmul.f32 0.01, %v2163_v31  ;;  %v2843_v34 = vrot.slane %v2566_v28, 1  ;;  %vm2195_vm5 = vcmp.ge.f32.partialorder %v2163_v31, 0.0 }
 0x382   : > { %v4991_v47 = vsel %vm4218_vm6, 0, %v2424_v29  ;;  %v2612_v32 = vshll.u32 %v2566_v28, 16  ;;  %3058 = vmatpush.bf16.msra.mxu1 %v3792_v59 }
 0x383   : > { %vm2178_vm4 = vcmp.ge.f32.partialorder %v2146_v39, 0.0  ;;  %v2210_v21 = vmul.f32 0.01, %v2146_v39  ;;  %v2842_v22 = vrot.slane %v4991_v47, 1  ;;  %v2607_v55 = vshll.u32 %v4991_v47, 16  ;;  %3815 = vmatpush.bf16.msrb.mxu3 %v3792_v59 }
 0x384   : > { %v2605_v12 = vshrl.u32 %v4991_v47, 16  ;;  %v2259_v62 = vsel %vm2195_vm5, %v2163_v31, %v2227_v58  ;;  %v2614_v36 = vrot.slane %v2612_v32, 1 }
 0x385   : > { %v2242_v10 = vsel %vm2178_vm4, %v2146_v39, %v2210_v21  ;;  %v2844_v49 = vsel %vm1831_vm1, %v2842_v22, %v2843_v34  ;;  %v2609_v7 = vrot.slane %v2607_v55, 1  ;;  %v2291_v42 = vpack.c.bf16 %v2259_v62, %v2259_v62 }
 0x386   : > { %v2274_v56 = vpack.c.bf16 %v2242_v10, %v2242_v10  ;;  %v2118_v50 = vpop.f32.mrf.mxu3  ;;  %3767 = vmatmul.msk.bf16.gmra.mxu2 %vm1945_vm3, %v2844_v49  ;;  %2774 = vrot.lane.b32.xlu0 %v2603_v11, %s3999_s14 }
 0x387   : > { %v2164_v25 = vadd.f32 %v4862_v8, %v2118_v50  ;;  %v2610_v45 = vor.u32 %v2609_v7, %v2605_v12  ;;  %v2380_v24 = vunpack.c.l.b16 %v2291_v42  ;;  %3059 = vmatpush.bf16.msra.mxu1 %v3791_v30  ;;  %3816 = vmatpush.bf16.msrb.mxu3 %v3791_v30 }
 0x388   : > { %v2363_v1 = vunpack.c.l.b16 %v2274_v56  ;;  %v2076_v35 = vpop.f32.mrf.mxu0 }
 0x389   : > { %vm2196_vm8 = vcmp.ge.f32.partialorder %v2164_v25, 0.0  ;;  %v2228_v48 = vmul.f32 0.01, %v2164_v25  ;;  %v2147_v20 = vadd.f32 %v4862_v8, %v2076_v35  ;;  %v2615_v38 = vsel %vm1574_vm7, %v2610_v45, %v2614_v36 }
 0x38a   : > { %v2391_v13 = vpack.c.b16 %v2363_v1, %v2362_v4  ;;  %2776 = vrot.lane.b32.xlu1 %v2615_v38, %s3999_s14 }
 0x38b   : > { %v2260_v61 = vsel %vm2196_vm8, %v2164_v25, %v2228_v48  ;;  %v2211_v3 = vmul.f32 0.01, %v2147_v20  ;;  %vm2179_vm9 = vcmp.ge.f32.partialorder %v2147_v20, 0.0  ;;  %3817 = vmatpush.bf16.msra.mxu3 %v4828_v5  ;;  %v1786_v25 = vpop.permute.xlu2 %1785 }
 0x38c   : > { %v2292_v63 = vpack.c.bf16 %v2260_v61, %v2260_v61  ;;  %v2426_v44 = vshrl.u32 %v2391_v13, 16  ;;  %v2429_v53 = vshll.u32 %v2391_v13, 16  ;;  %v1932_v48 = vsel %vm1912_vm14, %v4866_v43, %v1786_v25 }
 0x38d   : > { %v2243_v60 = vsel %vm2179_vm9, %v2147_v20, %v2211_v3 }
 0x38e   : > { %v2381_v17 = vunpack.c.l.b16 %v2292_v63  ;;  %v2428_v19 = vrot.slane %v2426_v44, 7  ;;  %v2275_v15 = vpack.c.bf16 %v2243_v60, %v2243_v60 }
 0x38f   : > { %3818 = vmatpush.bf16.msra.mxu3 %v4837_v51 }
 0x390   : > { %v2400_v18 = vpack.c.b16 %v2381_v17, %v2380_v24  ;;  %v2078_v16 = vpop.f32.mrf.mxu0  ;;  %v2431_v23 = vor.u32 %v2429_v53, %v2428_v19  ;;  %v2567_v31 = vsel %vm4218_vm6, %v2428_v19, 0  ;;  %v2364_v11 = vunpack.c.l.b16 %v2275_v15 }
 0x391   : > { %v2148_v52 = vadd.f32 %v4862_v8, %v2078_v16  ;;  %v2846_v39 = vrot.slane %v2567_v31, 1  ;;  %v2624_v21 = vshll.u32 %v2567_v31, 16 }
 0x392   : > { %v2489_v41 = vshrl.u32 %v2400_v18, 16  ;;  %v5021_v29 = vsel %vm4218_vm6, 0, %v2431_v23  ;;  %v2492_v37 = vshll.u32 %v2400_v18, 16 }
 0x393   : > { %vm2180_vm10 = vcmp.ge.f32.partialorder %v2148_v52, 0.0  ;;  %v2212_v28 = vmul.f32 0.01, %v2148_v52  ;;  %v2845_v26 = vrot.slane %v5021_v29, 1  ;;  %v2619_v22 = vshll.u32 %v5021_v29, 16  ;;  %3819 = vmatpush.bf16.msra.mxu3 %v4844_v2 }
 0x394   : > { %v2491_v58 = vrot.slane %v2489_v41, 7  ;;  %v2617_v46 = vshrl.u32 %v5021_v29, 16  ;;  %v2626_v62 = vrot.slane %v2624_v21, 1 }
 0x395   : > { %v2244_v34 = vsel %vm2180_vm10, %v2148_v52, %v2212_v28  ;;  %v2847_v0 = vsel %vm1831_vm1, %v2845_v26, %v2846_v39  ;;  %v2621_v10 = vrot.slane %v2619_v22, 1 }
 0x396   : > { %v2494_v32 = vor.u32 %v2492_v37, %v2491_v58  ;;  %v2276_v55 = vpack.c.bf16 %v2244_v34, %v2244_v34  ;;  %3768 = vmatmul.msk.bf16.gmra.mxu2 %vm1945_vm3, %v2847_v0  ;;  %v5033_v49 = vsel %vm4218_vm6, %v2491_v58, 0 }
 0x397   : > { %v2622_v7 = vor.u32 %v2621_v10, %v2617_v46  ;;  %v2732_v1 = vshll.u32 %v5033_v49, 16  ;;  %3820 = vmatpush.bf16.msra.mxu3 %v4853_v40 }
 0x398   : > { %v5038_v56 = vsel %vm4218_vm6, 0, %v2494_v32  ;;  %v2365_v50 = vunpack.c.l.b16 %v2276_v55  ;;  %v2081_v12 = vpop.f32.mrf.mxu0 }
 0x399   : > { %v2149_v14 = vadd.f32 %v4862_v8, %v2081_v12  ;;  %v2727_v4 = vshll.u32 %v5038_v56, 16  ;;  %v2627_v45 = vsel %vm1574_vm7, %v2622_v7, %v2626_v62  ;;  %v2725_v5 = vshrl.u32 %v5038_v56, 16 }
 0x39a   : > { %v2392_v35 = vpack.c.b16 %v2365_v50, %v2364_v11  ;;  %2778 = vrot.lane.b32.xlu2 %v2627_v45, %s3999_s14  ;;  %v2734_v3 = vrot.slane %v2732_v1, 1 }
 0x39b   : > { %v2729_v36 = vrot.slane %v2727_v4, 1  ;;  %v2213_v13 = vmul.f32 0.01, %v2149_v14  ;;  %vm2181_vm11 = vcmp.ge.f32.partialorder %v2149_v14, 0.0 }
 0x39c   : > { %v1899_v20 = vpop.permute.xlu0 %1898  ;;  %v2433_v42 = vshrl.u32 %v2392_v35, 16  ;;  %v2436_v33 = vshll.u32 %v2392_v35, 16 }
 0x39d   : > { %v1965_v38 = vsel %vm1945_vm3, %v1932_v48, %v1899_v20  ;;  %v2730_v61 = vor.u32 %v2729_v36, %v2725_v5  ;;  %v2245_v53 = vsel %vm2181_vm11, %v2149_v14, %v2213_v13 }
 0x39e   : > { %3710 = vmatmul.msk.bf16.gmra.mxu0 %vm2014_vm2, %v1965_v38  ;;  %v2435_v51 = vrot.slane %v2433_v42, 7  ;;  %v2277_v18 = vpack.c.bf16 %v2245_v53, %v2245_v53 }
 0x39f   : > { %v2735_v63 = vsel %vm1574_vm7, %v2730_v61, %v2734_v3 }
 0x3a0   : > { %v2083_v44 = vpop.f32.mrf.mxu0  ;;  %2796 = vrot.lane.b32.xlu1 %v2735_v63, %s3999_s14  ;;  %v2438_v43 = vor.u32 %v2436_v33, %v2435_v51  ;;  %v2568_v24 = vsel %vm4218_vm6, %v2435_v51, 0  ;;  %v2366_v39 = vunpack.c.l.b16 %v2277_v18 }
 0x3a1   : > { %v2150_v17 = vadd.f32 %v4862_v8, %v2083_v44  ;;  %v2849_v59 = vrot.slane %v2568_v24, 1  ;;  %v2636_v23 = vshll.u32 %v2568_v24, 16 }
 0x3a2   : > { %v5059_v19 = vsel %vm4218_vm6, 0, %v2438_v43 }
 0x3a3   : > { %vm2182_vm12 = vcmp.ge.f32.partialorder %v2150_v17, 0.0  ;;  %v2214_v2 = vmul.f32 0.01, %v2150_v17  ;;  %v2848_v60 = vrot.slane %v5059_v19, 1  ;;  %v2631_v16 = vshll.u32 %v5059_v19, 16 }
 0x3a4   : > { %v2629_v28 = vshrl.u32 %v5059_v19, 16  ;;  %v2638_v37 = vrot.slane %v2636_v23, 1 }
 0x3a5   : > { %v2246_v31 = vsel %vm2182_vm12, %v2150_v17, %v2214_v2  ;;  %v2850_v52 = vsel %vm1831_vm1, %v2848_v60, %v2849_v59  ;;  %v2633_v26 = vrot.slane %v2631_v16, 1 }
 0x3a6   : > { %v2278_v41 = vpack.c.bf16 %v2246_v31, %v2246_v31  ;;  %v2121_v15 = vpop.f32.mrf.mxu3  ;;  %3769 = vmatmul.msk.bf16.gmra.mxu2 %vm1945_vm3, %v2850_v52 }
 0x3a7   : > { %v2165_v40 = vadd.f32 %v4862_v8, %v2121_v15  ;;  %v2634_v58 = vor.u32 %v2633_v26, %v2629_v28 }
 0x3a8   : > { %v2367_v30 = vunpack.c.l.b16 %v2278_v41 }
 0x3a9   : > { %v2639_v22 = vsel %vm1574_vm7, %v2634_v58, %v2638_v37  ;;  %v2229_v34 = vmul.f32 0.01, %v2165_v40  ;;  %vm2197_vm13 = vcmp.ge.f32.partialorder %v2165_v40, 0.0 }
 0x3aa   : > { %v2393_v21 = vpack.c.b16 %v2367_v30, %v2366_v39  ;;  %2780 = vrot.lane.b32.xlu0 %v2639_v22, %s3999_s14 }
 0x3ab   : > { %v2261_v11 = vsel %vm2197_vm13, %v2165_v40, %v2229_v34 }
 0x3ac   : > { %v1901_v0 = vpop.permute.xlu2 %1900  ;;  %v2440_v46 = vshrl.u32 %v2393_v21, 16  ;;  %v2443_v32 = vshll.u32 %v2393_v21, 16  ;;  %v2293_v25 = vpack.c.bf16 %v2261_v11, %v2261_v11 }
 0x3ae   : > { %v2123_v55 = vpop.f32.mrf.mxu3  ;;  %v2442_v10 = vrot.slane %v2440_v46, 7  ;;  %v2382_v61 = vunpack.c.l.b16 %v2293_v25 }
 0x3af   : > { %v2166_v50 = vadd.f32 %v4862_v8, %v2123_v55 }
 0x3b0   : > { %v2445_v12 = vor.u32 %v2443_v32, %v2442_v10  ;;  %v2569_v7 = vsel %vm4218_vm6, %v2442_v10, 0 }
 0x3b1   : > { %vm2198_vm15 = vcmp.ge.f32.partialorder %v2166_v50, 0.0  ;;  %v2230_v62 = vmul.f32 0.01, %v2166_v50  ;;  %v2648_v4 = vshll.u32 %v2569_v7, 16  ;;  %v2852_v45 = vrot.slane %v2569_v7, 1 }
 0x3b2   : > { %v5075_v14 = vsel %vm4218_vm6, 0, %v2445_v12 }
 0x3b3   : > { %v2262_v1 = vsel %vm2198_vm15, %v2166_v50, %v2230_v62  ;;  %v2851_v35 = vrot.slane %v5075_v14, 1  ;;  %v2643_v5 = vshll.u32 %v5075_v14, 16  ;;  %v2641_v13 = vshrl.u32 %v5075_v14, 16 }
 0x3b4   : > { %v2294_v36 = vpack.c.bf16 %v2262_v1, %v2262_v1  ;;  %v2773_v48 = vpop.permute.xlu2 %2772  ;;  %v2650_v51 = vrot.slane %v2648_v4, 1 }
 0x3b5   : > { %v2885_v20 = vsel %vm1945_vm3, %v4896_v9, %v2773_v48  ;;  %v2853_v42 = vsel %vm1831_vm1, %v2851_v35, %v2852_v45  ;;  %v2645_v38 = vrot.slane %v2643_v5, 1 }
 0x3b6   : > { %v2383_v3 = vunpack.c.l.b16 %v2294_v36  ;;  %3060 = vmatmul.bf16.vlgmr.msra.gmra.mxu1 %v2885_v20  ;;  %3770 = vmatmul.msk.bf16.gmra.mxu2 %vm1945_vm3, %v2853_v42 }
 0x3b7   : > { %v2646_v33 = vor.u32 %v2645_v38, %v2641_v13 }
 0x3b8   : > { %v2401_v63 = vpack.c.b16 %v2383_v3, %v2382_v61 }
 0x3b9   : > { %v2651_v44 = vsel %vm1574_vm7, %v2646_v33, %v2650_v51 }
 0x3ba   : > { %v2496_v43 = vshrl.u32 %v2401_v63, 16  ;;  %2782 = vrot.lane.b32.xlu2 %v2651_v44, %s3999_s14  ;;  %v2499_v24 = vshll.u32 %v2401_v63, 16 }
 0x3bc   : > { %v2498_v9 = vrot.slane %v2496_v43, 7 }
 0x3be   : > { %v2501_v53 = vor.u32 %v2499_v24, %v2498_v9  ;;  %v5088_v17 = vsel %vm4218_vm6, %v2498_v9, 0 }
 0x3bf   : > { %v2744_v16 = vshll.u32 %v5088_v17, 16 }
 0x3c0   : > { %v2086_v2 = vpop.f32.mrf.mxu0  ;;  %v5092_v60 = vsel %vm4218_vm6, 0, %v2501_v53 }
 0x3c1   : > { %v2151_v59 = vadd.f32 %v4862_v8, %v2086_v2  ;;  %v2739_v18 = vshll.u32 %v5092_v60, 16  ;;  %v2737_v23 = vshrl.u32 %v5092_v60, 16  ;;  %v2746_v15 = vrot.slane %v2744_v16, 1 }
 0x3c3   : > { %v2741_v31 = vrot.slane %v2739_v18, 1  ;;  %v2215_v52 = vmul.f32 0.01, %v2151_v59  ;;  %vm2183_vm4 = vcmp.ge.f32.partialorder %v2151_v59, 0.0 }
 0x3c5   : > { %v2742_v41 = vor.u32 %v2741_v31, %v2737_v23  ;;  %v2247_v39 = vsel %vm2183_vm4, %v2151_v59, %v2215_v52 }
 0x3c6   : > { %v2279_v22 = vpack.c.bf16 %v2247_v39, %v2247_v39 }
 0x3c7   : > { %v2747_v28 = vsel %vm1574_vm7, %v2742_v41, %v2746_v15 }
 0x3c8   : > { %v2088_v26 = vpop.f32.mrf.mxu0  ;;  %v1788_v40 = vpop.permute.xlu1 %1787  ;;  %2798 = vrot.lane.b32.xlu0 %v2747_v28, %s3999_s14  ;;  %v2368_v10 = vunpack.c.l.b16 %v2279_v22 }
 0x3c9   : > { %v2152_v30 = vadd.f32 %v4862_v8, %v2088_v26  ;;  %v1934_v58 = vsel %vm1912_vm14, %v4912_v27, %v1788_v40 }
 0x3ca   : > { %v1967_v37 = vsel %vm1945_vm3, %v1934_v58, %v1901_v0 }
 0x3cb   : > { %vm2184_vm5 = vcmp.ge.f32.partialorder %v2152_v30, 0.0  ;;  %v2216_v21 = vmul.f32 0.01, %v2152_v30  ;;  %3711 = vmatmul.msk.bf16.gmra.mxu0 %vm2014_vm2, %v1967_v37 }
 0x3cd   : > { %v2248_v34 = vsel %vm2184_vm5, %v2152_v30, %v2216_v21 }
 0x3ce   : > { %v2280_v46 = vpack.c.bf16 %v2248_v34, %v2248_v34  ;;  %v2126_v32 = vpop.f32.mrf.mxu3 }
 0x3cf   : > { %v2167_v55 = vadd.f32 %v4862_v8, %v2126_v32 }
 0x3d0   : > { %v2369_v11 = vunpack.c.l.b16 %v2280_v46 }
 0x3d1   : > { %v2231_v12 = vmul.f32 0.01, %v2167_v55  ;;  %vm2199_vm8 = vcmp.ge.f32.partialorder %v2167_v55, 0.0 }
 0x3d2   : > { %v2394_v50 = vpack.c.b16 %v2369_v11, %v2368_v10 }
 0x3d3   : > { %v2263_v0 = vsel %vm2199_vm8, %v2167_v55, %v2231_v12 }
 0x3d4   : > { %v2447_v7 = vshrl.u32 %v2394_v50, 16  ;;  %v2450_v62 = vshll.u32 %v2394_v50, 16  ;;  %v2295_v5 = vpack.c.bf16 %v2263_v0, %v2263_v0 }
 0x3d6   : > { %v2128_v27 = vpop.f32.mrf.mxu3  ;;  %v2449_v25 = vrot.slane %v2447_v7, 7  ;;  %v2384_v63 = vunpack.c.l.b16 %v2295_v5 }
 0x3d7   : > { %v2168_v4 = vadd.f32 %v4862_v8, %v2128_v27 }
 0x3d8   : > { %v2452_v1 = vor.u32 %v2450_v62, %v2449_v25  ;;  %v2570_v35 = vsel %vm4218_vm6, %v2449_v25, 0 }
 0x3d9   : > { %vm2200_vm9 = vcmp.ge.f32.partialorder %v2168_v4, 0.0  ;;  %v2232_v45 = vmul.f32 0.01, %v2168_v4  ;;  %v2660_v48 = vshll.u32 %v2570_v35, 16  ;;  %v2855_v13 = vrot.slane %v2570_v35, 1 }
 0x3da   : > { %v5111_v36 = vsel %vm4218_vm6, 0, %v2452_v1 }
 0x3db   : > { %v2264_v20 = vsel %vm2200_vm9, %v2168_v4, %v2232_v45  ;;  %v2854_v42 = vrot.slane %v5111_v36, 1  ;;  %v2655_v38 = vshll.u32 %v5111_v36, 16  ;;  %v2653_v33 = vshrl.u32 %v5111_v36, 16 }
 0x3dc   : > { %v2296_v61 = vpack.c.bf16 %v2264_v20, %v2264_v20  ;;  %v2662_v24 = vrot.slane %v2660_v48, 1 }
 0x3dd   : > { %v2856_v3 = vsel %vm1831_vm1, %v2854_v42, %v2855_v13  ;;  %v2657_v51 = vrot.slane %v2655_v38, 1 }
 0x3de   : > { %v2385_v44 = vunpack.c.l.b16 %v2296_v61  ;;  %3771 = vmatmul.msk.bf16.gmra.mxu2 %vm1945_vm3, %v2856_v3 }
 0x3df   : > { %v2658_v43 = vor.u32 %v2657_v51, %v2653_v33 }
 0x3e0   : > { %v2402_v9 = vpack.c.b16 %v2385_v44, %v2384_v63 }
 0x3e1   : > { %v2663_v53 = vsel %vm1574_vm7, %v2658_v43, %v2662_v24 }
 0x3e2   : > { %v2503_v2 = vshrl.u32 %v2402_v9, 16  ;;  %2784 = vrot.lane.b32.xlu1 %v2663_v53, %s3999_s14  ;;  %v2506_v18 = vshll.u32 %v2402_v9, 16 }
 0x3e4   : > { %v2505_v59 = vrot.slane %v2503_v2, 7 }
 0x3e6   : > { %v2508_v16 = vor.u32 %v2506_v18, %v2505_v59  ;;  %v5122_v23 = vsel %vm4218_vm6, %v2505_v59, 0 }
 0x3e7   : > { %v2756_v28 = vshll.u32 %v5122_v23, 16 }
 0x3e8   : > { %v5126_v31 = vsel %vm4218_vm6, 0, %v2508_v16  ;;  %v2091_v52 = vpop.f32.mrf.mxu0 }
 0x3e9   : > { %v2153_v41 = vadd.f32 %v4862_v8, %v2091_v52  ;;  %v2751_v15 = vshll.u32 %v5126_v31, 16  ;;  %v2749_v26 = vshrl.u32 %v5126_v31, 16  ;;  %v2758_v58 = vrot.slane %v2756_v28, 1 }
 0x3eb   : > { %v2753_v40 = vrot.slane %v2751_v15, 1  ;;  %v2217_v39 = vmul.f32 0.01, %v2153_v41  ;;  %vm2185_vm10 = vcmp.ge.f32.partialorder %v2153_v41, 0.0 }
 0x3ec   : > { %v1903_v46 = vpop.permute.xlu1 %1902 }
 0x3ed   : > { %v2754_v30 = vor.u32 %v2753_v40, %v2749_v26  ;;  %v2249_v34 = vsel %vm2185_vm10, %v2153_v41, %v2217_v39 }
 0x3ee   : > { %v2281_v50 = vpack.c.bf16 %v2249_v34, %v2249_v34 }
 0x3ef   : > { %v2759_v37 = vsel %vm1574_vm7, %v2754_v30, %v2758_v58 }
 0x3f0   : > { %v2093_v21 = vpop.f32.mrf.mxu0  ;;  %2800 = vrot.lane.b32.xlu2 %v2759_v37, %s3999_s14  ;;  %v1790_v22 = vpop.permute.xlu0 %1789  ;;  %v2370_v25 = vunpack.c.l.b16 %v2281_v50 }
 0x3f1   : > { %v2154_v32 = vadd.f32 %v4862_v8, %v2093_v21  ;;  %v1936_v55 = vsel %vm1912_vm14, %v4959_v57, %v1790_v22  ;;  %v5143_v57 = vld [vmem:[%s5422_s4] ss:$0 sm:$0xff] }
 0x3f2   : > { %v1969_v10 = vsel %vm1945_vm3, %v1936_v55, %v1903_v46 }
 0x3f3   : > { %vm2186_vm11 = vcmp.ge.f32.partialorder %v2154_v32, 0.0  ;;  %v2218_v11 = vmul.f32 0.01, %v2154_v32  ;;  %3712 = vmatmul.msk.bf16.gmra.mxu0 %vm2014_vm2, %v1969_v10 }
 0x3f5   : > { %v2250_v12 = vsel %vm2186_vm11, %v2154_v32, %v2218_v11 }
 0x3f6   : > { %v2282_v7 = vpack.c.bf16 %v2250_v12, %v2250_v12  ;;  %v2131_v62 = vpop.f32.mrf.mxu3 }
 0x3f7   : > { %v2169_v27 = vadd.f32 %v4862_v8, %v2131_v62 }
 0x3f8   : > { %v2371_v0 = vunpack.c.l.b16 %v2282_v7  ;;  %v2096_v4 = vpop.f32.mrf.mxu0  ;;  %v2775_v1 = vpop.permute.xlu0 %2774 }
 0x3f9   : > { %v2155_v35 = vadd.f32 %v5143_v57, %v2096_v4  ;;  %v2888_v45 = vsel %vm1945_vm3, %v4926_v54, %v2775_v1  ;;  %v2233_v48 = vmul.f32 0.01, %v2169_v27  ;;  %vm2201_vm14 = vcmp.ge.f32.partialorder %v2169_v27, 0.0 }
 0x3fa   : > { %v2395_v5 = vpack.c.b16 %v2371_v0, %v2370_v25  ;;  %3065 = vmatmul.bf16.gmra.mxu1 %v2888_v45 }
 0x3fb   : > { %v2219_v20 = vmul.f32 0.01, %v2155_v35  ;;  %vm2187_vm2 = vcmp.ge.f32.partialorder %v2155_v35, 0.0  ;;  %v2265_v13 = vsel %vm2201_vm14, %v2169_v27, %v2233_v48 }
 0x3fc   : > { %v2454_v8 = vshrl.u32 %v2395_v5, 16  ;;  %v2457_v42 = vshll.u32 %v2395_v5, 16  ;;  %v2297_v54 = vpack.c.bf16 %v2265_v13, %v2265_v13  ;;  %v2777_v39 = vpop.permute.xlu1 %2776 }
 0x3fd   : > { %v2251_v3 = vsel %vm2187_vm2, %v2155_v35, %v2219_v20  ;;  %v2891_v10 = vsel %vm1945_vm3, %v4991_v47, %v2777_v39 }
 0x3fe   : > { %v2133_v38 = vpop.f32.mrf.mxu3  ;;  %v2456_v61 = vrot.slane %v2454_v8, 7  ;;  %v2283_v9 = vpack.c.bf16 %v2251_v3, %v2251_v3  ;;  %v2386_v28 = vunpack.c.l.b16 %v2297_v54 }
 0x3ff   : > { %v2170_v33 = vadd.f32 %v5143_v57, %v2133_v38 }
 0x400   : > { %v2098_v51 = vpop.f32.mrf.mxu0  ;;  %v2459_v63 = vor.u32 %v2457_v42, %v2456_v61  ;;  %v2571_v44 = vsel %vm4218_vm6, %v2456_v61, 0  ;;  %v2372_v22 = vunpack.c.l.b16 %v2283_v9 }
 0x401   : > { %vm2202_vm12 = vcmp.ge.f32.partialorder %v2170_v33, 0.0  ;;  %v2234_v43 = vmul.f32 0.01, %v2170_v33  ;;  %v2156_v24 = vadd.f32 %v5143_v57, %v2098_v51  ;;  %v2858_v2 = vrot.slane %v2571_v44, 1 }
 0x402   : > { %v5154_v53 = vsel %vm4218_vm6, 0, %v2459_v63  ;;  %v2672_v15 = vshll.u32 %v2571_v44, 16 }
 0x403   : > { %v2266_v59 = vsel %vm2202_vm12, %v2170_v33, %v2234_v43  ;;  %vm2188_vm13 = vcmp.ge.f32.partialorder %v2156_v24, 0.0  ;;  %v2220_v18 = vmul.f32 0.01, %v2156_v24  ;;  %v2857_v16 = vrot.slane %v5154_v53, 1  ;;  %v2779_v43 = vpop.permute.xlu2 %2778 }
 0x404   : > { %v2298_v52 = vpack.c.bf16 %v2266_v59, %v2266_v59  ;;  %v2667_v41 = vshll.u32 %v5154_v53, 16  ;;  %v2665_v37 = vshrl.u32 %v5154_v53, 16  ;;  %v2674_v55 = vrot.slane %v2672_v15, 1 }
 0x405   : > { %v2252_v26 = vsel %vm2188_vm13, %v2156_v24, %v2220_v18  ;;  %v2859_v40 = vsel %vm1831_vm1, %v2857_v16, %v2858_v2  ;;  %v2894_v16 = vsel %vm1945_vm3, %v5021_v29, %v2779_v43 }
 0x406   : > { %v2387_v30 = vunpack.c.l.b16 %v2298_v52  ;;  %v2284_v58 = vpack.c.bf16 %v2252_v26, %v2252_v26  ;;  %3772 = vmatmul.msk.bf16.gmra.mxu2 %vm1945_vm3, %v2859_v40  ;;  %v2669_v21 = vrot.slane %v2667_v41, 1 }
 0x408   : > { %v2403_v34 = vpack.c.b16 %v2387_v30, %v2386_v28  ;;  %v2373_v46 = vunpack.c.l.b16 %v2284_v58  ;;  %v2670_v32 = vor.u32 %v2669_v21, %v2665_v37 }
 0x40a   : > { %v2510_v11 = vshrl.u32 %v2403_v34, 16  ;;  %v2396_v50 = vpack.c.b16 %v2373_v46, %v2372_v22  ;;  %v2675_v12 = vsel %vm1574_vm7, %v2670_v32, %v2674_v55  ;;  %3070 = vmatmul.bf16.gmra.mxu1 %v2891_v10  ;;  %v2513_v62 = vshll.u32 %v2403_v34, 16  ;;  %v3150_v10 = vpop.f32.mrf.mxu2 }
 0x40b   : > { %2786 = vrot.lane.b32.xlu0 %v2675_v12, %s3999_s14 }
 0x40c   : > { %v2512_v7 = vrot.slane %v2510_v11, 7  ;;  %v2461_v27 = vshrl.u32 %v2396_v50, 16  ;;  %v2464_v0 = vshll.u32 %v2396_v50, 16 }
 0x40e   : > { %v2515_v25 = vor.u32 %v2513_v62, %v2512_v7  ;;  %v2463_v4 = vrot.slane %v2461_v27, 7  ;;  %v5167_v1 = vsel %vm4218_vm6, %v2512_v7, 0 }
 0x40f   : > { %v2768_v48 = vshll.u32 %v5167_v1, 16 }
 0x410   : > { %v5171_v47 = vsel %vm4218_vm6, 0, %v2515_v25  ;;  %v2466_v35 = vor.u32 %v2464_v0, %v2463_v4  ;;  %v2572_v45 = vsel %vm4218_vm6, %v2463_v4, 0  ;;  %v5204_v25 = vld [vmem:[%s5424_s6] ss:$0 sm:$0xff] }
 0x411   : > { %v2763_v5 = vshll.u32 %v5171_v47, 16  ;;  %v2861_v42 = vrot.slane %v2572_v45, 1  ;;  %v2761_v61 = vshrl.u32 %v5171_v47, 16  ;;  %v2684_v33 = vshll.u32 %v2572_v45, 16 }
 0x412   : > { %v2797_v20 = vpop.permute.xlu1 %2796  ;;  %v5179_v8 = vsel %vm4218_vm6, 0, %v2466_v35  ;;  %v2770_v54 = vrot.slane %v2768_v48, 1 }
 0x413   : > { %v2921_v13 = vsel %vm1945_vm3, %v5038_v56, %v2797_v20  ;;  %v2860_v38 = vrot.slane %v5179_v8, 1  ;;  %v2765_v3 = vrot.slane %v2763_v5, 1  ;;  %v2679_v51 = vshll.u32 %v5179_v8, 16 }
 0x414   : > { %3120 = vmatmul.bf16.vlgmr.msrb.gmra.mxu3 %v2921_v13  ;;  %v2677_v24 = vshrl.u32 %v5179_v8, 16  ;;  %v2686_v18 = vrot.slane %v2684_v33, 1  ;;  %v2783_v0 = vpop.permute.xlu2 %2782 }
 0x415   : > { %v2862_v63 = vsel %vm1831_vm1, %v2860_v38, %v2861_v42  ;;  %v2766_v44 = vor.u32 %v2765_v3, %v2761_v61  ;;  %v2681_v9 = vrot.slane %v2679_v51, 1  ;;  %v2900_v38 = vsel %vm1945_vm3, %v5075_v14, %v2783_v0  ;;  %v3152_v51 = vpop.f32.mrf.mxu2 }
 0x416   : > { %3773 = vmatmul.msk.bf16.gmra.mxu2 %vm1945_vm3, %v2862_v63 }
 0x417   : > { %v2771_v2 = vsel %vm1574_vm7, %v2766_v44, %v2770_v54  ;;  %v2682_v59 = vor.u32 %v2681_v9, %v2677_v24 }
 0x418   : > { %2802 = vrot.lane.b32.xlu1 %v2771_v2, %s3999_s14  ;;  %v5223_v2 = vld [vmem:[#allocation3] sm:$0xff] }
 0x419   : > { %v2687_v52 = vsel %vm1574_vm7, %v2682_v59, %v2686_v18  ;;  %v5225_v18 = vld [vmem:[#allocation3 + $0x8] sm:$0xff] }
 0x41a   : > { %3075 = vmatmul.bf16.gmra.mxu1 %v2894_v16  ;;  %2788 = vrot.lane.b32.xlu2 %v2687_v52, %s3999_s14 }
 0x41b   : > { %v2101_v41 = vpop.f32.mrf.mxu0 }
 0x41c   : > { %v2157_v15 = vadd.f32 %v5143_v57, %v2101_v41  ;;  %v2781_v30 = vpop.permute.xlu0 %2780 }
 0x41d   : > { %v2897_v22 = vsel %vm1945_vm3, %v5059_v19, %v2781_v30 }
 0x41e   : > { %v2221_v28 = vmul.f32 0.01, %v2157_v15  ;;  %vm2189_vm15 = vcmp.ge.f32.partialorder %v2157_v15, 0.0 }
 0x420   : > { %v2253_v40 = vsel %vm2189_vm15, %v2157_v15, %v2221_v28  ;;  %vm3523_vm15 = vcmask 1041409  }
 0x421   : > { %v2285_v37 = vpack.c.bf16 %v2253_v40, %v2253_v40 }
 0x423   : > { %v2103_v26 = vpop.f32.mrf.mxu0  ;;  %v2374_v34 = vunpack.c.l.b16 %v2285_v37 }
 0x424   : > { %v2158_v39 = vadd.f32 %v5143_v57, %v2103_v26 }
 0x426   : > { %vm2190_vm4 = vcmp.ge.f32.partialorder %v2158_v39, 0.0  ;;  %v2222_v58 = vmul.f32 0.01, %v2158_v39 }
 0x428   : > { %v2254_v21 = vsel %vm2190_vm4, %v2158_v39, %v2222_v58 }
 0x429   : > { %v2286_v29 = vpack.c.bf16 %v2254_v21, %v2254_v21 }
 0x42a   : > { %3080 = vmatmul.bf16.gmra.mxu1 %v2897_v22 }
 0x42b   : > { %v2375_v46 = vunpack.c.l.b16 %v2286_v29 }
 0x42d   : > { %v2397_v32 = vpack.c.b16 %v2375_v46, %v2374_v34 }
 0x42f   : > { %v2468_v55 = vshrl.u32 %v2397_v32, 16  ;;  %v2471_v11 = vshll.u32 %v2397_v32, 16 }
 0x431   : > { %v2470_v50 = vrot.slane %v2468_v55, 7 }
 0x433   : > { %v3061_v12 = vpop.f32.mrf.mxu1  ;;  %v2473_v7 = vor.u32 %v2471_v11, %v2470_v50  ;;  %v2573_v62 = vsel %vm4218_vm6, %v2470_v50, 0 }
 0x434   : > { %v3151_v27 = vadd.f32 %v3150_v10, %v3061_v12  ;;  %v2864_v35 = vrot.slane %v2573_v62, 1  ;;  %v2696_v5 = vshll.u32 %v2573_v62, 16 }
 0x435   : > { %v5208_v19 = vsel %vm4218_vm6, 0, %v2473_v7 }
 0x436   : > { %v2863_v4 = vrot.slane %v5208_v19, 1  ;;  %v2691_v45 = vshll.u32 %v5208_v19, 16  ;;  %v3233_v48 = vadd.f32 %v5204_v25, %v3151_v27  ;;  %v2689_v42 = vshrl.u32 %v5208_v19, 16 }
 0x437   : > { %v2698_v33 = vrot.slane %v2696_v5, 1 }
 0x438   : > { %v2865_v20 = vsel %vm1831_vm1, %v2863_v4, %v2864_v35  ;;  %v2693_v13 = vrot.slane %v2691_v45, 1  ;;  %v3297_v54 = vmul.f32 0.01, %v3233_v48  ;;  %vm3265_vm5 = vcmp.ge.f32.partialorder %v3233_v48, 0.0 }
 0x439   : > { %3774 = vmatmul.msk.bf16.gmra.mxu2 %vm1945_vm3, %v2865_v20 }
 0x43a   : > { %3085 = vmatmul.bf16.gmra.mxu1 %v2900_v38  ;;  %v2799_v61 = vpop.permute.xlu0 %2798  ;;  %v2694_v3 = vor.u32 %v2693_v13, %v2689_v42  ;;  %v3329_v14 = vsel %vm3265_vm5, %v3233_v48, %v3297_v54  ;;  %vm3525_vm5 = vcmask 1042434  }
 0x43b   : > { %v3063_v63 = vpop.f32.mrf.mxu1  ;;  %v2924_v44 = vsel %vm1945_vm3, %v5092_v60, %v2799_v61  ;;  %v3363_v52 = vmul.f32 %v5223_v2, %v3329_v14 }
 0x43c   : > { %v3153_v43 = vadd.f32 %v3152_v51, %v3063_v63  ;;  %3125 = vmatmul.bf16.gmra.mxu3 %v2924_v44  ;;  %v2699_v24 = vsel %vm1574_vm7, %v2694_v3, %v2698_v33  ;;  %v3155_v3 = vpop.f32.mrf.mxu2 }
 0x43d   : > { %2790 = vrot.lane.b32.xlu0 %v2699_v24, %s3999_s14 }
 0x43e   : > { %v3234_v9 = vadd.f32 %v5204_v25, %v3153_v43 }
 0x440   : > { %vm3266_vm8 = vcmp.ge.f32.partialorder %v3234_v9, 0.0  ;;  %v3298_v59 = vmul.f32 0.01, %v3234_v9 }
 0x442   : > { %v3330_v16 = vsel %vm3266_vm8, %v3234_v9, %v3298_v59  ;;  %vm3527_vm8 = vcmask 1043459  }
 0x443   : > { %v3364_v41 = vmul.f32 %v5225_v18, %v3330_v16 }
 0x444   : > { %v3157_v24 = vpop.f32.mrf.mxu2 }
 0x445   : > { %v5229_v15 = vadd.f32 %v3364_v41, %v3363_v52 }
 0x448   : > { %v2106_v28 = vpop.f32.mrf.mxu0 }
 0x449   : > { %v2159_v26 = vadd.f32 %v5143_v57, %v2106_v28 }
 0x44a   : > { %v2801_v40 = vpop.permute.xlu2 %2800 }
 0x44b   : > { %v2927_v39 = vsel %vm1945_vm3, %v5126_v31, %v2801_v40  ;;  %v2223_v30 = vmul.f32 0.01, %v2159_v26  ;;  %vm2191_vm9 = vcmp.ge.f32.partialorder %v2159_v26, 0.0 }
 0x44c   : > { %3130 = vmatmul.bf16.gmra.mxu3 %v2927_v39 }
 0x44d   : > { %v2255_v37 = vsel %vm2191_vm9, %v2159_v26, %v2223_v30 }
 0x44e   : > { %v2287_v22 = vpack.c.bf16 %v2255_v37, %v2255_v37 }
 0x450   : > { %v2108_v58 = vpop.f32.mrf.mxu0  ;;  %v2376_v10 = vunpack.c.l.b16 %v2287_v22 }
 0x451   : > { %v2160_v21 = vadd.f32 %v5143_v57, %v2108_v58 }
 0x453   : > { %vm2192_vm10 = vcmp.ge.f32.partialorder %v2160_v21, 0.0  ;;  %v2224_v29 = vmul.f32 0.01, %v2160_v21 }
 0x454   : > { %v2785_v34 = vpop.permute.xlu1 %2784 }
 0x455   : > { %v2256_v46 = vsel %vm2192_vm10, %v2160_v21, %v2224_v29  ;;  %v2903_v32 = vsel %vm1945_vm3, %v5111_v36, %v2785_v34  ;;  %v3160_v29 = vpop.f32.mrf.mxu2 }
 0x456   : > { %v2288_v55 = vpack.c.bf16 %v2256_v46, %v2256_v46  ;;  %3090 = vmatmul.bf16.gmra.mxu1 %v2903_v32 }
 0x458   : > { %v2377_v11 = vunpack.c.l.b16 %v2288_v55 }
 0x45a   : > { %v2398_v50 = vpack.c.b16 %v2377_v11, %v2376_v10 }
 0x45c   : > { %v2475_v12 = vshrl.u32 %v2398_v50, 16  ;;  %v2478_v7 = vshll.u32 %v2398_v50, 16 }
 0x45e   : > { %v2477_v62 = vrot.slane %v2475_v12, 7 }
 0x460   : > { %v2480_v27 = vor.u32 %v2478_v7, %v2477_v62  ;;  %v2574_v0 = vsel %vm4218_vm6, %v2477_v62, 0 }
 0x461   : > { %v2708_v35 = vshll.u32 %v2574_v0, 16  ;;  %v2867_v36 = vrot.slane %v2574_v0, 1 }
 0x462   : > { %v5241_v4 = vsel %vm4218_vm6, 0, %v2480_v27 }
 0x463   : > { %v2866_v45 = vrot.slane %v5241_v4, 1  ;;  %v2703_v5 = vshll.u32 %v5241_v4, 16  ;;  %v2701_v20 = vshrl.u32 %v5241_v4, 16  ;;  %v2710_v38 = vrot.slane %v2708_v35, 1 }
 0x465   : > { %v2868_v48 = vsel %vm1831_vm1, %v2866_v45, %v2867_v36  ;;  %v2705_v42 = vrot.slane %v2703_v5, 1 }
 0x466   : > { %3775 = vmatmul.msk.bf16.gmra.mxu2 %vm1945_vm3, %v2868_v48 }
 0x467   : > { %v2706_v13 = vor.u32 %v2705_v42, %v2701_v20 }
 0x469   : > { %v2711_v61 = vsel %vm1574_vm7, %v2706_v13, %v2710_v38 }
 0x46a   : > { %2792 = vrot.lane.b32.xlu1 %v2711_v61, %s3999_s14 }
 0x470   : > { %v2111_v33 = vpop.f32.mrf.mxu0 }
 0x471   : > { %v2161_v51 = vadd.f32 %v5143_v57, %v2111_v33 }
 0x473   : > { %v2225_v63 = vmul.f32 0.01, %v2161_v51  ;;  %vm2193_vm11 = vcmp.ge.f32.partialorder %v2161_v51, 0.0 }
 0x474   : > { %v2789_v20 = vpop.permute.xlu2 %2788 }
 0x475   : > { %v2257_v9 = vsel %vm2193_vm11, %v2161_v51, %v2225_v63 }
 0x476   : > { %v2289_v16 = vpack.c.bf16 %v2257_v9, %v2257_v9 }
 0x477   : > { %v3066_v44 = vpop.f32.mrf.mxu1 }
 0x478   : > { %v3156_v54 = vadd.f32 %v3155_v3, %v3066_v44  ;;  %v2113_v43 = vpop.f32.mrf.mxu0  ;;  %v2378_v30 = vunpack.c.l.b16 %v2289_v16 }
 0x479   : > { %v2162_v14 = vadd.f32 %v5143_v57, %v2113_v43  ;;  %v3396_v57 = vrot.slane %v5229_v15, 4 }
 0x47a   : > { %v3235_v52 = vadd.f32 %v5204_v25, %v3156_v54  ;;  %v2909_v54 = vsel %vm1945_vm3, %v5179_v8, %v2789_v20 }
 0x47b   : > { %vm2194_vm14 = vcmp.ge.f32.partialorder %v2162_v14, 0.0  ;;  %v2226_v59 = vmul.f32 0.01, %v2162_v14  ;;  %v3397_v10 = vadd.f32 %v3396_v57, %v5229_v15  ;;  %v3162_v15 = vpop.f32.mrf.mxu2 }
 0x47c   : > { %v3299_v58 = vmul.f32 0.01, %v3235_v52  ;;  %vm3267_vm2 = vcmp.ge.f32.partialorder %v3235_v52, 0.0 }
 0x47d   : > { %v2258_v41 = vsel %vm2194_vm14, %v2162_v14, %v2226_v59  ;;  %v2787_v28 = vpop.permute.xlu0 %2786  ;;  %v3398_v45 = vrot.slane %v3397_v10, 2 }
 0x47e   : > { %v2290_v26 = vpack.c.bf16 %v2258_v41, %v2258_v41  ;;  %v2906_v40 = vsel %vm1945_vm3, %v5154_v53, %v2787_v28  ;;  %v3331_v46 = vsel %vm3267_vm2, %v3235_v52, %v3299_v58 }
 0x47f   : > { %3095 = vmatmul.bf16.gmra.mxu1 %v2906_v40  ;;  %v3068_v39 = vpop.f32.mrf.mxu1  ;;  %v3365_v12 = vmul.f32 %v5223_v2, %v3331_v46  ;;  %v3399_v63 = vadd.f32 %v3398_v45, %v3397_v10 }
 0x480   : > { %v2379_v37 = vunpack.c.l.b16 %v2290_v26  ;;  %v3158_v21 = vadd.f32 %v3157_v24, %v3068_v39 }
 0x481   : > { %v3400_v28 = vrot.slane %v3399_v63, 1 }
 0x482   : > { %v2399_v22 = vpack.c.b16 %v2379_v37, %v2378_v30  ;;  %v3236_v34 = vadd.f32 %v5204_v25, %v3158_v21 }
 0x483   : > { %v3165_v37 = vpop.f32.mrf.mxu2  ;;  %v3401_v21 = vadd.f32 %v3400_v28, %v3399_v63  ;;  %v2882_v28 = vrot.slane %v5167_v1, 1 }
 0x484   : > { %vm3268_vm12 = vcmp.ge.f32.partialorder %v3236_v34, 0.0  ;;  %v3300_v32 = vmul.f32 0.01, %v3236_v34  ;;  %v2482_v55 = vshrl.u32 %v2399_v22, 16  ;;  %v2485_v53 = vshll.u32 %v2399_v22, 16 }
 0x486   : > { %v3332_v11 = vsel %vm3268_vm12, %v3236_v34, %v3300_v32  ;;  %v2484_v50 = vrot.slane %v2482_v55, 7  ;;  %v2875_v32 = vrot.slane %v5092_v60, 1 }
 0x487   : > { %v3366_v7 = vmul.f32 %v5225_v18, %v3332_v11  ;;  %v3071_v62 = vpop.f32.mrf.mxu1 }
 0x488   : > { %v3161_v27 = vadd.f32 %v3160_v29, %v3071_v62  ;;  %v2487_v0 = vor.u32 %v2485_v53, %v2484_v50  ;;  %v2575_v35 = vsel %vm4218_vm6, %v2484_v50, 0  ;;  %v2876_v53 = vrot.slane %v5088_v17, 1 }
 0x489   : > { %v3402_v36 = vadd.f32 %v3366_v7, %v3365_v12  ;;  %v2870_v61 = vrot.slane %v2575_v35, 1  ;;  %v2720_v33 = vshll.u32 %v2575_v35, 16  ;;  %v2872_v50 = vrot.slane %v5038_v56, 1 }
 0x48a   : > { %v2803_v5 = vpop.permute.xlu1 %2802  ;;  %v5264_v48 = vsel %vm4218_vm6, 0, %v2487_v0  ;;  %v3237_v3 = vadd.f32 %v5204_v25, %v3161_v27  ;;  %v2877_v7 = vsel %vm1831_vm1, %v2875_v32, %v2876_v53  ;;  %v2873_v62 = vrot.slane %v5033_v49, 1 }
 0x48b   : > { %v3403_v42 = vrot.slane %v3402_v36, 4  ;;  %v2930_v13 = vsel %vm1945_vm3, %v5171_v47, %v2803_v5  ;;  %v2869_v38 = vrot.slane %v5264_v48, 1  ;;  %v2715_v51 = vshll.u32 %v5264_v48, 16  ;;  %v3167_v35 = vpop.f32.mrf.mxu2 }
 0x48c   : > { %3135 = vmatmul.bf16.gmra.mxu3 %v2930_v13  ;;  %v2713_v43 = vshrl.u32 %v5264_v48, 16  ;;  %v3301_v59 = vmul.f32 0.01, %v3237_v3  ;;  %v2722_v41 = vrot.slane %v2720_v33, 1  ;;  %vm3269_vm6 = vcmp.ge.f32.partialorder %v3237_v3, 0.0 }
 0x48d   : > { %v3404_v44 = vadd.f32 %v3403_v42, %v3402_v36  ;;  %v2871_v6 = vsel %vm1831_vm1, %v2869_v38, %v2870_v61  ;;  %v2717_v24 = vrot.slane %v2715_v51, 1  ;;  %v2874_v60 = vsel %vm1831_vm1, %v2872_v50, %v2873_v62 }
 0x48e   : > { %3776 = vmatmul.msk.bf16.gmra.mxu2 %vm1945_vm3, %v2871_v6  ;;  %v3333_v30 = vsel %vm3269_vm6, %v3237_v3, %v3301_v59  ;;  %v2878_v33 = vrot.slane %v5126_v31, 1  ;;  %vm3529_vm6 = vcmask 1044484  }
 0x48f   : > { %v3405_v9 = vrot.slane %v3404_v44, 2  ;;  %3100 = vmatmul.bf16.gmra.mxu1 %v2909_v54  ;;  %v3073_v14 = vpop.f32.mrf.mxu1  ;;  %v2718_v52 = vor.u32 %v2717_v24, %v2713_v43  ;;  %v3367_v22 = vmul.f32 %v5223_v2, %v3333_v30 }
 0x490   : > { %v3163_v16 = vadd.f32 %v3162_v15, %v3073_v14 }
 0x491   : > { %v3406_v26 = vadd.f32 %v3405_v9, %v3404_v44  ;;  %v2723_v39 = vsel %vm1574_vm7, %v2718_v52, %v2722_v41  ;;  %v2879_v44 = vrot.slane %v5122_v23, 1  ;;  %v2881_v52 = vrot.slane %v5171_v47, 1 }
 0x492   : > { %v3238_v40 = vadd.f32 %v5204_v25, %v3163_v16  ;;  %2794 = vrot.lane.b32.xlu2 %v2723_v39, %s3999_s14 }
 0x493   : > { %v3407_v8 = vrot.slane %v3406_v26, 1  ;;  %v2880_v54 = vsel %vm1831_vm1, %v2878_v33, %v2879_v44 }
 0x494   : > { %vm3270_vm13 = vcmp.ge.f32.partialorder %v3238_v40, 0.0  ;;  %v3302_v58 = vmul.f32 0.01, %v3238_v40 }
 0x495   : > { %v3408_v29 = vadd.f32 %v3407_v8, %v3406_v26  ;;  %v3170_v26 = vpop.f32.mrf.mxu2 }
 0x496   : > { %v3334_v57 = vsel %vm3270_vm13, %v3238_v40, %v3302_v58  ;;  %v2883_v40 = vsel %vm1831_vm1, %v2881_v52, %v2882_v28  ;;  %vm3531_vm13 = vcmask 1045509  }
 0x497   : > { %v3368_v34 = vmul.f32 %v5225_v18, %v3334_v57  ;;  %v3076_v46 = vpop.f32.mrf.mxu1  ;;  %v3524_v55 = vsel %vm3523_vm15, %v3408_v29, %v3401_v21 }
 0x498   : > { %v3166_v10 = vadd.f32 %v3165_v37, %v3076_v46 }
 0x499   : > { %v3409_v11 = vadd.f32 %v3368_v34, %v3367_v22  ;;  %v5310_v22 = vpop.f32.mrf.mxu3 }
 0x49a   : > { %v3239_v27 = vadd.f32 %v5204_v25, %v3166_v10 }
 0x49b   : > { %v3410_v12 = vrot.slane %v3409_v11, 4 }
 0x49c   : > { %3778 = vmatmul.msk.bf16.vlgmr.msra.gmra.mxu3 %vm1945_vm3, %v2877_v7  ;;  %v3303_v36 = vmul.f32 0.01, %v3239_v27  ;;  %vm3271_vm7 = vcmp.ge.f32.partialorder %v3239_v27, 0.0 }
 0x49d   : > { %v3411_v0 = vadd.f32 %v3410_v12, %v3409_v11 }
 0x49e   : > { %3777 = vmatmul.msk.bf16.gmra.mxu2 %vm1945_vm3, %v2874_v60  ;;  %v3335_v49 = vsel %vm3271_vm7, %v3239_v27, %v3303_v36  ;;  %vm3533_vm7 = vcmask 1046534  }
 0x49f   : > { %v3412_v45 = vrot.slane %v3411_v0, 2  ;;  %v3078_v17 = vpop.f32.mrf.mxu1  ;;  %v3369_v61 = vmul.f32 %v5223_v2, %v3335_v49 }
 0x4a0   : > { %v3168_v5 = vadd.f32 %v3167_v35, %v3078_v17 }
 0x4a1   : > { %v3413_v56 = vadd.f32 %v3412_v45, %v3411_v0 }
 0x4a2   : > { %v3240_v15 = vadd.f32 %v5204_v25, %v3168_v5 }
 0x4a3   : > { %v3414_v20 = vrot.slane %v3413_v56, 1 }
 0x4a4   : > { %vm3272_vm4 = vcmp.ge.f32.partialorder %v3240_v15, 0.0  ;;  %v3304_v42 = vmul.f32 0.01, %v3240_v15 }
 0x4a5   : > { %v3415_v13 = vadd.f32 %v3414_v20, %v3413_v56 }
 0x4a6   : > { %v3336_v38 = vsel %vm3272_vm4, %v3240_v15, %v3304_v42  ;;  %vm3535_vm4 = vcmask 1047559  }
 0x4a7   : > { %v3370_v3 = vmul.f32 %v5225_v18, %v3336_v38  ;;  %v3526_v51 = vsel %vm3525_vm5, %v3415_v13, %v3524_v55  ;;  %v3081_v41 = vpop.f32.mrf.mxu1  ;;  %v5312_v55 = vpop.f32.mrf.mxu3 }
 0x4a8   : > { %v3171_v10 = vadd.f32 %v3170_v26, %v3081_v41 }
 0x4a9   : > { %v3416_v63 = vadd.f32 %v3370_v3, %v3369_v61 }
 0x4aa   : > { %v3241_v27 = vadd.f32 %v5204_v25, %v3171_v10 }
 0x4ab   : > { %v3417_v6 = vrot.slane %v3416_v63, 4 }
 0x4ac   : > { %3779 = vmatmul.msk.bf16.gmra.mxu3 %vm1945_vm3, %v2880_v54  ;;  %v3305_v36 = vmul.f32 0.01, %v3241_v27 }
 0x4ad   : > { %v3418_v43 = vadd.f32 %v3417_v6, %v3416_v63 }
 0x4af   : > { %v3419_v24 = vrot.slane %v3418_v43, 2  ;;  %v2791_v9 = vpop.permute.xlu0 %2790  ;;  %v3083_v39 = vpop.f32.mrf.mxu1 }
 0x4b0   : > { %v2912_v14 = vsel %vm1945_vm3, %v5208_v19, %v2791_v9  ;;  %v3172_v19 = vpop.f32.mrf.mxu2 }
 0x4b1   : > { %v3420_v59 = vadd.f32 %v3419_v24, %v3418_v43  ;;  %3105 = vmatmul.bf16.gmra.mxu1 %v2912_v14  ;;  %v3173_v34 = vadd.f32 %v3172_v19, %v3083_v39 }
 0x4b3   : > { %v3421_v16 = vrot.slane %v3420_v59, 1  ;;  %v3242_v12 = vadd.f32 %v5204_v25, %v3173_v34 }
 0x4b5   : > { %v3422_v31 = vadd.f32 %v3421_v16, %v3420_v59  ;;  %v3306_v35 = vmul.f32 0.01, %v3242_v12  ;;  %vm3274_vm1 = vcmp.ge.f32.partialorder %v3242_v12, 0.0 }
 0x4b7   : > { %v5303_v23 = vsel %vm3527_vm8, %v3422_v31, %v3526_v51  ;;  %v3086_v8 = vpop.f32.mrf.mxu1  ;;  %v3338_v20 = vsel %vm3274_vm1, %v3242_v12, %v3306_v35 }
 0x4b8   : > { %v3175_v30 = vpop.f32.mrf.mxu2  ;;  %v3372_v61 = vmul.f32 %v5225_v18, %v3338_v20 }
 0x4b9   : > { %v3176_v11 = vadd.f32 %v3175_v30, %v3086_v8 }
 0x4bb   : > { %v3243_v60 = vadd.f32 %v5204_v25, %v3176_v11 }
 0x4bc   : > { %3780 = vmatmul.msk.bf16.gmra.mxu3 %vm1945_vm3, %v2883_v40 }
 0x4bd   : > { %v3307_v15 = vmul.f32 0.01, %v3243_v60  ;;  %vm3275_vm11 = vcmp.ge.f32.partialorder %v3243_v60, 0.0 }
 0x4bf   : > { %v3088_v58 = vpop.f32.mrf.mxu1  ;;  %v5322_v5 = vpop.f32.mrf.mxu3  ;;  %v3339_v3 = vsel %vm3275_vm11, %v3243_v60, %v3307_v15 }
 0x4c0   : > { %v3177_v37 = vpop.f32.mrf.mxu2  ;;  %v3373_v6 = vmul.f32 %v5223_v2, %v3339_v3 }
 0x4c1   : > { %v3178_v32 = vadd.f32 %v3177_v37, %v3088_v58 }
 0x4c3   : > { %v3244_v62 = vadd.f32 %v5204_v25, %v3178_v32 }
 0x4c5   : > { %v3308_v17 = vmul.f32 0.01, %v3244_v62  ;;  %vm3276_vm9 = vcmp.ge.f32.partialorder %v3244_v62, 0.0 }
 0x4c7   : > { %v3340_v42 = vsel %vm3276_vm9, %v3244_v62, %v3308_v17  ;;  %v5330_v59 = vpop.f32.mrf.mxu3 }
 0x4c8   : > { %v3180_v57 = vpop.f32.mrf.mxu2  ;;  %v3374_v33 = vmul.f32 %v5225_v18, %v3340_v42 }
 0x4ca   : > { %v3430_v14 = vadd.f32 %v3374_v33, %v3373_v6 }
 0x4cc   : > { %v3431_v28 = vrot.slane %v3430_v14, 4 }
 0x4ce   : > { %v3432_v30 = vadd.f32 %v3431_v28, %v3430_v14 }
 0x4d0   : > { %v3182_v46 = vpop.f32.mrf.mxu2  ;;  %v3433_v34 = vrot.slane %v3432_v30, 2 }
 0x4d2   : > { %v3434_v12 = vadd.f32 %v3433_v34, %v3432_v30 }
 0x4d3   : > { %v3091_v29 = vpop.f32.mrf.mxu1 }
 0x4d4   : > { %v3181_v7 = vadd.f32 %v3180_v57, %v3091_v29 }
 0x4d6   : > { %v3245_v45 = vadd.f32 %v5204_v25, %v3181_v7 }
 0x4d8   : > { %v3309_v49 = vmul.f32 0.01, %v3245_v45  ;;  %vm3277_vm14 = vcmp.ge.f32.partialorder %v3245_v45, 0.0 }
 0x4da   : > { %v3341_v51 = vsel %vm3277_vm14, %v3245_v45, %v3309_v49 }
 0x4db   : > { %v3093_v1 = vpop.f32.mrf.mxu1  ;;  %v3375_v24 = vmul.f32 %v5223_v2, %v3341_v51 }
 0x4dc   : > { %v2793_v21 = vpop.permute.xlu1 %2792  ;;  %v3183_v53 = vadd.f32 %v3182_v46, %v3093_v1 }
 0x4dd   : > { %v2915_v47 = vsel %vm1945_vm3, %v5241_v4, %v2793_v21  ;;  %v5334_v21 = vpop.f32.mrf.mxu3 }
 0x4de   : > { %3110 = vmatmul.bf16.gmra.mxu1 %v2915_v47  ;;  %v3246_v0 = vadd.f32 %v5204_v25, %v3183_v53 }
 0x4e0   : > { %v3310_v56 = vmul.f32 0.01, %v3246_v0  ;;  %vm3278_vm10 = vcmp.ge.f32.partialorder %v3246_v0, 0.0 }
 0x4e2   : > { %v3342_v38 = vsel %vm3278_vm10, %v3246_v0, %v3310_v56  ;;  %v3435_v0 = vrot.slane %v3434_v12, 1 }
 0x4e3   : > { %v3376_v44 = vmul.f32 %v5225_v18, %v3342_v38 }
 0x4e4   : > { %v3436_v56 = vadd.f32 %v3435_v0, %v3434_v12 }
 0x4e5   : > { %v3437_v31 = vadd.f32 %v3376_v44, %v3375_v24 }
 0x4e7   : > { %v3438_v26 = vrot.slane %v3437_v31, 4 }
 0x4e9   : > { %v3439_v37 = vadd.f32 %v3438_v26, %v3437_v31 }
 0x4eb   : > { %v3440_v32 = vrot.slane %v3439_v37, 2 }
 0x4ec   : > { %v2795_v50 = vpop.permute.xlu2 %2794 }
 0x4ed   : > { %v2918_v4 = vsel %vm1945_vm3, %v5264_v48, %v2795_v50  ;;  %v3185_v48 = vpop.f32.mrf.mxu2  ;;  %vm3273_vm3 = vcmp.ge.f32.partialorder %v3241_v27, 0.0  ;;  %v3441_v7 = vadd.f32 %v3440_v32, %v3439_v37 }
 0x4ee   : > { %3115 = vmatmul.bf16.gmra.mxu1 %v2918_v4  ;;  %v3337_v13 = vsel %vm3273_vm3, %v3241_v27, %v3305_v36  ;;  %v5338_v27 = vpop.f32.mrf.mxu3 }
 0x4ef   : > { %v3371_v63 = vmul.f32 %v5223_v2, %v3337_v13  ;;  %v3442_v45 = vrot.slane %v3441_v7, 1 }
 0x4f1   : > { %v3423_v43 = vadd.f32 %v3372_v61, %v3371_v63  ;;  %v3443_v15 = vadd.f32 %v3442_v45, %v3441_v7 }
 0x4f3   : > { %v3424_v52 = vrot.slane %v3423_v43, 4 }
 0x4f5   : > { %v3187_v16 = vpop.f32.mrf.mxu2  ;;  %v3425_v39 = vadd.f32 %v3424_v52, %v3423_v43 }
 0x4f7   : > { %v3426_v29 = vrot.slane %v3425_v39, 2 }
 0x4f9   : > { %v3427_v11 = vadd.f32 %v3426_v29, %v3425_v39 }
 0x4fb   : > { %v3428_v62 = vrot.slane %v3427_v11, 1 }
 0x4fc   : > { %v3096_v54 = vpop.f32.mrf.mxu1 }
 0x4fd   : > { %v3186_v9 = vadd.f32 %v3185_v48, %v3096_v54  ;;  %v3190_v47 = vpop.f32.mrf.mxu2  ;;  %v3429_v36 = vadd.f32 %v3428_v62, %v3427_v11 }
 0x4ff   : > { %v3247_v41 = vadd.f32 %v5204_v25, %v3186_v9  ;;  %v3530_v49 = vsel %vm3529_vm6, %v3429_v36, %v5303_v23 }
 0x500   : > { %v3532_v38 = vsel %vm3531_vm13, %v3436_v56, %v3530_v49 }
 0x501   : > { %v3311_v19 = vmul.f32 0.01, %v3247_v41  ;;  %vm3279_vm2 = vcmp.ge.f32.partialorder %v3247_v41, 0.0  ;;  %v3534_v3 = vsel %vm3533_vm7, %v3443_v15, %v3532_v38 }
 0x503   : > { %v3343_v57 = vsel %vm3279_vm2, %v3247_v41, %v3311_v19 }
 0x504   : > { %v3098_v40 = vpop.f32.mrf.mxu1  ;;  %v3377_v10 = vmul.f32 %v5223_v2, %v3343_v57 }
 0x505   : > { %v3188_v8 = vadd.f32 %v3187_v16, %v3098_v40  ;;  %v3192_v35 = vpop.f32.mrf.mxu2 }
 0x507   : > { %v3248_v58 = vadd.f32 %v5204_v25, %v3188_v8 }
 0x509   : > { %vm3280_vm12 = vcmp.ge.f32.partialorder %v3248_v58, 0.0  ;;  %v3312_v1 = vmul.f32 0.01, %v3248_v58 }
 0x50b   : > { %v3344_v46 = vsel %vm3280_vm12, %v3248_v58, %v3312_v1 }
 0x50c   : > { %v3378_v53 = vmul.f32 %v5225_v18, %v3344_v46  ;;  %v3101_v43 = vpop.f32.mrf.mxu1 }
 0x50d   : > { %v3195_v61 = vpop.f32.mrf.mxu2  ;;  %v3191_v41 = vadd.f32 %v3190_v47, %v3101_v43 }
 0x50e   : > { %v3444_v50 = vadd.f32 %v3378_v53, %v3377_v10 }
 0x50f   : > { %v5342_v42 = vpop.f32.mrf.mxu3  ;;  %v3249_v19 = vadd.f32 %v5204_v25, %v3191_v41 }
 0x510   : > { %v3445_v4 = vrot.slane %v3444_v50, 4 }
 0x511   : > { %v3313_v30 = vmul.f32 0.01, %v3249_v19  ;;  %vm3281_vm1 = vcmp.ge.f32.partialorder %v3249_v19, 0.0 }
 0x512   : > { %v3446_v60 = vadd.f32 %v3445_v4, %v3444_v50 }
 0x513   : > { %v3345_v10 = vsel %vm3281_vm1, %v3249_v19, %v3313_v30 }
 0x514   : > { %v3447_v17 = vrot.slane %v3446_v60, 2  ;;  %v3103_v9 = vpop.f32.mrf.mxu1 }
 0x515   : > { %v3197_v63 = vpop.f32.mrf.mxu2  ;;  %v3193_v40 = vadd.f32 %v3192_v35, %v3103_v9 }
 0x516   : > { %v3448_v48 = vadd.f32 %v3447_v17, %v3446_v60 }
 0x517   : > { %v3138_v51 = vpop.f32.mrf.mxu3  ;;  %v3250_v8 = vadd.f32 %v5204_v25, %v3193_v40 }
 0x518   : > { %v3449_v20 = vrot.slane %v3448_v48, 1 }
 0x519   : > { %v3314_v57 = vmul.f32 0.01, %v3250_v8  ;;  %vm3282_vm9 = vcmp.ge.f32.partialorder %v3250_v8, 0.0 }
 0x51a   : > { %v3450_v13 = vadd.f32 %v3449_v20, %v3448_v48 }
 0x51b   : > { %v3346_v50 = vsel %vm3282_vm9, %v3250_v8, %v3314_v57 }
 0x51c   : > { %v3536_v33 = vsel %vm3535_vm4, %v3450_v13, %v3534_v3  ;;  %v3380_v60 = vmul.f32 %v5225_v18, %v3346_v50 }
 0x51d   : > { %3546 = vadd.xlane.f32.xlu0 %v3536_v33  ;;  %v3200_v44 = vpop.f32.mrf.mxu2 }
 0x51f   : > { %v3215_v6 = vpop.f32.mrf.mxu3 }
 0x520   : > { %v3216_v58 = vadd.f32 %v3215_v6, %v5322_v5 }
 0x522   : > { %v5357_v53 = vadd.f32 %v5204_v25, %v3216_v58 }
 0x524   : > { %v3323_v35 = vmul.f32 0.01, %v5357_v53  ;;  %vm3291_vm3 = vcmp.ge.f32.partialorder %v5357_v53, 0.0 }
 0x525   : > { %v3202_v54 = vpop.f32.mrf.mxu2 }
 0x527   : > { %v3217_v24 = vpop.f32.mrf.mxu3 }
 0x528   : > { %v3218_v47 = vadd.f32 %v3217_v24, %v5330_v59  ;;  %v3379_v59 = vmul.f32 %v5223_v2, %v3345_v10 }
 0x52a   : > { %v3260_v4 = vadd.f32 %v5204_v25, %v3218_v47  ;;  %v3451_v47 = vadd.f32 %v3380_v60, %v3379_v59 }
 0x52c   : > { %vm3292_vm14 = vcmp.ge.f32.partialorder %v3260_v4, 0.0  ;;  %v3324_v38 = vmul.f32 0.01, %v3260_v4 }
 0x52d   : > { %v5347_v23 = vpop.f32.mrf.mxu2 }
 0x52e   : > { %v3106_v31 = vpop.f32.mrf.mxu1  ;;  %v3356_v9 = vsel %vm3292_vm14, %v3260_v4, %v3324_v38 }
 0x52f   : > { %v3220_v14 = vpop.f32.mrf.mxu3  ;;  %v3196_v46 = vadd.f32 %v3195_v61, %v3106_v31 }
 0x530   : > { %v3221_v56 = vadd.f32 %v3220_v14, %v5334_v21 }
 0x532   : > { %v3261_v21 = vadd.f32 %v5204_v25, %v3221_v56 }
 0x535   : > { %v5349_v16 = vpop.f32.mrf.mxu2 }
 0x536   : > { %v3108_v26 = vpop.f32.mrf.mxu1 }
 0x537   : > { %v3222_v52 = vpop.f32.mrf.mxu3  ;;  %v3198_v37 = vadd.f32 %v3197_v63, %v3108_v26 }
 0x538   : > { %v3223_v62 = vadd.f32 %v3222_v52, %v5338_v27 }
 0x539   : > { %v3252_v11 = vadd.f32 %v5204_v25, %v3198_v37  ;;  %v3355_v37 = vsel %vm3291_vm3, %v5357_v53, %v3323_v35 }
 0x53a   : > { %v3262_v20 = vadd.f32 %v5204_v25, %v3223_v62  ;;  %v3389_v50 = vmul.f32 %v5223_v2, %v3355_v37 }
 0x53b   : > { %v3316_v45 = vmul.f32 0.01, %v3252_v11  ;;  %vm3284_vm10 = vcmp.ge.f32.partialorder %v3252_v11, 0.0 }
 0x53d   : > { %v3210_v28 = vpop.f32.mrf.mxu2  ;;  %v3348_v61 = vsel %vm3284_vm10, %v3252_v11, %v3316_v45  ;;  %vm3294_vm10 = vcmp.ge.f32.partialorder %v3262_v20, 0.0 }
 0x53e   : > { %v3211_v1 = vadd.f32 %v3210_v28, %v5310_v22  ;;  %v3251_v22 = vadd.f32 %v5204_v25, %v3196_v46  ;;  %v3382_v6 = vmul.f32 %v5225_v18, %v3348_v61  ;;  %v3325_v28 = vmul.f32 0.01, %v3261_v21 }
 0x53f   : > { %v3225_v39 = vpop.f32.mrf.mxu3 }
 0x540   : > { %v3257_v7 = vadd.f32 %v5204_v25, %v3211_v1  ;;  %v3315_v27 = vmul.f32 0.01, %v3251_v22  ;;  %v3226_v15 = vadd.f32 %v3225_v39, %v5342_v42  ;;  %vm3283_vm2 = vcmp.ge.f32.partialorder %v3251_v22, 0.0 }
 0x542   : > { %vm3289_vm11 = vcmp.ge.f32.partialorder %v3257_v7, 0.0  ;;  %v3321_v63 = vmul.f32 0.01, %v3257_v7  ;;  %v3263_v42 = vadd.f32 %v5204_v25, %v3226_v15 }
 0x544   : > { %v3327_v40 = vmul.f32 0.01, %v3263_v42  ;;  %v3353_v8 = vsel %vm3289_vm11, %v3257_v7, %v3321_v63  ;;  %vm3295_vm14 = vcmp.ge.f32.partialorder %v3263_v42, 0.0 }
 0x545   : > { %v3212_v34 = vpop.f32.mrf.mxu2 }
 0x546   : > { %v3213_v5 = vadd.f32 %v3212_v34, %v5312_v55  ;;  %v3390_v34 = vmul.f32 %v5225_v18, %v3356_v9  ;;  %v3359_v10 = vsel %vm3295_vm14, %v3263_v42, %v3327_v40 }
 0x547   : > { %v3227_v12 = vpop.f32.mrf.mxu3  ;;  %v3393_v62 = vmul.f32 %v5223_v2, %v3359_v10 }
 0x548   : > { %v3228_v17 = vadd.f32 %v3227_v12, %v3138_v51  ;;  %v3258_v36 = vadd.f32 %v5204_v25, %v3213_v5  ;;  %v3486_v59 = vadd.f32 %v3390_v34, %v3389_v50 }
 0x54a   : > { %v3264_v3 = vadd.f32 %v5204_v25, %v3228_v17  ;;  %v3322_v33 = vmul.f32 0.01, %v3258_v36  ;;  %vm3290_vm9 = vcmp.ge.f32.partialorder %v3258_v36, 0.0  ;;  %v3487_v15 = vrot.slane %v3486_v59, 4 }
 0x54c   : > { %v3328_v14 = vmul.f32 0.01, %v3264_v3  ;;  %v3354_v52 = vsel %vm3290_vm9, %v3258_v36, %v3322_v33  ;;  %vm3296_vm0 = vcmp.ge.f32.partialorder %v3264_v3, 0.0 }
 0x54e   : > { %v3360_v57 = vsel %vm3296_vm0, %v3264_v3, %v3328_v14 }
 0x54f   : > { %v3394_v53 = vmul.f32 %v5225_v18, %v3360_v57 }
 0x55b   : > { %v3111_v29 = vpop.f32.mrf.mxu1 }
 0x55c   : > { %v3201_v32 = vadd.f32 %v3200_v44, %v3111_v29  ;;  %v3347_v44 = vsel %vm3283_vm2, %v3251_v22, %v3315_v27  ;;  %vm3293_vm2 = vcmp.ge.f32.partialorder %v3261_v21, 0.0  ;;  %v3388_v29 = vmul.f32 %v5225_v18, %v3354_v52 }
 0x55d   : > { %v3381_v41 = vmul.f32 %v5223_v2, %v3347_v44  ;;  %v3357_v46 = vsel %vm3293_vm2, %v3261_v21, %v3325_v28  ;;  %v3452_v22 = vrot.slane %v3451_v47, 4 }
 0x55e   : > { %v3253_v0 = vadd.f32 %v5204_v25, %v3201_v32  ;;  %v3387_v32 = vmul.f32 %v5223_v2, %v3353_v8  ;;  %v3391_v7 = vmul.f32 %v5223_v2, %v3357_v46 }
 0x55f   : > { %v3458_v30 = vadd.f32 %v3382_v6, %v3381_v41  ;;  %v3453_v27 = vadd.f32 %v3452_v22, %v3451_v47 }
 0x560   : > { %v3317_v49 = vmul.f32 0.01, %v3253_v0  ;;  %vm3285_vm12 = vcmp.ge.f32.partialorder %v3253_v0, 0.0  ;;  %v3479_v12 = vadd.f32 %v3388_v29, %v3387_v32 }
 0x561   : > { %v3459_v5 = vrot.slane %v3458_v30, 4 }
 0x562   : > { %v3349_v43 = vsel %vm3285_vm12, %v3253_v0, %v3317_v49  ;;  %v3480_v36 = vrot.slane %v3479_v12, 4 }
 0x563   : > { %v3113_v55 = vpop.f32.mrf.mxu1  ;;  %v3383_v39 = vmul.f32 %v5223_v2, %v3349_v43  ;;  %v3460_v17 = vadd.f32 %v3459_v5, %v3458_v30 }
 0x564   : > { %v3203_v48 = vadd.f32 %v3202_v54, %v3113_v55  ;;  %v3326_v54 = vmul.f32 0.01, %v3262_v20  ;;  %v3500_v55 = vadd.f32 %v3394_v53, %v3393_v62  ;;  %v3481_v3 = vadd.f32 %v3480_v36, %v3479_v12  ;;  %v3938_v12 = vld [vmem:[#allocation2] ss:$0 sm:$0xff] }
 0x565   : > { %v3461_v38 = vrot.slane %v3460_v17, 2 }
 0x566   : > { %v3254_v13 = vadd.f32 %v5204_v25, %v3203_v48  ;;  %v3358_v58 = vsel %vm3294_vm10, %v3262_v20, %v3326_v54  ;;  %v3501_v61 = vrot.slane %v3500_v55, 4  ;;  %v3482_v43 = vrot.slane %v3481_v3, 2 }
 0x567   : > { %v3462_v6 = vadd.f32 %v3461_v38, %v3460_v17 }
 0x568   : > { %vm3286_vm1 = vcmp.ge.f32.partialorder %v3254_v13, 0.0  ;;  %v3318_v51 = vmul.f32 0.01, %v3254_v13  ;;  %v3502_v54 = vadd.f32 %v3501_v61, %v3500_v55  ;;  %v3483_v40 = vadd.f32 %v3482_v43, %v3481_v3 }
 0x569   : > { %v3463_v41 = vrot.slane %v3462_v6, 1 }
 0x56a   : > { %v3350_v24 = vsel %vm3286_vm1, %v3254_v13, %v3318_v51  ;;  %v3454_v51 = vrot.slane %v3453_v27, 2  ;;  %v3484_v57 = vrot.slane %v3483_v40, 1 }
 0x56b   : > { %v3384_v31 = vmul.f32 %v5225_v18, %v3350_v24  ;;  %v3116_v26 = vpop.f32.mrf.mxu1 }
 0x56c   : > { %v3206_v19 = vadd.f32 %v5347_v23, %v3116_v26  ;;  %v3392_v23 = vmul.f32 %v5225_v18, %v3358_v58  ;;  %v3455_v9 = vadd.f32 %v3454_v51, %v3453_v27  ;;  %v3503_v26 = vrot.slane %v3502_v54, 2 }
 0x56d   : > { %v3465_v1 = vadd.f32 %v3384_v31, %v3383_v39 }
 0x56e   : > { %v3255_v11 = vadd.f32 %v5204_v25, %v3206_v19  ;;  %v3493_v60 = vadd.f32 %v3392_v23, %v3391_v7  ;;  %v3456_v19 = vrot.slane %v3455_v9, 1  ;;  %v3504_v37 = vadd.f32 %v3503_v26, %v3502_v54 }
 0x56f   : > { %v3466_v4 = vrot.slane %v3465_v1, 4 }
 0x570   : > { %v3319_v35 = vmul.f32 0.01, %v3255_v11  ;;  %vm3287_vm0 = vcmp.ge.f32.partialorder %v3255_v11, 0.0  ;;  %v3494_v20 = vrot.slane %v3493_v60, 4  ;;  %v3505_v23 = vrot.slane %v3504_v37, 1 }
 0x571   : > { %v3467_v56 = vadd.f32 %v3466_v4, %v3465_v1  ;;  %v3457_v1 = vadd.f32 %v3456_v19, %v3455_v9 }
 0x572   : > { %v3351_v49 = vsel %vm3287_vm0, %v3255_v11, %v3319_v35  ;;  %v3495_v42 = vadd.f32 %v3494_v20, %v3493_v60  ;;  %v3485_v11 = vadd.f32 %v3484_v57, %v3483_v40  ;;  %v3506_v22 = vadd.f32 %v3505_v23, %v3504_v37 }
 0x573   : > { %v3118_v0 = vpop.f32.mrf.mxu1  ;;  %v3468_v33 = vrot.slane %v3467_v56, 2  ;;  %v3385_v63 = vmul.f32 %v5223_v2, %v3351_v49 }
 0x574   : > { %v3208_v45 = vadd.f32 %v5349_v16, %v3118_v0  ;;  %v3488_v16 = vadd.f32 %v3487_v15, %v3486_v59  ;;  %v3496_v52 = vrot.slane %v3495_v42, 2 }
 0x575   : > { %v3469_v24 = vadd.f32 %v3468_v33, %v3467_v56 }
 0x576   : > { %v3256_v48 = vadd.f32 %v5204_v25, %v3208_v45  ;;  %v3489_v14 = vrot.slane %v3488_v16, 2  ;;  %v3497_v30 = vadd.f32 %v3496_v52, %v3495_v42 }
 0x577   : > { %v3470_v39 = vrot.slane %v3469_v24, 1 }
 0x578   : > { %vm3288_vm3 = vcmp.ge.f32.partialorder %v3256_v48, 0.0  ;;  %v3320_v13 = vmul.f32 0.01, %v3256_v48  ;;  %v3490_v2 = vadd.f32 %v3489_v14, %v3488_v16  ;;  %v3498_v46 = vrot.slane %v3497_v30, 1 }
 0x579   : > { %v3471_v29 = vadd.f32 %v3470_v39, %v3469_v24 }
 0x57a   : > { %v3352_v21 = vsel %vm3288_vm3, %v3256_v48, %v3320_v13  ;;  %v3491_v34 = vrot.slane %v3490_v2, 1  ;;  %v3499_v7 = vadd.f32 %v3498_v46, %v3497_v30 }
 0x57b   : > { %v3386_v44 = vmul.f32 %v5225_v18, %v3352_v21  ;;  %v3464_v18 = vadd.f32 %v3463_v41, %v3462_v6 }
 0x57c   : > { %v3492_v5 = vadd.f32 %v3491_v34, %v3490_v2 }
 0x57d   : > { %v3472_v25 = vadd.f32 %v3386_v44, %v3385_v63  ;;  %v3537_v10 = vsel %vm3523_vm15, %v3464_v18, %v3457_v1 }
 0x57e   : > { %v3538_v50 = vsel %vm3525_vm5, %v3471_v29, %v3537_v10 }
 0x57f   : > { %v3473_v31 = vrot.slane %v3472_v25, 4 }
 0x581   : > { %v3474_v28 = vadd.f32 %v3473_v31, %v3472_v25 }
 0x583   : > { %v3475_v8 = vrot.slane %v3474_v28, 2 }
 0x585   : > { %v3476_v58 = vadd.f32 %v3475_v8, %v3474_v28 }
 0x587   : > { %v3477_v47 = vrot.slane %v3476_v58, 1 }
 0x589   : > { %v3478_v32 = vadd.f32 %v3477_v47, %v3476_v58 }
 0x58b   : > { %v3539_v53 = vsel %vm3527_vm8, %v3478_v32, %v3538_v50 }
 0x58c   : > { %v3540_v4 = vsel %vm3529_vm6, %v3485_v11, %v3539_v53 }
 0x58d   : > { %v3541_v59 = vsel %vm3531_vm13, %v3492_v5, %v3540_v4  ;;  %vm5431_vm13 = vcmask 7168  }
 0x58e   : > { %v3542_v62 = vsel %vm3533_vm7, %v3499_v7, %v3541_v59  ;;  %vm5432_vm1 = vmmov %vm5431_vm13 }
 0x58f   : > { %v3543_v60 = vsel %vm3535_vm4, %v3506_v22, %v3542_v62 }
 0x590   : > { %v3547_v0 = vpop.xlane.xlu0 %3546  ;;  %3548 = vadd.xlane.f32.xlu1 %v3543_v60 }
 0x591   : > { %v3554_v35 = vadd.f32 %v3938_v12, %v3547_v0 }
 0x593   : > { %v3781_v45 = vmul.f32 -1.442695, %v3554_v35 }
 0x595   : > { %3939 = vpow2.f32 %v3781_v45 }
 0x59b   : > { %v3940_v17 = vpop.eup %3939 }
 0x59c   : > { %v3562_v55 = vadd.f32 1.0, %v3940_v17 }
 0x59e   : > { %3941 = vrcp.f32 %v3562_v55  ;;  %v3575_v27 = vand.u32 2147483648, %v3562_v55  ;;  %v3573_v20 = vand.u32 2147483647, %v3562_v55  ;;  %vm3569_vm5 = vweird.f32 %v3562_v55 }
 0x5a0   : > { %v3576_v13 = vor.u32 1.1754944e-38, %v3575_v27  ;;  %vm3574_vm6 = vcmp.eq.f32.partialorder %v3573_v20, 8.507059e+37 }
 0x5a4   : > { %v3942_v36 = vpop.eup %3941 }
 0x5a5   : > { %v3565_v56 = vmul.f32 %v3942_v36, %v3562_v55  ;;  %vm3570_vm15 = vweird.f32 %v3942_v36 }
 0x5a6   : > { %vm3571_vm8 = vmor %vm3569_vm5, %vm3570_vm15 }
 0x5a7   : > { %v3566_v48 = vsub.f32 1.0, %v3565_v56 }
 0x5a9   : > { %v3567_v15 = vmul.f32 %v3942_v36, %v3566_v48 }
 0x5ab   : > { %v3568_v49 = vadd.f32 %v3942_v36, %v3567_v15 }
 0x5ad   : > { %v3572_v38 = vsel %vm3571_vm8, %v3942_v36, %v3568_v49 }
 0x5ae   : > { %v3577_v61 = vsel %vm3574_vm6, %v3576_v13, %v3572_v38 }
 0x5af   : > { %3594 = vst.msk [vmem:[%s353_s12] sm:$0xff] %vm5431_vm13, %v3577_v61 }
 0x603   : > { %v3549_v3 = vpop.xlane.xlu1 %3548 }
 0x604   : > { %v3555_v33 = vadd.f32 %v3938_v12, %v3549_v3 }
 0x606   : > { %v3782_v21 = vmul.f32 -1.442695, %v3555_v33 }
 0x608   : > { %3943 = vpow2.f32 %v3782_v21 }
 0x60e   : > { %v3944_v51 = vpop.eup %3943 }
 0x60f   : > { %v3563_v16 = vadd.f32 1.0, %v3944_v51 }
 0x611   : > { %3945 = vrcp.f32 %v3563_v16  ;;  %v3590_v6 = vand.u32 2147483648, %v3563_v16  ;;  %v3588_v54 = vand.u32 2147483647, %v3563_v16  ;;  %vm3584_vm4 = vweird.f32 %v3563_v16 }
 0x613   : > { %v3591_v24 = vor.u32 1.1754944e-38, %v3590_v6  ;;  %vm3589_vm12 = vcmp.eq.f32.partialorder %v3588_v54, 8.507059e+37 }
 0x617   : > { %v3946_v63 = vpop.eup %3945 }
 0x618   : > { %v3580_v44 = vmul.f32 %v3946_v63, %v3563_v16  ;;  %vm3585_vm7 = vweird.f32 %v3946_v63 }
 0x619   : > { %vm3586_vm11 = vmor %vm3584_vm4, %vm3585_vm7 }
 0x61a   : > { %v3581_v42 = vsub.f32 1.0, %v3580_v44 }
 0x61c   : > { %v3582_v25 = vmul.f32 %v3946_v63, %v3581_v42 }
 0x61e   : > { %v3583_v43 = vadd.f32 %v3946_v63, %v3582_v25 }
 0x620   : > { %v3587_v9 = vsel %vm3586_vm11, %v3946_v63, %v3583_v43 }
 0x621   : > { %v3592_v14 = vsel %vm3589_vm12, %v3591_v24, %v3587_v9 }
 0x622   : > { %3595 = vst.msk [vmem:[%s353_s12 + $0x8] sm:$0xff] %vm5432_vm1, %v3592_v14 }
 0x623 PF: > { %s22_s11 = sadd.s32 1, %s3992_s11  }
 0x624   : > { %p19_p7 = scmp.ge.s32.totalorder %s22_s11, 4  }
 0x626   :  { %21 = sbr.rel (!%p19_p7) target bundleno = 4 (0x4), region = 93 }
 0x62b   :  { %3618 = vsyncpa [#allocation4], 1 }
 0x62c   :  { %3620 = vsyncpa [#allocation4 + $0x1], 1 }

</bundles_post_ra>
